<compile_context>
chip_gen: v7x
topology: tpu7x:2x2x1
jax: 0.10.0
libtpu: 0.0.40
codegen_flags: <defaults>
</compile_context>

<pallas_src>
import jax
import jax.numpy as jnp
from jax.experimental import pallas as pl
from jax.experimental.pallas import tpu as pltpu

EPS = 1e-5


def _round_up(v, m):
    return (v + m - 1) // m * m


# ---------------------------------------------------------------------------
# Stage A: ConvTranspose2d(k=2,s=2) + channel-concat(skip), emitted directly in
# the zero-padded flattened layout (N, (H+4)*Wp, CoutT+Cskip).
# Grid: (N, h+2); block r covers padded rows [2r, 2r+2).  r=0 and r=h+1 are the
# zero border bands; interior r maps to input row r-1.
# ---------------------------------------------------------------------------
def _make_upsample_concat_kernel(h, w, W, Wp, CoutT, Cskip):
    Ctot = CoutT + Cskip
    f32 = jnp.float32

    def kernel(x_ref, s_ref, w4_ref, b_ref, o_ref):
        r = pl.program_id(1)
        interior = jnp.logical_and(r >= 1, r <= h)

        @pl.when(jnp.logical_not(interior))
        def _():
            # top / bottom zero-padding bands of the padded image
            o_ref[0] = jnp.zeros((2 * Wp, Ctot), o_ref.dtype)

        @pl.when(interior)
        def _():
            xv = x_ref[0, 0]                    # (w, Cin), storage dtype
            bias = b_ref[...]                   # (1, Ctot) f32 (zero on skip chans)
            # One matmul per (di, dj) tap of the 2x2 transposed conv.  Output
            # columns already embedded into the full Ctot channel range.
            a = [jnp.dot(xv, w4_ref[k], preferred_element_type=f32) + bias
                 for k in range(4)]             # each (w, Ctot) f32

            # 0/1 placement matrices (built with iota compares on the VPU; the
            # dots ride the MXU).  They interleave even/odd output columns and
            # shift by the 1-column pad, producing exact zeros at the borders,
            # so a single aligned full-pitch store per row suffices.
            pi = jax.lax.broadcasted_iota(jnp.int32, (Wp, w), 0)
            ci = jax.lax.broadcasted_iota(jnp.int32, (Wp, w), 1)
            p_even = (pi == 2 * ci + 1).astype(f32)        # dj = 0 -> col 1+2c
            p_odd = (pi == 2 * ci + 2).astype(f32)         # dj = 1 -> col 2+2c
            pj = jax.lax.broadcasted_iota(jnp.int32, (Wp, W), 0)
            cj = jax.lax.broadcasted_iota(jnp.int32, (Wp, W), 1)
            p_skip = (pj == cj + 1).astype(f32)            # skip col j -> 1+j
            rs = jax.lax.broadcasted_iota(jnp.int32, (Cskip, Ctot), 0)
            cs = jax.lax.broadcasted_iota(jnp.int32, (Cskip, Ctot), 1)
            e_skip = (cs == rs + CoutT).astype(f32)        # embed skip channels

            for di in range(2):                            # two padded rows
                rowc = (jnp.dot(p_even, a[2 * di], preferred_element_type=f32)
                        + jnp.dot(p_odd, a[2 * di + 1], preferred_element_type=f32))
                sk = jnp.dot(p_skip, s_ref[0, di].astype(f32),
                             preferred_element_type=f32)   # (Wp, Cskip)
                row = rowc + jnp.dot(sk, e_skip, preferred_element_type=f32)
                o_ref[0, pl.ds(di * Wp, Wp), :] = row.astype(o_ref.dtype)

    return kernel


# ---------------------------------------------------------------------------
# Stage B (fused): conv1+BN1+ReLU (kept in VMEM scratch, padded layout) ->
# conv2+BN2 + residual 1x1 conv + bias + ReLU, one HBM pass per sample.
# ---------------------------------------------------------------------------
def _make_fused_conv_kernel(H, W, Wp, Cout):
    L = H * Wp
    start = 2 * Wp
    f32 = jnp.float32

    def kernel(xcat_ref, w1_ref, b1_ref, w2_ref, wres_ref, b2_ref, mask_ref,
               o_ref, y1_ref):
        # Zero only the padded border rows of the scratch (cheap; done every
        # step so the batch grid axis stays safely "parallel" on megacore).
        y1_ref[pl.ds(0, start), :] = jnp.zeros((start, Cout), y1_ref.dtype)
        y1_ref[pl.ds(start + L, start), :] = jnp.zeros((start, Cout), y1_ref.dtype)

        keep = mask_ref[...] > 0.5                         # (L, 1) interior cols

        # ---- conv1 (on concat buffer) + BN1 + ReLU -> VMEM scratch ----
        acc = jnp.zeros((L, Cout), f32)
        for k in range(9):
            di, dj = k // 3, k % 3
            off = start + (di - 1) * Wp + (dj - 1)         # static offsets
            v = xcat_ref[0, pl.ds(off, L), :]
            acc = acc + jnp.dot(v, w1_ref[k], preferred_element_type=f32)
        acc = jnp.maximum(acc + b1_ref[...], 0.0)
        acc = jnp.where(keep, acc, 0.0)                    # zero pad columns
        y1_ref[pl.ds(start, L), :] = acc.astype(y1_ref.dtype)

        # ---- conv2 + BN2 + residual 1x1 conv + bias + ReLU ----
        acc2 = jnp.zeros((L, Cout), f32)
        for k in range(9):
            di, dj = k // 3, k % 3
            off = start + (di - 1) * Wp + (dj - 1)
            v = y1_ref[pl.ds(off, L), :]
            acc2 = acc2 + jnp.dot(v, w2_ref[k], preferred_element_type=f32)
        # residual = convT output = first CoutT channels of the concat buffer;
        # channel selection folded into wres (zero rows for skip channels).
        rv = xcat_ref[0, pl.ds(start, L), :]
        acc2 = acc2 + jnp.dot(rv, wres_ref[...], preferred_element_type=f32)
        acc2 = acc2 + b2_ref[...]
        o_ref[0] = jnp.maximum(acc2, 0.0).astype(o_ref.dtype)

    return kernel


# ---------------------------------------------------------------------------
# Wrapper
# ---------------------------------------------------------------------------
def _fold_bn(conv_w, bn):
    gamma, beta, mean, var = bn
    scale = gamma / jnp.sqrt(var + EPS)
    return conv_w * scale[:, None, None, None], beta - mean * scale


def decoder_v3_forward(x, skip, p):
    """x: (N, convT_channels, h, w) NCHW; skip: (N, in_channels, 2h, 2w) NCHW."""
    N, Cin, h, w = x.shape
    _, Cskip, H, W = skip.shape
    CoutT = p["convT_w"].shape[1]
    Cout = p["conv1_w"].shape[0]
    Ctot = CoutT + Cskip
    sd = x.dtype                      # storage dtype (bf16 or f32); accum is f32

    Wp = _round_up(W + 2, 8)          # sublane-aligned padded row pitch
    Mp = (H + 4) * Wp
    L = H * Wp

    # interface transposes (NCHW -> NHWC); everything else stays pixel-major
    x_nhwc = jnp.transpose(x, (0, 2, 3, 1)).astype(sd)           # (N, h, w, Cin)
    skip_nhwc = jnp.transpose(skip, (0, 2, 3, 1)).astype(sd)     # (N, H, W, Cskip)

    # ConvT weights: (Cin, CoutT, 2, 2) -> (di*2+dj, Cin, Ctot) with the CoutT
    # output channels embedded at [0:CoutT]; bias zero-extended the same way.
    w4c = jnp.transpose(p["convT_w"], (2, 3, 0, 1)).reshape(4, Cin, CoutT)
    w4 = jnp.concatenate([w4c, jnp.zeros((4, Cin, Cskip), w4c.dtype)], axis=-1).astype(sd)
    bT = jnp.concatenate(
        [p["convT_b"], jnp.zeros((Cskip,), jnp.float32)]).reshape(1, Ctot).astype(jnp.float32)

    # BN-folded conv weights (inference-mode BN).
    w1, shift1 = _fold_bn(p["conv1_w"], p["bn1"])
    w1k = jnp.transpose(w1, (2, 3, 1, 0)).reshape(9, Ctot, Cout).astype(sd)
    b1 = shift1.reshape(1, Cout).astype(jnp.float32)

    w2, shift2 = _fold_bn(p["conv2_w"], p["bn2"])
    w2k = jnp.transpose(w2, (2, 3, 1, 0)).reshape(9, Cout, Cout).astype(sd)
    wres_c = jnp.transpose(p["convres_w"].reshape(Cout, CoutT), (1, 0))
    wres = jnp.concatenate([wres_c, jnp.zeros((Cskip, Cout), wres_c.dtype)], axis=0).astype(sd)
    b2 = (shift2 + p["convres_b"]).reshape(1, Cout).astype(jnp.float32)

    # interior-column mask of the padded row pitch (grid-invariant operand)
    col = jnp.arange(Wp, dtype=jnp.int32)
    mask = jnp.tile((col >= 1) & (col <= W), H).reshape(L, 1).astype(jnp.float32)

    def _edge(r):
        return jnp.clip(r - 1, 0, h - 1)

    # ---- Stage A: convT + concat + zero-pad layout ----
    xcat = pl.pallas_call(
        _make_upsample_concat_kernel(h, w, W, Wp, CoutT, Cskip),
        out_shape=jax.ShapeDtypeStruct((N, Mp, Ctot), sd),
        grid_spec=pltpu.PrefetchScalarGridSpec(
            num_scalar_prefetch=0,
            grid=(N, h + 2),
            in_specs=[
                pl.BlockSpec((1, 1, w, Cin), lambda n, r: (n, _edge(r), 0, 0)),
                pl.BlockSpec((1, 2, W, Cskip), lambda n, r: (n, _edge(r), 0, 0)),
                pl.BlockSpec((4, Cin, Ctot), lambda n, r: (0, 0, 0)),
                pl.BlockSpec((1, Ctot), lambda n, r: (0, 0)),
            ],
            out_specs=pl.BlockSpec((1, 2 * Wp, Ctot), lambda n, r: (n, r, 0)),
        ),
        compiler_params=pltpu.CompilerParams(
            dimension_semantics=("parallel", "parallel")),
    )(x_nhwc, skip_nhwc, w4, bT)

    # ---- Stage B: fused conv1+BN1+ReLU -> conv2+BN2 + residual + ReLU ----
    y = pl.pallas_call(
        _make_fused_conv_kernel(H, W, Wp, Cout),
        out_shape=jax.ShapeDtypeStruct((N, L, Cout), sd),
        grid_spec=pltpu.PrefetchScalarGridSpec(
            num_scalar_prefetch=0,
            grid=(N,),
            in_specs=[
                pl.BlockSpec((1, Mp, Ctot), lambda n: (n, 0, 0)),
                pl.BlockSpec((9, Ctot, Cout), lambda n: (0, 0, 0)),
                pl.BlockSpec((1, Cout), lambda n: (0, 0)),
                pl.BlockSpec((9, Cout, Cout), lambda n: (0, 0, 0)),
                pl.BlockSpec((Ctot, Cout), lambda n: (0, 0)),
                pl.BlockSpec((1, Cout), lambda n: (0, 0)),
                pl.BlockSpec((L, 1), lambda n: (0, 0)),
            ],
            out_specs=pl.BlockSpec((1, L, Cout), lambda n: (n, 0, 0)),
            scratch_shapes=[pltpu.VMEM((Mp, Cout), sd)],
        ),
        compiler_params=pltpu.CompilerParams(
            dimension_semantics=("parallel",)),
    )(xcat, w1k, b1, w2k, wres, b2, mask)

    out = y.reshape(N, H, Wp, Cout)[:, :, 1:W + 1, :]
    return jnp.transpose(out, (0, 3, 1, 2))   # NCHW


# ---------------------------------------------------------------------------
# Pure-JAX reference (eval-mode BN), same semantics as the PyTorch forward.
# ---------------------------------------------------------------------------
def _ref_forward(x, skip, p):
    hi = jax.lax.Precision.HIGHEST
    yt = jnp.einsum("nchw,cdij->ndhiwj", x, p["convT_w"], precision=hi)
    N, D, hh, _, ww, _ = yt.shape
    yt = yt.reshape(N, D, 2 * hh, 2 * ww) + p["convT_b"][None, :, None, None]
    residual = yt
    xc = jnp.concatenate([yt, skip], axis=1)

    def conv_bn(v, wt, bn):
        y = jax.lax.conv_general_dilated(v, wt, (1, 1), ((1, 1), (1, 1)),
                                         dimension_numbers=("NCHW", "OIHW", "NCHW"),
                                         precision=hi)
        g, b, m, var = bn
        return ((y - m[None, :, None, None]) / jnp.sqrt(var + EPS)[None, :, None, None]
                * g[None, :, None, None] + b[None, :, None, None])

    y = jax.nn.relu(conv_bn(xc, p["conv1_w"], p["bn1"]))
    y = conv_bn(y, p["conv2_w"], p["bn2"])
    res = jax.lax.conv_general_dilated(residual, p["convres_w"], (1, 1), ((0, 0), (0, 0)),
                                       dimension_numbers=("NCHW", "OIHW", "NCHW"),
                                       precision=hi)
    res = res + p["convres_b"][None, :, None, None]
    return jax.nn.relu(y + res)


if __name__ == "__main__":
    key = jax.random.PRNGKey(0)
    ks = jax.random.split(key, 10)

    # Decoder_v3(in_channels=4, convT_channels=8, out_channels=8, convT_ratio=2)
    N = 2
    in_channels, convT_channels, out_channels = 4, 8, 8
    CoutT = convT_channels // 2
    h = w = 8
    H, W = 2 * h, 2 * w

    def uni(k, shape, bound):
        return jax.random.uniform(k, shape, minval=-bound, maxval=bound, dtype=jnp.float32)

    def bn_params(k, c):
        k1, k2, k3, k4 = jax.random.split(k, 4)
        return (jax.random.uniform(k1, (c,), minval=0.5, maxval=1.5, dtype=jnp.float32),
                uni(k2, (c,), 0.2),
                0.1 * jax.random.normal(k3, (c,), dtype=jnp.float32),
                jax.random.uniform(k4, (c,), minval=0.5, maxval=1.5, dtype=jnp.float32))

    x = jax.random.normal(ks[0], (N, convT_channels, h, w), dtype=jnp.float32)
    skip = jax.random.normal(ks[1], (N, in_channels, H, W), dtype=jnp.float32)

    Cin1 = in_channels + CoutT
    params = {
        "convT_w": uni(ks[2], (convT_channels, CoutT, 2, 2), (convT_channels * 4) ** -0.5),
        "convT_b": uni(ks[3], (CoutT,), (convT_channels * 4) ** -0.5),
        "conv1_w": uni(ks[4], (out_channels, Cin1, 3, 3), (Cin1 * 9) ** -0.5),
        "bn1": bn_params(ks[5], out_channels),
        "conv2_w": uni(ks[6], (out_channels, out_channels, 3, 3), (out_channels * 9) ** -0.5),
        "bn2": bn_params(ks[7], out_channels),
        "convres_w": uni(ks[8], (out_channels, CoutT, 1, 1), CoutT ** -0.5),
        "convres_b": uni(ks[9], (out_channels,), CoutT ** -0.5),
    }

    fwd = jax.jit(decoder_v3_forward)
    ref = _ref_forward(x, skip, params)

    # f32 storage path: tight check against the f32 reference.
    out = fwd(x, skip, params)
    jax.block_until_ready(out)
    assert out.shape == ref.shape == (N, out_channels, H, W)
    err_f32 = float(jnp.max(jnp.abs(out - ref)))
    assert err_f32 < 2e-3, f"f32 max abs error {err_f32}"

    # bf16 storage path (f32 accumulation inside the kernels): loose check —
    # activations/weights are quantized to bf16, so ~1e-2 absolute error is expected.
    out_bf = fwd(x.astype(jnp.bfloat16), skip.astype(jnp.bfloat16), params)
    jax.block_until_ready(out_bf)
    err_bf = float(jnp.max(jnp.abs(out_bf.astype(jnp.float32) - ref)))
    assert err_bf < 1e-1, f"bf16 max abs error {err_bf}"

    print("KERNEL_OK")
</pallas_src>

<mosaic_0001>
module attributes {stable_mosaic.version = 11 : i64} {
  func.func @kernel(%arg0: i32, %arg1: i32, %arg2: memref<1x1x8x8xf32, #tpu.memory_space<vmem>>, %arg3: memref<1x2x16x4xf32, #tpu.memory_space<vmem>>, %arg4: memref<4x8x8xf32, #tpu.memory_space<vmem>>, %arg5: memref<1x8xf32, #tpu.memory_space<vmem>>, %arg6: memref<1x48x8xf32, #tpu.memory_space<vmem>>) attributes {dimension_semantics = [#tpu.dimension_semantics<parallel>, #tpu.dimension_semantics<parallel>], iteration_bounds = array<i64: 2, 10>, scalar_prefetch = 0 : i64, scratch_operands = 0 : i64, tpu.core_type = #tpu.core_type<tc>, window_params = [{transform_indices = @transform_0, window_bounds = array<i64: 1, 1, 8, 8>}, {transform_indices = @transform_1, window_bounds = array<i64: 1, 2, 16, 4>}, {pipeline_mode = #tpu.pipeline_mode<synchronous>, transform_indices = @transform_2, window_bounds = array<i64: 4, 8, 8>}, {pipeline_mode = #tpu.pipeline_mode<synchronous>, transform_indices = @transform_3, window_bounds = array<i64: 1, 8>}, {transform_indices = @transform_4, window_bounds = array<i64: 1, 48, 8>}]} {
    %c1_i32 = arith.constant 1 : i32
    %0 = arith.cmpi sge, %arg1, %c1_i32 : i32
    %c8_i32 = arith.constant 8 : i32
    %1 = arith.cmpi sle, %arg1, %c8_i32 : i32
    %2 = arith.andi %0, %1 : i1
    %true = arith.constant true
    %3 = arith.xori %2, %true : i1
    %4 = arith.extui %3 : i1 to i32
    %c0_i32 = arith.constant 0 : i32
    %5 = arith.cmpi ne, %4, %c0_i32 : i32
    scf.if %5 {
      %cst = arith.constant 0.000000e+00 : f32
      %8 = vector.broadcast %cst : f32 to vector<48x8xf32>
      %c0 = arith.constant 0 : index
      %c0_1 = arith.constant 0 : index
      %c0_2 = arith.constant 0 : index
      %9 = vector.load %arg6[%c0, %c0_1, %c0_2] : memref<1x48x8xf32, #tpu.memory_space<vmem>>, vector<1x48x8xf32>
      %10 = vector.shape_cast %9 : vector<1x48x8xf32> to vector<48x8xf32>
      %11 = vector.shape_cast %8 : vector<48x8xf32> to vector<1x48x8xf32>
      tpu.vector_store %arg6[%c0, %c0_1, %c0_2], %11 {strides = array<i32>} : memref<1x48x8xf32, #tpu.memory_space<vmem>>, vector<1x48x8xf32>,
    } else {
    }
    %6 = arith.extui %2 : i1 to i32
    %c0_i32_0 = arith.constant 0 : i32
    %7 = arith.cmpi ne, %6, %c0_i32_0 : i32
    scf.if %7 {
      %c0 = arith.constant 0 : index
      %c0_1 = arith.constant 0 : index
      %c0_2 = arith.constant 0 : index
      %c0_3 = arith.constant 0 : index
      %8 = vector.load %arg2[%c0, %c0_1, %c0_2, %c0_3] : memref<1x1x8x8xf32, #tpu.memory_space<vmem>>, vector<1x1x8x8xf32>
      %9 = vector.shape_cast %8 : vector<1x1x8x8xf32> to vector<8x8xf32>
      %c0_4 = arith.constant 0 : index
      %c0_5 = arith.constant 0 : index
      %10 = vector.load %arg5[%c0_4, %c0_5] : memref<1x8xf32, #tpu.memory_space<vmem>>, vector<1x8xf32>
      %c0_6 = arith.constant 0 : index
      %c0_7 = arith.constant 0 : index
      %c0_8 = arith.constant 0 : index
      %11 = vector.load %arg4[%c0_6, %c0_7, %c0_8] : memref<4x8x8xf32, #tpu.memory_space<vmem>>, vector<1x8x8xf32>
      %12 = vector.shape_cast %11 : vector<1x8x8xf32> to vector<8x8xf32>
      %cst = arith.constant dense<0.000000e+00> : vector<8x8xf32>
      %13 = tpu.matmul %9, %12, %cst {dimension_numbers = #tpu.dot_dimension_numbers<[1], [0], [0], [1], [0, 0, 1, 1], [], []>} : vector<8x8xf32>, vector<8x8xf32>, vector<8x8xf32> -> vector<8x8xf32>
      %14 = vector.broadcast %10 : vector<1x8xf32> to vector<8x8xf32>
      %15 = arith.addf %13, %14 : vector<8x8xf32>
      %c1 = arith.constant 1 : index
      %c0_9 = arith.constant 0 : index
      %c0_10 = arith.constant 0 : index
      %16 = vector.load %arg4[%c1, %c0_9, %c0_10] : memref<4x8x8xf32, #tpu.memory_space<vmem>>, vector<1x8x8xf32>
      %17 = vector.shape_cast %16 : vector<1x8x8xf32> to vector<8x8xf32>
      %cst_11 = arith.constant dense<0.000000e+00> : vector<8x8xf32>
      %18 = tpu.matmul %9, %17, %cst_11 {dimension_numbers = #tpu.dot_dimension_numbers<[1], [0], [0], [1], [0, 0, 1, 1], [], []>} : vector<8x8xf32>, vector<8x8xf32>, vector<8x8xf32> -> vector<8x8xf32>
      %19 = vector.broadcast %10 : vector<1x8xf32> to vector<8x8xf32>
      %20 = arith.addf %18, %19 : vector<8x8xf32>
      %c2 = arith.constant 2 : index
      %c0_12 = arith.constant 0 : index
      %c0_13 = arith.constant 0 : index
      %21 = vector.load %arg4[%c2, %c0_12, %c0_13] : memref<4x8x8xf32, #tpu.memory_space<vmem>>, vector<1x8x8xf32>
      %22 = vector.shape_cast %21 : vector<1x8x8xf32> to vector<8x8xf32>
      %cst_14 = arith.constant dense<0.000000e+00> : vector<8x8xf32>
      %23 = tpu.matmul %9, %22, %cst_14 {dimension_numbers = #tpu.dot_dimension_numbers<[1], [0], [0], [1], [0, 0, 1, 1], [], []>} : vector<8x8xf32>, vector<8x8xf32>, vector<8x8xf32> -> vector<8x8xf32>
      %24 = vector.broadcast %10 : vector<1x8xf32> to vector<8x8xf32>
      %25 = arith.addf %23, %24 : vector<8x8xf32>
      %c3 = arith.constant 3 : index
      %c0_15 = arith.constant 0 : index
      %c0_16 = arith.constant 0 : index
      %26 = vector.load %arg4[%c3, %c0_15, %c0_16] : memref<4x8x8xf32, #tpu.memory_space<vmem>>, vector<1x8x8xf32>
      %27 = vector.shape_cast %26 : vector<1x8x8xf32> to vector<8x8xf32>
      %cst_17 = arith.constant dense<0.000000e+00> : vector<8x8xf32>
      %28 = tpu.matmul %9, %27, %cst_17 {dimension_numbers = #tpu.dot_dimension_numbers<[1], [0], [0], [1], [0, 0, 1, 1], [], []>} : vector<8x8xf32>, vector<8x8xf32>, vector<8x8xf32> -> vector<8x8xf32>
      %29 = vector.broadcast %10 : vector<1x8xf32> to vector<8x8xf32>
      %30 = arith.addf %28, %29 : vector<8x8xf32>
      %31 = tpu.iota {dimensions = array<i32: 0>} : vector<24x8xi32>
      %32 = tpu.iota {dimensions = array<i32: 1>} : vector<24x8xi32>
      %c2_i32 = arith.constant 2 : i32
      %33 = vector.broadcast %c2_i32 : i32 to vector<24x8xi32>
      %34 = arith.muli %33, %32 : vector<24x8xi32>
      %c1_i32_18 = arith.constant 1 : i32
      %35 = vector.broadcast %c1_i32_18 : i32 to vector<24x8xi32>
      %36 = arith.addi %34, %35 : vector<24x8xi32>
      %37 = arith.cmpi eq, %31, %36 : vector<24x8xi32>
      %38 = arith.extui %37 : vector<24x8xi1> to vector<24x8xi32>
      %39 = arith.sitofp %38 : vector<24x8xi32> to vector<24x8xf32>
      %c2_i32_19 = arith.constant 2 : i32
      %40 = vector.broadcast %c2_i32_19 : i32 to vector<24x8xi32>
      %41 = arith.muli %40, %32 : vector<24x8xi32>
      %c2_i32_20 = arith.constant 2 : i32
      %42 = vector.broadcast %c2_i32_20 : i32 to vector<24x8xi32>
      %43 = arith.addi %41, %42 : vector<24x8xi32>
      %44 = arith.cmpi eq, %31, %43 : vector<24x8xi32>
      %45 = arith.extui %44 : vector<24x8xi1> to vector<24x8xi32>
      %46 = arith.sitofp %45 : vector<24x8xi32> to vector<24x8xf32>
      %47 = tpu.iota {dimensions = array<i32: 0>} : vector<24x16xi32>
      %48 = tpu.iota {dimensions = array<i32: 1>} : vector<24x16xi32>
      %c1_i32_21 = arith.constant 1 : i32
      %49 = vector.broadcast %c1_i32_21 : i32 to vector<24x16xi32>
      %50 = arith.addi %48, %49 : vector<24x16xi32>
      %51 = arith.cmpi eq, %47, %50 : vector<24x16xi32>
      %52 = arith.extui %51 : vector<24x16xi1> to vector<24x16xi32>
      %53 = arith.sitofp %52 : vector<24x16xi32> to vector<24x16xf32>
      %54 = tpu.iota {dimensions = array<i32: 0>} : vector<4x8xi32>
      %55 = tpu.iota {dimensions = array<i32: 1>} : vector<4x8xi32>
      %c4_i32 = arith.constant 4 : i32
      %56 = vector.broadcast %c4_i32 : i32 to vector<4x8xi32>
      %57 = arith.addi %54, %56 : vector<4x8xi32>
      %58 = arith.cmpi eq, %55, %57 : vector<4x8xi32>
      %59 = arith.extui %58 : vector<4x8xi1> to vector<4x8xi32>
      %60 = arith.sitofp %59 : vector<4x8xi32> to vector<4x8xf32>
      %cst_22 = arith.constant dense<0.000000e+00> : vector<24x8xf32>
      %61 = tpu.matmul %39, %15, %cst_22 {dimension_numbers = #tpu.dot_dimension_numbers<[1], [0], [0], [1], [0, 0, 1, 1], [], []>} : vector<24x8xf32>, vector<8x8xf32>, vector<24x8xf32> -> vector<24x8xf32>
      %cst_23 = arith.constant dense<0.000000e+00> : vector<24x8xf32>
      %62 = tpu.matmul %46, %20, %cst_23 {dimension_numbers = #tpu.dot_dimension_numbers<[1], [0], [0], [1], [0, 0, 1, 1], [], []>} : vector<24x8xf32>, vector<8x8xf32>, vector<24x8xf32> -> vector<24x8xf32>
      %63 = arith.addf %61, %62 : vector<24x8xf32>
      %c0_24 = arith.constant 0 : index
      %c0_25 = arith.constant 0 : index
      %c0_26 = arith.constant 0 : index
      %c0_27 = arith.constant 0 : index
      %64 = vector.load %arg3[%c0_24, %c0_25, %c0_26, %c0_27] : memref<1x2x16x4xf32, #tpu.memory_space<vmem>>, vector<1x1x16x4xf32>
      %65 = vector.shape_cast %64 : vector<1x1x16x4xf32> to vector<16x4xf32>
      %cst_28 = arith.constant dense<0.000000e+00> : vector<24x4xf32>
      %66 = tpu.matmul %53, %65, %cst_28 {dimension_numbers = #tpu.dot_dimension_numbers<[1], [0], [0], [1], [0, 0, 1, 1], [], []>} : vector<24x16xf32>, vector<16x4xf32>, vector<24x4xf32> -> vector<24x4xf32>
      %cst_29 = arith.constant dense<0.000000e+00> : vector<24x8xf32>
      %67 = tpu.matmul %66, %60, %cst_29 {dimension_numbers = #tpu.dot_dimension_numbers<[1], [0], [0], [1], [0, 0, 1, 1], [], []>} : vector<24x4xf32>, vector<4x8xf32>, vector<24x8xf32> -> vector<24x8xf32>
      %68 = arith.addf %63, %67 : vector<24x8xf32>
      %c0_30 = arith.constant 0 : index
      %c0_31 = arith.constant 0 : index
      %c0_32 = arith.constant 0 : index
      %69 = vector.load %arg6[%c0_30, %c0_31, %c0_32] : memref<1x48x8xf32, #tpu.memory_space<vmem>>, vector<1x24x8xf32>
      %70 = vector.shape_cast %69 : vector<1x24x8xf32> to vector<24x8xf32>
      %71 = vector.shape_cast %68 : vector<24x8xf32> to vector<1x24x8xf32>
      tpu.vector_store %arg6[%c0_30, %c0_31, %c0_32], %71 {strides = array<i32>} : memref<1x48x8xf32, #tpu.memory_space<vmem>>, vector<1x24x8xf32>,
      %cst_33 = arith.constant dense<0.000000e+00> : vector<24x8xf32>
      %72 = tpu.matmul %39, %25, %cst_33 {dimension_numbers = #tpu.dot_dimension_numbers<[1], [0], [0], [1], [0, 0, 1, 1], [], []>} : vector<24x8xf32>, vector<8x8xf32>, vector<24x8xf32> -> vector<24x8xf32>
      %cst_34 = arith.constant dense<0.000000e+00> : vector<24x8xf32>
      %73 = tpu.matmul %46, %30, %cst_34 {dimension_numbers = #tpu.dot_dimension_numbers<[1], [0], [0], [1], [0, 0, 1, 1], [], []>} : vector<24x8xf32>, vector<8x8xf32>, vector<24x8xf32> -> vector<24x8xf32>
      %74 = arith.addf %72, %73 : vector<24x8xf32>
      %c0_35 = arith.constant 0 : index
      %c1_36 = arith.constant 1 : index
      %c0_37 = arith.constant 0 : index
      %c0_38 = arith.constant 0 : index
      %75 = vector.load %arg3[%c0_35, %c1_36, %c0_37, %c0_38] : memref<1x2x16x4xf32, #tpu.memory_space<vmem>>, vector<1x1x16x4xf32>
      %76 = vector.shape_cast %75 : vector<1x1x16x4xf32> to vector<16x4xf32>
      %cst_39 = arith.constant dense<0.000000e+00> : vector<24x4xf32>
      %77 = tpu.matmul %53, %76, %cst_39 {dimension_numbers = #tpu.dot_dimension_numbers<[1], [0], [0], [1], [0, 0, 1, 1], [], []>} : vector<24x16xf32>, vector<16x4xf32>, vector<24x4xf32> -> vector<24x4xf32>
      %cst_40 = arith.constant dense<0.000000e+00> : vector<24x8xf32>
      %78 = tpu.matmul %77, %60, %cst_40 {dimension_numbers = #tpu.dot_dimension_numbers<[1], [0], [0], [1], [0, 0, 1, 1], [], []>} : vector<24x4xf32>, vector<4x8xf32>, vector<24x8xf32> -> vector<24x8xf32>
      %79 = arith.addf %74, %78 : vector<24x8xf32>
      %c0_41 = arith.constant 0 : index
      %c24 = arith.constant 24 : index
      %c0_42 = arith.constant 0 : index
      %80 = vector.load %arg6[%c0_41, %c24, %c0_42] : memref<1x48x8xf32, #tpu.memory_space<vmem>>, vector<1x24x8xf32>
      %81 = vector.shape_cast %80 : vector<1x24x8xf32> to vector<24x8xf32>
      %82 = vector.shape_cast %79 : vector<24x8xf32> to vector<1x24x8xf32>
      tpu.vector_store %arg6[%c0_41, %c24, %c0_42], %82 {strides = array<i32>} : memref<1x48x8xf32, #tpu.memory_space<vmem>>, vector<1x24x8xf32>,
    } else {
    }
    return
  }
  func.func @transform_0(%arg0: i32, %arg1: i32) -> (i32, i32, i32, i32) {
    %c1_i32 = arith.constant 1 : i32
    %0 = arith.subi %arg1, %c1_i32 : i32
    %c0_i32 = arith.constant 0 : i32
    %c7_i32 = arith.constant 7 : i32
    %1 = arith.maxsi %c0_i32, %0 : i32
    %2 = arith.minsi %c7_i32, %1 : i32
    %c0_i32_0 = arith.constant 0 : i32
    %c0_i32_1 = arith.constant 0 : i32
    %c0_i32_2 = arith.constant 0 : i32
    return %arg0, %2, %c0_i32_0, %c0_i32_1 : i32, i32, i32, i32
  }
  func.func @transform_1(%arg0: i32, %arg1: i32) -> (i32, i32, i32, i32) {
    %c1_i32 = arith.constant 1 : i32
    %0 = arith.subi %arg1, %c1_i32 : i32
    %c0_i32 = arith.constant 0 : i32
    %c7_i32 = arith.constant 7 : i32
    %1 = arith.maxsi %c0_i32, %0 : i32
    %2 = arith.minsi %c7_i32, %1 : i32
    %c0_i32_0 = arith.constant 0 : i32
    %c0_i32_1 = arith.constant 0 : i32
    %c0_i32_2 = arith.constant 0 : i32
    return %arg0, %2, %c0_i32_0, %c0_i32_1 : i32, i32, i32, i32
  }
  func.func @transform_2(%arg0: i32, %arg1: i32) -> (i32, i32, i32) {
    %c0_i32 = arith.constant 0 : i32
    %c0_i32_0 = arith.constant 0 : i32
    %c0_i32_1 = arith.constant 0 : i32
    %c0_i32_2 = arith.constant 0 : i32
    return %c0_i32, %c0_i32_0, %c0_i32_1 : i32, i32, i32
  }
  func.func @transform_3(%arg0: i32, %arg1: i32) -> (i32, i32) {
    %c0_i32 = arith.constant 0 : i32
    %c0_i32_0 = arith.constant 0 : i32
    %c0_i32_1 = arith.constant 0 : i32
    return %c0_i32, %c0_i32_0 : i32, i32
  }
  func.func @transform_4(%arg0: i32, %arg1: i32) -> (i32, i32, i32) {
    %c0_i32 = arith.constant 0 : i32
    %c0_i32_0 = arith.constant 0 : i32
    return %arg0, %arg1, %c0_i32 : i32, i32, i32
  }
}

module attributes {stable_mosaic.version = 11 : i64} {
  func.func @kernel(%arg0: i32, %arg1: memref<1x480x8xf32, #tpu.memory_space<vmem>>, %arg2: memref<9x8x8xf32, #tpu.memory_space<vmem>>, %arg3: memref<1x8xf32, #tpu.memory_space<vmem>>, %arg4: memref<9x8x8xf32, #tpu.memory_space<vmem>>, %arg5: memref<8x8xf32, #tpu.memory_space<vmem>>, %arg6: memref<1x8xf32, #tpu.memory_space<vmem>>, %arg7: memref<384x1xf32, #tpu.memory_space<vmem>>, %arg8: memref<1x384x8xf32, #tpu.memory_space<vmem>>, %arg9: memref<480x8xf32, #tpu.memory_space<vmem>>) attributes {dimension_semantics = [#tpu.dimension_semantics<parallel>], iteration_bounds = array<i64: 2>, scalar_prefetch = 0 : i64, scratch_operands = 1 : i64, tpu.core_type = #tpu.core_type<tc>, window_params = [{transform_indices = @transform_0, window_bounds = array<i64: 1, 480, 8>}, {pipeline_mode = #tpu.pipeline_mode<synchronous>, transform_indices = @transform_1, window_bounds = array<i64: 9, 8, 8>}, {pipeline_mode = #tpu.pipeline_mode<synchronous>, transform_indices = @transform_2, window_bounds = array<i64: 1, 8>}, {pipeline_mode = #tpu.pipeline_mode<synchronous>, transform_indices = @transform_3, window_bounds = array<i64: 9, 8, 8>}, {pipeline_mode = #tpu.pipeline_mode<synchronous>, transform_indices = @transform_4, window_bounds = array<i64: 8, 8>}, {pipeline_mode = #tpu.pipeline_mode<synchronous>, transform_indices = @transform_5, window_bounds = array<i64: 1, 8>}, {pipeline_mode = #tpu.pipeline_mode<synchronous>, transform_indices = @transform_6, window_bounds = array<i64: 384, 1>}, {transform_indices = @transform_7, window_bounds = array<i64: 1, 384, 8>}]} {
    %cst = arith.constant 0.000000e+00 : f32
    %0 = vector.broadcast %cst : f32 to vector<48x8xf32>
    %c0 = arith.constant 0 : index
    %c0_0 = arith.constant 0 : index
    %1 = vector.load %arg9[%c0, %c0_0] : memref<480x8xf32, #tpu.memory_space<vmem>>, vector<48x8xf32>
    tpu.vector_store %arg9[%c0, %c0_0], %0 {strides = array<i32>} : memref<480x8xf32, #tpu.memory_space<vmem>>, vector<48x8xf32>,
    %cst_1 = arith.constant 0.000000e+00 : f32
    %2 = vector.broadcast %cst_1 : f32 to vector<48x8xf32>
    %c432 = arith.constant 432 : index
    %c0_2 = arith.constant 0 : index
    %3 = vector.load %arg9[%c432, %c0_2] : memref<480x8xf32, #tpu.memory_space<vmem>>, vector<48x8xf32>
    tpu.vector_store %arg9[%c432, %c0_2], %2 {strides = array<i32>} : memref<480x8xf32, #tpu.memory_space<vmem>>, vector<48x8xf32>,
    %c0_3 = arith.constant 0 : index
    %c0_4 = arith.constant 0 : index
    %4 = vector.load %arg7[%c0_3, %c0_4] : memref<384x1xf32, #tpu.memory_space<vmem>>, vector<384x1xf32>
    %cst_5 = arith.constant 5.000000e-01 : f32
    %5 = vector.broadcast %cst_5 : f32 to vector<384x1xf32>
    %6 = arith.cmpf ogt, %4, %5 : vector<384x1xf32>
    %cst_6 = arith.constant 0.000000e+00 : f32
    %7 = vector.broadcast %cst_6 : f32 to vector<384x8xf32>
    %c0_7 = arith.constant 0 : index
    %c23 = arith.constant 23 : index
    %c0_8 = arith.constant 0 : index
    %8 = vector.load %arg1[%c0_7, %c23, %c0_8] : memref<1x480x8xf32, #tpu.memory_space<vmem>>, vector<1x384x8xf32>
    %9 = vector.shape_cast %8 : vector<1x384x8xf32> to vector<384x8xf32>
    %c0_9 = arith.constant 0 : index
    %c0_10 = arith.constant 0 : index
    %c0_11 = arith.constant 0 : index
    %10 = vector.load %arg2[%c0_9, %c0_10, %c0_11] : memref<9x8x8xf32, #tpu.memory_space<vmem>>, vector<1x8x8xf32>
    %11 = vector.shape_cast %10 : vector<1x8x8xf32> to vector<8x8xf32>
    %cst_12 = arith.constant dense<0.000000e+00> : vector<384x8xf32>
    %12 = tpu.matmul %9, %11, %cst_12 {dimension_numbers = #tpu.dot_dimension_numbers<[1], [0], [0], [1], [0, 0, 1, 1], [], []>} : vector<384x8xf32>, vector<8x8xf32>, vector<384x8xf32> -> vector<384x8xf32>
    %13 = arith.addf %7, %12 : vector<384x8xf32>
    %c0_13 = arith.constant 0 : index
    %c24 = arith.constant 24 : index
    %c0_14 = arith.constant 0 : index
    %14 = vector.load %arg1[%c0_13, %c24, %c0_14] : memref<1x480x8xf32, #tpu.memory_space<vmem>>, vector<1x384x8xf32>
    %15 = vector.shape_cast %14 : vector<1x384x8xf32> to vector<384x8xf32>
    %c1 = arith.constant 1 : index
    %c0_15 = arith.constant 0 : index
    %c0_16 = arith.constant 0 : index
    %16 = vector.load %arg2[%c1, %c0_15, %c0_16] : memref<9x8x8xf32, #tpu.memory_space<vmem>>, vector<1x8x8xf32>
    %17 = vector.shape_cast %16 : vector<1x8x8xf32> to vector<8x8xf32>
    %cst_17 = arith.constant dense<0.000000e+00> : vector<384x8xf32>
    %18 = tpu.matmul %15, %17, %cst_17 {dimension_numbers = #tpu.dot_dimension_numbers<[1], [0], [0], [1], [0, 0, 1, 1], [], []>} : vector<384x8xf32>, vector<8x8xf32>, vector<384x8xf32> -> vector<384x8xf32>
    %19 = arith.addf %13, %18 : vector<384x8xf32>
    %c0_18 = arith.constant 0 : index
    %c25 = arith.constant 25 : index
    %c0_19 = arith.constant 0 : index
    %20 = vector.load %arg1[%c0_18, %c25, %c0_19] : memref<1x480x8xf32, #tpu.memory_space<vmem>>, vector<1x384x8xf32>
    %21 = vector.shape_cast %20 : vector<1x384x8xf32> to vector<384x8xf32>
    %c2 = arith.constant 2 : index
    %c0_20 = arith.constant 0 : index
    %c0_21 = arith.constant 0 : index
    %22 = vector.load %arg2[%c2, %c0_20, %c0_21] : memref<9x8x8xf32, #tpu.memory_space<vmem>>, vector<1x8x8xf32>
    %23 = vector.shape_cast %22 : vector<1x8x8xf32> to vector<8x8xf32>
    %cst_22 = arith.constant dense<0.000000e+00> : vector<384x8xf32>
    %24 = tpu.matmul %21, %23, %cst_22 {dimension_numbers = #tpu.dot_dimension_numbers<[1], [0], [0], [1], [0, 0, 1, 1], [], []>} : vector<384x8xf32>, vector<8x8xf32>, vector<384x8xf32> -> vector<384x8xf32>
    %25 = arith.addf %19, %24 : vector<384x8xf32>
    %c0_23 = arith.constant 0 : index
    %c47 = arith.constant 47 : index
    %c0_24 = arith.constant 0 : index
    %26 = vector.load %arg1[%c0_23, %c47, %c0_24] : memref<1x480x8xf32, #tpu.memory_space<vmem>>, vector<1x384x8xf32>
    %27 = vector.shape_cast %26 : vector<1x384x8xf32> to vector<384x8xf32>
    %c3 = arith.constant 3 : index
    %c0_25 = arith.constant 0 : index
    %c0_26 = arith.constant 0 : index
    %28 = vector.load %arg2[%c3, %c0_25, %c0_26] : memref<9x8x8xf32, #tpu.memory_space<vmem>>, vector<1x8x8xf32>
    %29 = vector.shape_cast %28 : vector<1x8x8xf32> to vector<8x8xf32>
    %cst_27 = arith.constant dense<0.000000e+00> : vector<384x8xf32>
    %30 = tpu.matmul %27, %29, %cst_27 {dimension_numbers = #tpu.dot_dimension_numbers<[1], [0], [0], [1], [0, 0, 1, 1], [], []>} : vector<384x8xf32>, vector<8x8xf32>, vector<384x8xf32> -> vector<384x8xf32>
    %31 = arith.addf %25, %30 : vector<384x8xf32>
    %c0_28 = arith.constant 0 : index
    %c48 = arith.constant 48 : index
    %c0_29 = arith.constant 0 : index
    %32 = vector.load %arg1[%c0_28, %c48, %c0_29] : memref<1x480x8xf32, #tpu.memory_space<vmem>>, vector<1x384x8xf32>
    %33 = vector.shape_cast %32 : vector<1x384x8xf32> to vector<384x8xf32>
    %c4 = arith.constant 4 : index
    %c0_30 = arith.constant 0 : index
    %c0_31 = arith.constant 0 : index
    %34 = vector.load %arg2[%c4, %c0_30, %c0_31] : memref<9x8x8xf32, #tpu.memory_space<vmem>>, vector<1x8x8xf32>
    %35 = vector.shape_cast %34 : vector<1x8x8xf32> to vector<8x8xf32>
    %cst_32 = arith.constant dense<0.000000e+00> : vector<384x8xf32>
    %36 = tpu.matmul %33, %35, %cst_32 {dimension_numbers = #tpu.dot_dimension_numbers<[1], [0], [0], [1], [0, 0, 1, 1], [], []>} : vector<384x8xf32>, vector<8x8xf32>, vector<384x8xf32> -> vector<384x8xf32>
    %37 = arith.addf %31, %36 : vector<384x8xf32>
    %c0_33 = arith.constant 0 : index
    %c49 = arith.constant 49 : index
    %c0_34 = arith.constant 0 : index
    %38 = vector.load %arg1[%c0_33, %c49, %c0_34] : memref<1x480x8xf32, #tpu.memory_space<vmem>>, vector<1x384x8xf32>
    %39 = vector.shape_cast %38 : vector<1x384x8xf32> to vector<384x8xf32>
    %c5 = arith.constant 5 : index
    %c0_35 = arith.constant 0 : index
    %c0_36 = arith.constant 0 : index
    %40 = vector.load %arg2[%c5, %c0_35, %c0_36] : memref<9x8x8xf32, #tpu.memory_space<vmem>>, vector<1x8x8xf32>
    %41 = vector.shape_cast %40 : vector<1x8x8xf32> to vector<8x8xf32>
    %cst_37 = arith.constant dense<0.000000e+00> : vector<384x8xf32>
    %42 = tpu.matmul %39, %41, %cst_37 {dimension_numbers = #tpu.dot_dimension_numbers<[1], [0], [0], [1], [0, 0, 1, 1], [], []>} : vector<384x8xf32>, vector<8x8xf32>, vector<384x8xf32> -> vector<384x8xf32>
    %43 = arith.addf %37, %42 : vector<384x8xf32>
    %c0_38 = arith.constant 0 : index
    %c71 = arith.constant 71 : index
    %c0_39 = arith.constant 0 : index
    %44 = vector.load %arg1[%c0_38, %c71, %c0_39] : memref<1x480x8xf32, #tpu.memory_space<vmem>>, vector<1x384x8xf32>
    %45 = vector.shape_cast %44 : vector<1x384x8xf32> to vector<384x8xf32>
    %c6 = arith.constant 6 : index
    %c0_40 = arith.constant 0 : index
    %c0_41 = arith.constant 0 : index
    %46 = vector.load %arg2[%c6, %c0_40, %c0_41] : memref<9x8x8xf32, #tpu.memory_space<vmem>>, vector<1x8x8xf32>
    %47 = vector.shape_cast %46 : vector<1x8x8xf32> to vector<8x8xf32>
    %cst_42 = arith.constant dense<0.000000e+00> : vector<384x8xf32>
    %48 = tpu.matmul %45, %47, %cst_42 {dimension_numbers = #tpu.dot_dimension_numbers<[1], [0], [0], [1], [0, 0, 1, 1], [], []>} : vector<384x8xf32>, vector<8x8xf32>, vector<384x8xf32> -> vector<384x8xf32>
    %49 = arith.addf %43, %48 : vector<384x8xf32>
    %c0_43 = arith.constant 0 : index
    %c72 = arith.constant 72 : index
    %c0_44 = arith.constant 0 : index
    %50 = vector.load %arg1[%c0_43, %c72, %c0_44] : memref<1x480x8xf32, #tpu.memory_space<vmem>>, vector<1x384x8xf32>
    %51 = vector.shape_cast %50 : vector<1x384x8xf32> to vector<384x8xf32>
    %c7 = arith.constant 7 : index
    %c0_45 = arith.constant 0 : index
    %c0_46 = arith.constant 0 : index
    %52 = vector.load %arg2[%c7, %c0_45, %c0_46] : memref<9x8x8xf32, #tpu.memory_space<vmem>>, vector<1x8x8xf32>
    %53 = vector.shape_cast %52 : vector<1x8x8xf32> to vector<8x8xf32>
    %cst_47 = arith.constant dense<0.000000e+00> : vector<384x8xf32>
    %54 = tpu.matmul %51, %53, %cst_47 {dimension_numbers = #tpu.dot_dimension_numbers<[1], [0], [0], [1], [0, 0, 1, 1], [], []>} : vector<384x8xf32>, vector<8x8xf32>, vector<384x8xf32> -> vector<384x8xf32>
    %55 = arith.addf %49, %54 : vector<384x8xf32>
    %c0_48 = arith.constant 0 : index
    %c73 = arith.constant 73 : index
    %c0_49 = arith.constant 0 : index
    %56 = vector.load %arg1[%c0_48, %c73, %c0_49] : memref<1x480x8xf32, #tpu.memory_space<vmem>>, vector<1x384x8xf32>
    %57 = vector.shape_cast %56 : vector<1x384x8xf32> to vector<384x8xf32>
    %c8 = arith.constant 8 : index
    %c0_50 = arith.constant 0 : index
    %c0_51 = arith.constant 0 : index
    %58 = vector.load %arg2[%c8, %c0_50, %c0_51] : memref<9x8x8xf32, #tpu.memory_space<vmem>>, vector<1x8x8xf32>
    %59 = vector.shape_cast %58 : vector<1x8x8xf32> to vector<8x8xf32>
    %cst_52 = arith.constant dense<0.000000e+00> : vector<384x8xf32>
    %60 = tpu.matmul %57, %59, %cst_52 {dimension_numbers = #tpu.dot_dimension_numbers<[1], [0], [0], [1], [0, 0, 1, 1], [], []>} : vector<384x8xf32>, vector<8x8xf32>, vector<384x8xf32> -> vector<384x8xf32>
    %61 = arith.addf %55, %60 : vector<384x8xf32>
    %c0_53 = arith.constant 0 : index
    %c0_54 = arith.constant 0 : index
    %62 = vector.load %arg3[%c0_53, %c0_54] : memref<1x8xf32, #tpu.memory_space<vmem>>, vector<1x8xf32>
    %63 = vector.broadcast %62 : vector<1x8xf32> to vector<384x8xf32>
    %64 = arith.addf %61, %63 : vector<384x8xf32>
    %cst_55 = arith.constant 0.000000e+00 : f32
    %65 = vector.broadcast %cst_55 : f32 to vector<384x8xf32>
    %66 = arith.maximumf %64, %65 : vector<384x8xf32>
    %cst_56 = arith.constant 0.000000e+00 : f32
    %67 = vector.shape_cast %6 : vector<384x1xi1> to vector<384x1xi1>
    %68 = vector.broadcast %67 : vector<384x1xi1> to vector<384x8xi1>
    %69 = vector.broadcast %cst_56 : f32 to vector<384x8xf32>
    %70 = arith.select %68, %66, %69 : vector<384x8xi1>, vector<384x8xf32>
    %c48_57 = arith.constant 48 : index
    %c0_58 = arith.constant 0 : index
    %71 = vector.load %arg9[%c48_57, %c0_58] : memref<480x8xf32, #tpu.memory_space<vmem>>, vector<384x8xf32>
    tpu.vector_store %arg9[%c48_57, %c0_58], %70 {strides = array<i32>} : memref<480x8xf32, #tpu.memory_space<vmem>>, vector<384x8xf32>,
    %cst_59 = arith.constant 0.000000e+00 : f32
    %72 = vector.broadcast %cst_59 : f32 to vector<384x8xf32>
    %c23_60 = arith.constant 23 : index
    %c0_61 = arith.constant 0 : index
    %73 = vector.load %arg9[%c23_60, %c0_61] : memref<480x8xf32, #tpu.memory_space<vmem>>, vector<384x8xf32>
    %c0_62 = arith.constant 0 : index
    %c0_63 = arith.constant 0 : index
    %c0_64 = arith.constant 0 : index
    %74 = vector.load %arg4[%c0_62, %c0_63, %c0_64] : memref<9x8x8xf32, #tpu.memory_space<vmem>>, vector<1x8x8xf32>
    %75 = vector.shape_cast %74 : vector<1x8x8xf32> to vector<8x8xf32>
    %cst_65 = arith.constant dense<0.000000e+00> : vector<384x8xf32>
    %76 = tpu.matmul %73, %75, %cst_65 {dimension_numbers = #tpu.dot_dimension_numbers<[1], [0], [0], [1], [0, 0, 1, 1], [], []>} : vector<384x8xf32>, vector<8x8xf32>, vector<384x8xf32> -> vector<384x8xf32>
    %77 = arith.addf %72, %76 : vector<384x8xf32>
    %c24_66 = arith.constant 24 : index
    %c0_67 = arith.constant 0 : index
    %78 = vector.load %arg9[%c24_66, %c0_67] : memref<480x8xf32, #tpu.memory_space<vmem>>, vector<384x8xf32>
    %c1_68 = arith.constant 1 : index
    %c0_69 = arith.constant 0 : index
    %c0_70 = arith.constant 0 : index
    %79 = vector.load %arg4[%c1_68, %c0_69, %c0_70] : memref<9x8x8xf32, #tpu.memory_space<vmem>>, vector<1x8x8xf32>
    %80 = vector.shape_cast %79 : vector<1x8x8xf32> to vector<8x8xf32>
    %cst_71 = arith.constant dense<0.000000e+00> : vector<384x8xf32>
    %81 = tpu.matmul %78, %80, %cst_71 {dimension_numbers = #tpu.dot_dimension_numbers<[1], [0], [0], [1], [0, 0, 1, 1], [], []>} : vector<384x8xf32>, vector<8x8xf32>, vector<384x8xf32> -> vector<384x8xf32>
    %82 = arith.addf %77, %81 : vector<384x8xf32>
    %c25_72 = arith.constant 25 : index
    %c0_73 = arith.constant 0 : index
    %83 = vector.load %arg9[%c25_72, %c0_73] : memref<480x8xf32, #tpu.memory_space<vmem>>, vector<384x8xf32>
    %c2_74 = arith.constant 2 : index
    %c0_75 = arith.constant 0 : index
    %c0_76 = arith.constant 0 : index
    %84 = vector.load %arg4[%c2_74, %c0_75, %c0_76] : memref<9x8x8xf32, #tpu.memory_space<vmem>>, vector<1x8x8xf32>
    %85 = vector.shape_cast %84 : vector<1x8x8xf32> to vector<8x8xf32>
    %cst_77 = arith.constant dense<0.000000e+00> : vector<384x8xf32>
    %86 = tpu.matmul %83, %85, %cst_77 {dimension_numbers = #tpu.dot_dimension_numbers<[1], [0], [0], [1], [0, 0, 1, 1], [], []>} : vector<384x8xf32>, vector<8x8xf32>, vector<384x8xf32> -> vector<384x8xf32>
    %87 = arith.addf %82, %86 : vector<384x8xf32>
    %c47_78 = arith.constant 47 : index
    %c0_79 = arith.constant 0 : index
    %88 = vector.load %arg9[%c47_78, %c0_79] : memref<480x8xf32, #tpu.memory_space<vmem>>, vector<384x8xf32>
    %c3_80 = arith.constant 3 : index
    %c0_81 = arith.constant 0 : index
    %c0_82 = arith.constant 0 : index
    %89 = vector.load %arg4[%c3_80, %c0_81, %c0_82] : memref<9x8x8xf32, #tpu.memory_space<vmem>>, vector<1x8x8xf32>
    %90 = vector.shape_cast %89 : vector<1x8x8xf32> to vector<8x8xf32>
    %cst_83 = arith.constant dense<0.000000e+00> : vector<384x8xf32>
    %91 = tpu.matmul %88, %90, %cst_83 {dimension_numbers = #tpu.dot_dimension_numbers<[1], [0], [0], [1], [0, 0, 1, 1], [], []>} : vector<384x8xf32>, vector<8x8xf32>, vector<384x8xf32> -> vector<384x8xf32>
    %92 = arith.addf %87, %91 : vector<384x8xf32>
    %c48_84 = arith.constant 48 : index
    %c0_85 = arith.constant 0 : index
    %93 = vector.load %arg9[%c48_84, %c0_85] : memref<480x8xf32, #tpu.memory_space<vmem>>, vector<384x8xf32>
    %c4_86 = arith.constant 4 : index
    %c0_87 = arith.constant 0 : index
    %c0_88 = arith.constant 0 : index
    %94 = vector.load %arg4[%c4_86, %c0_87, %c0_88] : memref<9x8x8xf32, #tpu.memory_space<vmem>>, vector<1x8x8xf32>
    %95 = vector.shape_cast %94 : vector<1x8x8xf32> to vector<8x8xf32>
    %cst_89 = arith.constant dense<0.000000e+00> : vector<384x8xf32>
    %96 = tpu.matmul %93, %95, %cst_89 {dimension_numbers = #tpu.dot_dimension_numbers<[1], [0], [0], [1], [0, 0, 1, 1], [], []>} : vector<384x8xf32>, vector<8x8xf32>, vector<384x8xf32> -> vector<384x8xf32>
    %97 = arith.addf %92, %96 : vector<384x8xf32>
    %c49_90 = arith.constant 49 : index
    %c0_91 = arith.constant 0 : index
    %98 = vector.load %arg9[%c49_90, %c0_91] : memref<480x8xf32, #tpu.memory_space<vmem>>, vector<384x8xf32>
    %c5_92 = arith.constant 5 : index
    %c0_93 = arith.constant 0 : index
    %c0_94 = arith.constant 0 : index
    %99 = vector.load %arg4[%c5_92, %c0_93, %c0_94] : memref<9x8x8xf32, #tpu.memory_space<vmem>>, vector<1x8x8xf32>
    %100 = vector.shape_cast %99 : vector<1x8x8xf32> to vector<8x8xf32>
    %cst_95 = arith.constant dense<0.000000e+00> : vector<384x8xf32>
    %101 = tpu.matmul %98, %100, %cst_95 {dimension_numbers = #tpu.dot_dimension_numbers<[1], [0], [0], [1], [0, 0, 1, 1], [], []>} : vector<384x8xf32>, vector<8x8xf32>, vector<384x8xf32> -> vector<384x8xf32>
    %102 = arith.addf %97, %101 : vector<384x8xf32>
    %c71_96 = arith.constant 71 : index
    %c0_97 = arith.constant 0 : index
    %103 = vector.load %arg9[%c71_96, %c0_97] : memref<480x8xf32, #tpu.memory_space<vmem>>, vector<384x8xf32>
    %c6_98 = arith.constant 6 : index
    %c0_99 = arith.constant 0 : index
    %c0_100 = arith.constant 0 : index
    %104 = vector.load %arg4[%c6_98, %c0_99, %c0_100] : memref<9x8x8xf32, #tpu.memory_space<vmem>>, vector<1x8x8xf32>
    %105 = vector.shape_cast %104 : vector<1x8x8xf32> to vector<8x8xf32>
    %cst_101 = arith.constant dense<0.000000e+00> : vector<384x8xf32>
    %106 = tpu.matmul %103, %105, %cst_101 {dimension_numbers = #tpu.dot_dimension_numbers<[1], [0], [0], [1], [0, 0, 1, 1], [], []>} : vector<384x8xf32>, vector<8x8xf32>, vector<384x8xf32> -> vector<384x8xf32>
    %107 = arith.addf %102, %106 : vector<384x8xf32>
    %c72_102 = arith.constant 72 : index
    %c0_103 = arith.constant 0 : index
    %108 = vector.load %arg9[%c72_102, %c0_103] : memref<480x8xf32, #tpu.memory_space<vmem>>, vector<384x8xf32>
    %c7_104 = arith.constant 7 : index
    %c0_105 = arith.constant 0 : index
    %c0_106 = arith.constant 0 : index
    %109 = vector.load %arg4[%c7_104, %c0_105, %c0_106] : memref<9x8x8xf32, #tpu.memory_space<vmem>>, vector<1x8x8xf32>
    %110 = vector.shape_cast %109 : vector<1x8x8xf32> to vector<8x8xf32>
    %cst_107 = arith.constant dense<0.000000e+00> : vector<384x8xf32>
    %111 = tpu.matmul %108, %110, %cst_107 {dimension_numbers = #tpu.dot_dimension_numbers<[1], [0], [0], [1], [0, 0, 1, 1], [], []>} : vector<384x8xf32>, vector<8x8xf32>, vector<384x8xf32> -> vector<384x8xf32>
    %112 = arith.addf %107, %111 : vector<384x8xf32>
    %c73_108 = arith.constant 73 : index
    %c0_109 = arith.constant 0 : index
    %113 = vector.load %arg9[%c73_108, %c0_109] : memref<480x8xf32, #tpu.memory_space<vmem>>, vector<384x8xf32>
    %c8_110 = arith.constant 8 : index
    %c0_111 = arith.constant 0 : index
    %c0_112 = arith.constant 0 : index
    %114 = vector.load %arg4[%c8_110, %c0_111, %c0_112] : memref<9x8x8xf32, #tpu.memory_space<vmem>>, vector<1x8x8xf32>
    %115 = vector.shape_cast %114 : vector<1x8x8xf32> to vector<8x8xf32>
    %cst_113 = arith.constant dense<0.000000e+00> : vector<384x8xf32>
    %116 = tpu.matmul %113, %115, %cst_113 {dimension_numbers = #tpu.dot_dimension_numbers<[1], [0], [0], [1], [0, 0, 1, 1], [], []>} : vector<384x8xf32>, vector<8x8xf32>, vector<384x8xf32> -> vector<384x8xf32>
    %117 = arith.addf %112, %116 : vector<384x8xf32>
    %c0_114 = arith.constant 0 : index
    %c48_115 = arith.constant 48 : index
    %c0_116 = arith.constant 0 : index
    %118 = vector.load %arg1[%c0_114, %c48_115, %c0_116] : memref<1x480x8xf32, #tpu.memory_space<vmem>>, vector<1x384x8xf32>
    %119 = vector.shape_cast %118 : vector<1x384x8xf32> to vector<384x8xf32>
    %c0_117 = arith.constant 0 : index
    %c0_118 = arith.constant 0 : index
    %120 = vector.load %arg5[%c0_117, %c0_118] : memref<8x8xf32, #tpu.memory_space<vmem>>, vector<8x8xf32>
    %cst_119 = arith.constant dense<0.000000e+00> : vector<384x8xf32>
    %121 = tpu.matmul %119, %120, %cst_119 {dimension_numbers = #tpu.dot_dimension_numbers<[1], [0], [0], [1], [0, 0, 1, 1], [], []>} : vector<384x8xf32>, vector<8x8xf32>, vector<384x8xf32> -> vector<384x8xf32>
    %122 = arith.addf %117, %121 : vector<384x8xf32>
    %c0_120 = arith.constant 0 : index
    %c0_121 = arith.constant 0 : index
    %123 = vector.load %arg6[%c0_120, %c0_121] : memref<1x8xf32, #tpu.memory_space<vmem>>, vector<1x8xf32>
    %124 = vector.broadcast %123 : vector<1x8xf32> to vector<384x8xf32>
    %125 = arith.addf %122, %124 : vector<384x8xf32>
    %cst_122 = arith.constant 0.000000e+00 : f32
    %126 = vector.broadcast %cst_122 : f32 to vector<384x8xf32>
    %127 = arith.maximumf %125, %126 : vector<384x8xf32>
    %c0_123 = arith.constant 0 : index
    %c0_124 = arith.constant 0 : index
    %c0_125 = arith.constant 0 : index
    %128 = vector.load %arg8[%c0_123, %c0_124, %c0_125] : memref<1x384x8xf32, #tpu.memory_space<vmem>>, vector<1x384x8xf32>
    %129 = vector.shape_cast %128 : vector<1x384x8xf32> to vector<384x8xf32>
    %130 = vector.shape_cast %127 : vector<384x8xf32> to vector<1x384x8xf32>
    tpu.vector_store %arg8[%c0_123, %c0_124, %c0_125], %130 {strides = array<i32>} : memref<1x384x8xf32, #tpu.memory_space<vmem>>, vector<1x384x8xf32>,
    return
  }
  func.func @transform_0(%arg0: i32) -> (i32, i32, i32) {
    %c0_i32 = arith.constant 0 : i32
    %c0_i32_0 = arith.constant 0 : i32
    %c0_i32_1 = arith.constant 0 : i32
    return %arg0, %c0_i32, %c0_i32_0 : i32, i32, i32
  }
  func.func @transform_1(%arg0: i32) -> (i32, i32, i32) {
    %c0_i32 = arith.constant 0 : i32
    %c0_i32_0 = arith.constant 0 : i32
    %c0_i32_1 = arith.constant 0 : i32
    %c0_i32_2 = arith.constant 0 : i32
    return %c0_i32, %c0_i32_0, %c0_i32_1 : i32, i32, i32
  }
  func.func @transform_2(%arg0: i32) -> (i32, i32) {
    %c0_i32 = arith.constant 0 : i32
    %c0_i32_0 = arith.constant 0 : i32
    %c0_i32_1 = arith.constant 0 : i32
    return %c0_i32, %c0_i32_0 : i32, i32
  }
  func.func @transform_3(%arg0: i32) -> (i32, i32, i32) {
    %c0_i32 = arith.constant 0 : i32
    %c0_i32_0 = arith.constant 0 : i32
    %c0_i32_1 = arith.constant 0 : i32
    %c0_i32_2 = arith.constant 0 : i32
    return %c0_i32, %c0_i32_0, %c0_i32_1 : i32, i32, i32
  }
  func.func @transform_4(%arg0: i32) -> (i32, i32) {
    %c0_i32 = arith.constant 0 : i32
    %c0_i32_0 = arith.constant 0 : i32
    %c0_i32_1 = arith.constant 0 : i32
    return %c0_i32, %c0_i32_0 : i32, i32
  }
  func.func @transform_5(%arg0: i32) -> (i32, i32) {
    %c0_i32 = arith.constant 0 : i32
    %c0_i32_0 = arith.constant 0 : i32
    %c0_i32_1 = arith.constant 0 : i32
    return %c0_i32, %c0_i32_0 : i32, i32
  }
  func.func @transform_6(%arg0: i32) -> (i32, i32) {
    %c0_i32 = arith.constant 0 : i32
    %c0_i32_0 = arith.constant 0 : i32
    %c0_i32_1 = arith.constant 0 : i32
    return %c0_i32, %c0_i32_0 : i32, i32
  }
  func.func @transform_7(%arg0: i32) -> (i32, i32, i32) {
    %c0_i32 = arith.constant 0 : i32
    %c0_i32_0 = arith.constant 0 : i32
    %c0_i32_1 = arith.constant 0 : i32
    return %arg0, %c0_i32, %c0_i32_0 : i32, i32, i32
  }
}

</mosaic_0001>

<bundles_post_ra>
// kernel: decoder_v3_forward.2
= control target key start
LH: loop header
LB: loop body
LE: loop exit
PB: predicated region body
PF: predicated region fallthrough
CT: control target
= control target key end

     0   :  { %s1922_s15 = smov 0   ;;  %s1924_s16 = smov 0   ;;  %s2176_s0 = inlined_call_operand.vmem [shape: f32[2,8,8,8], index: 0, kind: input, shape index: {}]   ;;  %s2177_s1 = inlined_call_operand.vmem [shape: f32[2,16,16,4], index: 1, kind: input, shape index: {}]   ;;  %s2178_s2 = inlined_call_operand.vmem [shape: f32[4,8,8], index: 2, kind: input, shape index: {}]   ;;  %s2179_s3 = inlined_call_operand.vmem [shape: f32[1,8], index: 3, kind: input, shape index: {}]   ;;  %s2180_s4 = inlined_call_operand.vmem [shape: f32[2,480,8], index: 4, kind: output, shape index: {}]  }
   0x1   :  { %s1926_s17 = smov 0   ;;  %s1928_s18 = smov 0  }
   0x2   :  { %s1930_s19 = smov 0  }
   0x3 LB: > { %s23_s20 = sadd.s32 1, %s1883_s17  ;;  %s26_s21 = sadd.s32 1, %s1887_s18  ;;  %s1891_s19 = sphi %s1930_s19, %s14_s19   ;;  %s1887_s18 = sphi %s1928_s18, %s2185_s18   ;;  %s1883_s17 = sphi %s1926_s17, %s2184_s17   ;;  %s1879_s16 = sphi %s1924_s16, %s2183_s16   ;;  %s1875_s15 = sphi %s1922_s15, %s2182_s15  }
   0x4   : > { %p24_p0 = scmp.ge.s32.totalorder %s23_s20, 10  ;;  %p1544_p1 = scmp.ge.s32.totalorder %s1891_s19, 1 }
   0x5   : > { %p239_p2 = scmp.lt.s32.totalorder %s1891_s19, 21 }
   0x6   : > { %s2187_s20 = smov (%p24_p0, %s23_s20), 0  ;;  %s2189_s21 = smov (!%p24_p0, %s26_s21), %s1887_s18 }
   0x7   : > { %p240_p3 = pnand %p1544_p1, %p239_p2  ;;  %p28_p4 = scmp.ge.s32.totalorder %s2189_s21, 2 }
   0x8   : > { %s1545_s22 = sadd.s32 (!%p240_p3), 4294967295, %s1875_s15  ;;  %p297_p5 = scmp.lt.s32.totalorder (!%p240_p3), %s1879_s16, 1 }
   0x9   : > { %s2191_s21 = smov (%p28_p4, %s2189_s21), 0  ;;  %243 = sbr.rel (%p240_p3) target bundleno = 717 (0x2cd), region = 36 }
   0xa   : > { %p293_p6 = scmp.gt.s32.totalorder (!%p240_p3), %s1545_s22, 0  ;;  %p1546_p7 = scmp.lt.s32.totalorder (!%p240_p3), %s1545_s22, 7 }
   0xb   : > { %s331_s25 = smul.u32 (!%p240_p3), 6, %s1875_s15  ;;  %p341_p8 = scmp.ge.s32.totalorder (!%p240_p3), %s1875_s15, 1 }
   0xc   : > { %p342_p12 = scmp.le.s32.totalorder (!%p240_p3), %s1875_s15, 8 }
   0xd   : > { %p334_p11 = scmp.lt.s32.totalorder (!%p240_p3), %s331_s25, 59 }
   0xe   : > { %p1968_p13 = pnand (!%p240_p3), %p342_p12, %p341_p8 }
  0x10   : > { %s2193_s16 = smov (!%p297_p5, %s1879_s16), 1  ;;  %s2195_s22 = smov (!%p293_p6, %s1545_s22), 0 }
  0x11   : > { %s1551_s23 = sshll.u32 %s2193_s16, 3  ;;  %s1561_s24 = sshll.u32 %s2193_s16, 5  ;;  %v1566_v0 = vld [vmem:[%s2178_s2 + $0x8] sm:$0xff] (!%p1968_p13)  ;;  %vm356_vm0 = vcmask (!%p1968_p13), 64512   ;;  %v349_v2 = vld [vmem:[%s2178_s2] sm:$0xff] (!%p1968_p13)  ;;  %v646_v3 = vlaneseq (!%p1968_p13)  ;;  %v1893_v4 = vmov (!%p1968_p13), 0.0  }
  0x12   : > { %s2197_s22 = smov (!%p1546_p7, %s2195_s22), 7  ;;  %s1808_s28 = smul.u32 60, %s2193_s16  ;;  %1671 = vmatprep.subr.mxu1 (!%p1968_p13), %v1893_v4  ;;  %vm1894_vm1 = vmmov (!%p1968_p13), 0   ;;  %1666 = vmatprep.subr.mxu0 (!%p1968_p13), %v1893_v4  ;;  %v1570_v7 = vld [vmem:[%s2178_s2 + $0x18] sm:$0xff] (!%p1968_p13)  ;;  %v1895_v13 = vmov (!%p1968_p13), 0.0|0.0   ;;  %v1568_v14 = vld [vmem:[%s2178_s2 + $0x10] sm:$0xff] (!%p1968_p13) }
  0x13   : > { %p299_p9 = scmp.lt.s32.totalorder %s2197_s22, 7  ;;  %s1559_s26 = sshll.u32 %s2197_s22, 1  ;;  %1673 = vmatprep.mubr.msk.f32.mxu1 (!%p1968_p13), %vm1894_vm1, %v1893_v4  ;;  %1672 = vmatpush3.msra.mxu1 (!%p1968_p13), %v1566_v0  ;;  %v1994_v8 = vshrl.u32 (!%p1968_p13), %v646_v3, 7  ;;  %v1996_v9 = vand.u32 (!%p1968_p13), 127, %v646_v3  ;;  %vm867_vm3 = vcmask (!%p1968_p13), 130048   ;;  %vm967_vm11 = vcmask (!%p1968_p13), 1043456  }
  0x14   : > { %p318_p10 = scmp.lt.s32.totalorder %s1559_s26, 15  ;;  %s2203_s25 = smov (!%p334_p11, %s331_s25), 59  ;;  %1667 = vmatpush3.msra.mxu0 (!%p1968_p13), %v349_v2  ;;  %1668 = vmatprep.mubr.msk.f32.mxu0 (!%p1968_p13), %vm1894_vm1, %v1893_v4  ;;  %v1564_v21 = vld [vmem:[%s2179_s3] ss:$0 sm:$0xff] (!%p1968_p13)  ;;  %vm957_vm14 = vcmask (!%p1968_p13), 31744  }
  0x15   : > { %s2199_s22 = smov (!%p299_p9, %s2197_s22), 7  ;;  %s337_s14 = sadd.s32 %s1808_s28, %s2203_s25  ;;  %1681 = vmatprep.subr.mxu1 (!%p1968_p13), %v1893_v4  ;;  %v673_v11 = vadd.s32 (!%p1968_p13), 1, %v1996_v9  ;;  %v2005_v12 = vadd.s32 (!%p1968_p13), 8, %v1994_v8  ;;  %1676 = vmatprep.subr.mxu0 (!%p1968_p13), %v1893_v4  ;;  %v2023_v16 = vadd.s32 (!%p1968_p13), 16, %v1994_v8  ;;  %v652_v19 = vmul.u32 (!%p1968_p13), 2, %v1996_v9 }
  0x16   : > { %s2201_s26 = smov (!%p318_p10, %s1559_s26), 15  ;;  %s302_s27 = sadd.s32 %s1551_s23, %s2199_s22  ;;  %v683_v34 = vadd.s32 (!%p1968_p13), 4, %v1994_v8 }
  0x17   : > { %s1552_s29 = sshll.u32 %s302_s27, 3  ;;  %s1560_s30 = sshll.u32 %s2201_s26, 1  ;;  %vm674_vm2 = vcmp.eq.s32.totalorder (!%p1968_p13), %v1994_v8, %v673_v11  ;;  %vm675_vm4 = vcmp.eq.s32.totalorder (!%p1968_p13), %v2005_v12, %v673_v11  ;;  %vm676_vm5 = vcmp.eq.s32.totalorder (!%p1968_p13), %v2023_v16, %v673_v11  ;;  %v663_v20 = vadd.s32 (!%p1968_p13), 2, %v652_v19 }
  0x18   : > { %s304_s7 = scalar_lea.vmem %s2176_s0, %s1552_s29  ;;  %s322_s8 = sadd.s32 %s1561_s24, %s1560_s30  ;;  %v2019_v15 = vsel (!%p1968_p13), %vm674_vm2, 1.0, %v1893_v4  ;;  %v2036_v17 = vsel (!%p1968_p13), %vm675_vm4, 1.0, %v1893_v4  ;;  %v2045_v18 = vsel (!%p1968_p13), %vm676_vm5, 1.0, %v1893_v4  ;;  %v653_v33 = vadd.s32 (!%p1968_p13), 1, %v652_v19 }
  0x19   : > { %s1562_s9 = sshll.u32 %s322_s8, 3  ;;  %s1563_s16 = sshll.u32 %s337_s14, 3  ;;  %v347_v1 = vld [vmem:[%s304_s7] sm:$0xff] (!%p1968_p13)  ;;  %vm664_vm6 = vcmp.eq.s32.totalorder (!%p1968_p13), %v1994_v8, %v663_v20  ;;  %vm665_vm7 = vcmp.eq.s32.totalorder (!%p1968_p13), %v2005_v12, %v663_v20  ;;  %vm666_vm8 = vcmp.eq.s32.totalorder (!%p1968_p13), %v2023_v16, %v663_v20  ;;  %vm684_vm10 = vcmp.eq.s32.totalorder (!%p1968_p13), %v1996_v9, %v683_v34 }
  0x1a   : > { %s1964_s12 = scalar_lea.vmem %s2177_s1, %s1562_s9  ;;  %s1975_s26 = scalar_lea.vmem %s2180_s4, %s1563_s16  ;;  %1674 = vmatmul.mubr.msk.f32.vlgmr.msra.gmra.mrb[0].mxu1 (!%p1968_p13), %vm356_vm0, %v347_v1  ;;  %1669 = vmatmul.mubr.msk.f32.vlgmr.msra.gmra.mrb[0].mxu0 (!%p1968_p13), %vm356_vm0, %v347_v1  ;;  %v1575_v25 = vsel (!%p1968_p13), %vm664_vm6, 1.0, %v1893_v4  ;;  %v1576_v30 = vsel (!%p1968_p13), %vm665_vm7, 1.0, %v1893_v4  ;;  %v1577_v39 = vsel (!%p1968_p13), %vm666_vm8, 1.0, %v1893_v4  ;;  %vm654_vm9 = vcmp.eq.s32.totalorder (!%p1968_p13), %v1994_v8, %v653_v33 }
  0x1b   : > { %346 = sbr.rel (%p1968_p13) target bundleno = 710 (0x2c6), region = 40  ;;  %v865_v5 = vld [vmem:[%s1964_s12] sm:$0xff] (!%p1968_p13)  ;;  %v866_v6 = vld [vmem:[%s1964_s12 + $0x8] sm:$0xff] (!%p1968_p13)  ;;  %1682 = vmatpush3.msra.mxu1 (!%p1968_p13), %v1570_v7  ;;  %1683 = vmatprep.mubr.msk.f32.mxu1 (!%p1968_p13), %vm1894_vm1, %v1893_v4  ;;  %v1572_v42 = vsel (!%p1968_p13), %vm654_vm9, 1.0, %v1893_v4  ;;  %v1581_v44 = vsel (!%p1968_p13), %vm684_vm10, 1.0, %v1893_v4  ;;  %vm655_vm12 = vcmp.eq.s32.totalorder (!%p1968_p13), %v2005_v12, %v653_v33  ;;  %vm656_vm13 = vcmp.eq.s32.totalorder (!%p1968_p13), %v2023_v16, %v653_v33  ;;  %v1601_v49 = vld [vmem:[%s1964_s12 + $0x10] sm:$0xff] (!%p1968_p13) }
  0x1c   : > { %v1779_v10 = vpack.c.bf16 (!%p1968_p13), %v866_v6, %v865_v5  ;;  %1778 = vmatprep.subr.bf16.mxu1 (!%p1968_p13), %v1895_v13  ;;  %1677 = vmatpush3.msra.mxu0 (!%p1968_p13), %v1568_v14  ;;  %v1573_v46 = vsel (!%p1968_p13), %vm655_vm12, 1.0, %v1893_v4  ;;  %v1574_v48 = vsel (!%p1968_p13), %vm656_vm13, 1.0, %v1893_v4  ;;  %v1602_v50 = vld [vmem:[%s1964_s12 + $0x18] sm:$0xff] (!%p1968_p13) }
  0x1d   : > { %1678 = vmatprep.mubr.msk.f32.mxu0 (!%p1968_p13), %vm1894_vm1, %v1893_v4  ;;  %1686 = vmatprep.subr.mxu0 (!%p1968_p13), %v1893_v4  ;;  %v1782_v51 = vpack.c.bf16 (!%p1968_p13), %v1602_v50, %v1601_v49 }
  0x1e   : > { %1684 = vmatmul.mubr.msk.f32.vlgmr.msra.gmra.mrb[2].mxu1 (!%p1968_p13), %vm356_vm0, %v347_v1  ;;  %1679 = vmatmul.mubr.msk.f32.vlgmr.msra.gmra.mrb[2].mxu0 (!%p1968_p13), %vm356_vm0, %v347_v1 }
  0x1f   : > { %1780 = vmatpush3.bf16.msra.mxu1 (!%p1968_p13), %v1779_v10  ;;  %1712 = vmatprep.mubr.msk.f32.mxu1 (!%p1968_p13), %vm1894_vm1, %v1893_v4 }
  0x20   : > { %1688 = vmatprep.mubr.msk.f32.mxu0 (!%p1968_p13), %vm1894_vm1, %v1893_v4  ;;  %1732 = vmatprep.subr.mxu1 (!%p1968_p13), %v1893_v4 }
  0x22   : > { %1713 = vmatmul.mubr.msk.f32.vlgmr.msra.gmra.mrb[4].mxu1 %vm867_vm3, %v2019_v15 }
  0x23   : > { %1715 = vmatprep.mubr.msk.f32.mxu1 %vm1894_vm1, %v1893_v4 }
  0x26   : > { %1716 = vmatmul.mubr.msk.f32.gmra.mrb[6].mxu1 %vm867_vm3, %v2036_v17 }
  0x27   : > { %1718 = vmatprep.mubr.msk.f32.mxu1 %vm1894_vm1, %v1893_v4 }
  0x2a   : > { %1719 = vmatmul.mubr.msk.f32.gmra.mrb[8].mxu1 %vm867_vm3, %v2045_v18 }
  0x2b   : > { %1734 = vmatprep.mubr.msk.f32.mxu1 %vm1894_vm1, %v1893_v4 }
  0xed   : > { %v498_v22 = vpop.f32.mrb[0].mxu1  ;;  %v426_v26 = vpop.f32.mrb[0].mxu0 }
  0xee   : > { %v499_v23 = vadd.f32 %v1564_v21, %v498_v22  ;;  %v1675_v24 = vpop.f32.mrb[1].mxu1  ;;  %v427_v27 = vadd.f32 %v1564_v21, %v426_v26  ;;  %v1670_v28 = vpop.f32.mrb[1].mxu0 }
  0xf0   : > { %1687 = vmatpush3.msra.mxu0 %v499_v23 }
  0xf1   : > { %1689 = vmatmul.mubr.msk.f32.vlgmr.msra.gmra.mrb[4].mxu0 %vm356_vm0, %v1575_v25  ;;  %1697 = vmatprep.subr.mxu0 %v1893_v4  ;;  %v642_v29 = vpop.f32.mrb[2].mxu1  ;;  %v570_v35 = vpop.f32.mrb[2].mxu0 }
  0xf2   : > { %1691 = vmatprep.mubr.msk.f32.mxu0 %vm1894_vm1, %v1893_v4  ;;  %1698 = vmatpush3.msra.mxu0 %v427_v27  ;;  %v643_v31 = vadd.f32 %v1564_v21, %v642_v29  ;;  %v1685_v32 = vpop.f32.mrb[3].mxu1  ;;  %v571_v37 = vadd.f32 %v1564_v21, %v570_v35  ;;  %v1680_v38 = vpop.f32.mrb[3].mxu0 }
  0xf3   : > { %1721 = vmatprep.subr.mxu0 %v1893_v4 }
  0xf4   : > { %1733 = vmatpush3.msra.mxu1 %v643_v31 }
  0xf5   : > { %1692 = vmatmul.mubr.msk.f32.gmra.mrb[6].mxu0 %vm356_vm0, %v1576_v30  ;;  %v943_v36 = vpop.f32.mrb[4].mxu1  ;;  %1743 = vmatprep.subr.mxu1 %v1893_v4 }
  0xf6   : > { %1694 = vmatprep.mubr.msk.f32.mxu0 %vm1894_vm1, %v1893_v4  ;;  %v1714_v40 = vpop.f32.mrb[5].mxu1  ;;  %1735 = vmatmul.mubr.msk.f32.vlgmr.msra.gmra.mrb[10].mxu1 %vm356_vm0, %v1575_v25 }
  0xf7   : > { %1744 = vmatpush3.msra.mxu1 %v571_v37  ;;  %1737 = vmatprep.mubr.msk.f32.mxu1 %vm1894_vm1, %v1893_v4 }
  0xf8   : > { %1767 = vmatprep.subr.mxu1 %v1893_v4 }
  0xf9   : > { %1695 = vmatmul.mubr.msk.f32.gmra.mrb[8].mxu0 %vm356_vm0, %v1577_v39  ;;  %v948_v41 = vpop.f32.mrb[6].mxu1 }
  0xfa   : > { %1699 = vmatprep.mubr.msk.f32.mxu0 %vm1894_vm1, %v1893_v4  ;;  %v1717_v43 = vpop.f32.mrb[7].mxu1  ;;  %1738 = vmatmul.mubr.msk.f32.gmra.mrb[12].mxu1 %vm356_vm0, %v1576_v30 }
  0xfb   : > { %1740 = vmatprep.mubr.msk.f32.mxu1 %vm1894_vm1, %v1893_v4 }
  0xfd   : > { %1700 = vmatmul.mubr.msk.f32.vlgmr.msra.gmra.mrb[4].mxu0 %vm356_vm0, %v1572_v42  ;;  %v953_v45 = vpop.f32.mrb[8].mxu1 }
  0xfe   : > { %1702 = vmatprep.mubr.msk.f32.mxu0 %vm1894_vm1, %v1893_v4  ;;  %1722 = vmatpush3.msk.msra.mxu0 %vm967_vm11, %v1581_v44  ;;  %v1720_v47 = vpop.f32.mrb[9].mxu1 }
  0xff   : > { %1781 = vmatprep.subr.bf16.mxu0 %v1895_v13  ;;  %1741 = vmatmul.mubr.msk.f32.gmra.mrb[14].mxu1 %vm356_vm0, %v1577_v39 }
 0x100   : > { %1745 = vmatprep.mubr.msk.f32.mxu1 %vm1894_vm1, %v1893_v4 }
 0x101   : > { %1703 = vmatmul.mubr.msk.f32.gmra.mrb[6].mxu0 %vm356_vm0, %v1573_v46 }
 0x102   : > { %1705 = vmatprep.mubr.msk.f32.mxu0 %vm1894_vm1, %v1893_v4 }
 0x103   : > { %1746 = vmatmul.mubr.msk.f32.vlgmr.msra.gmra.mrb[10].mxu1 %vm356_vm0, %v1572_v42 }
 0x104   : > { %1748 = vmatprep.mubr.msk.f32.mxu1 %vm1894_vm1, %v1893_v4  ;;  %1768 = vmatpush3.msk.msra.mxu1 %vm967_vm11, %v1581_v44 }
 0x105   : > { %1706 = vmatmul.mubr.msk.f32.gmra.mrb[8].mxu0 %vm356_vm0, %v1574_v48 }
 0x106   : > { %1723 = vmatprep.mubr.msk.f32.mxu0 %vm1894_vm1, %v1893_v4 }
 0x107   : > { %1749 = vmatmul.mubr.msk.f32.gmra.mrb[12].mxu1 %vm356_vm0, %v1573_v46 }
 0x108   : > { %1751 = vmatprep.mubr.msk.f32.mxu1 %vm1894_vm1, %v1893_v4 }
 0x109   : > { %1724 = vmatmul.mubr.msk.f32.vlgmr.msra.gmra.mrb[4].mxu0 %vm957_vm14, %v943_v36 }
 0x10a   : > { %1726 = vmatprep.mubr.msk.f32.mxu0 %vm1894_vm1, %v1893_v4  ;;  %1783 = vmatpush3.bf16.msra.mxu0 %v1782_v51 }
 0x10b   : > { %1752 = vmatmul.mubr.msk.f32.gmra.mrb[14].mxu1 %vm356_vm0, %v1574_v48 }
 0x10c   : > { %1769 = vmatprep.mubr.msk.f32.mxu1 %vm1894_vm1, %v1893_v4 }
 0x10d   : > { %1727 = vmatmul.mubr.msk.f32.gmra.mrb[6].mxu0 %vm957_vm14, %v948_v41 }
 0x10e   : > { %1729 = vmatprep.mubr.msk.f32.mxu0 %vm1894_vm1, %v1893_v4 }
 0x111   : > { %1730 = vmatmul.mubr.msk.f32.gmra.mrb[8].mxu0 %vm957_vm14, %v953_v45 }
 0x112   : > { %1758 = vmatprep.mubr.msk.f32.mxu0 %vm1894_vm1, %v1893_v4 }
 0x115   : > { %1759 = vmatmul.mubr.msk.f32.vlgmr.msra.gmra.mrb[10].mxu0 %vm867_vm3, %v2019_v15 }
 0x116   : > { %1761 = vmatprep.mubr.msk.f32.mxu0 %vm1894_vm1, %v1893_v4 }
 0x119   : > { %1762 = vmatmul.mubr.msk.f32.gmra.mrb[12].mxu0 %vm867_vm3, %v2036_v17 }
 0x11a   : > { %1764 = vmatprep.mubr.msk.f32.mxu0 %vm1894_vm1, %v1893_v4 }
 0x11d   : > { %1765 = vmatmul.mubr.msk.f32.gmra.mrb[14].mxu0 %vm867_vm3, %v2045_v18 }
 0x1dc   : > { %v1037_v52 = vpop.f32.mrb[4].mxu0 }
 0x1dd   : > { %1054 = vst.msk [vmem:[%s1975_s26] sm:$0xff] %vm356_vm0, %v1037_v52  ;;  %v1725_v53 = vpop.f32.mrb[5].mxu0 }
 0x1e0   : > { %v1042_v54 = vpop.f32.mrb[6].mxu0 }
 0x1e1   : > { %1055 = vst.msk [vmem:[%s1975_s26 + $0x8] sm:$0xff] %vm356_vm0, %v1042_v54  ;;  %v1728_v55 = vpop.f32.mrb[7].mxu0 }
 0x1e4   : > { %v1047_v56 = vpop.f32.mrb[8].mxu0 }
 0x1e5   : > { %1056 = vst.msk [vmem:[%s1975_s26 + $0x10] sm:$0xff] %vm356_vm0, %v1047_v56  ;;  %v1731_v57 = vpop.f32.mrb[9].mxu0 }
 0x1e8   : > { %v1286_v58 = vpop.f32.mrb[10].mxu0 }
 0x1e9   : > { %1770 = vmatmul.mubr.msk.f32.vlgmr.msra.gmra.mrb[10].mxu1 %vm957_vm14, %v1286_v58  ;;  %v1760_v59 = vpop.f32.mrb[11].mxu0 }
 0x1ea   : > { %1772 = vmatprep.mubr.msk.f32.mxu1 %vm1894_vm1, %v1893_v4 }
 0x1ec   : > { %v1291_v60 = vpop.f32.mrb[12].mxu0 }
 0x1ed   : > { %1773 = vmatmul.mubr.msk.f32.gmra.mrb[12].mxu1 %vm957_vm14, %v1291_v60  ;;  %v1763_v61 = vpop.f32.mrb[13].mxu0 }
 0x1ee   : > { %1775 = vmatprep.mubr.msk.f32.mxu1 %vm1894_vm1, %v1893_v4 }
 0x1f0   : > { %v1296_v62 = vpop.f32.mrb[14].mxu0 }
 0x1f1   : > { %1776 = vmatmul.mubr.msk.f32.gmra.mrb[14].mxu1 %vm957_vm14, %v1296_v62  ;;  %v1766_v63 = vpop.f32.mrb[15].mxu0 }
 0x2bc   : > { %v1375_v0 = vpop.f32.mrb[10].mxu1 }
 0x2bd   : > { %1392 = vst.msk [vmem:[%s1975_s26 + $0x18] sm:$0xff] %vm356_vm0, %v1375_v0  ;;  %v1771_v1 = vpop.f32.mrb[11].mxu1 }
 0x2c0   : > { %v1380_v2 = vpop.f32.mrb[12].mxu1 }
 0x2c1   : > { %1393 = vst.msk [vmem:[%s1975_s26 + $0x20] sm:$0xff] %vm356_vm0, %v1380_v2  ;;  %v1774_v3 = vpop.f32.mrb[13].mxu1 }
 0x2c4   : > { %v1385_v5 = vpop.f32.mrb[14].mxu1 }
 0x2c5   : > { %1394 = vst.msk [vmem:[%s1975_s26 + $0x28] sm:$0xff] %vm356_vm0, %v1385_v5  ;;  %v1777_v6 = vpop.f32.mrb[15].mxu1 }
 0x2c6 PF: > { %1397 = sbr.rel (!%p1968_p13) target bundleno = 717 (0x2cd), region = 44  ;;  %vm1398_vm15 = vcmask (%p1968_p13), 64512   ;;  %v1896_v4 = vmov (%p1968_p13), 0.0  }
 0x2c7   : > { %1399 = vst.msk [vmem:[%s1975_s26] sm:$0xff] (%p1968_p13), %vm1398_vm15, %v1896_v4  ;;  %1400 = vst.msk [vmem:[%s1975_s26 + $0x8] sm:$0xff] (%p1968_p13), %vm1398_vm15, %v1896_v4 }
 0x2c8   : > { %1401 = vst.msk [vmem:[%s1975_s26 + $0x10] sm:$0xff] (%p1968_p13), %vm1398_vm15, %v1896_v4  ;;  %1402 = vst.msk [vmem:[%s1975_s26 + $0x18] sm:$0xff] (%p1968_p13), %vm1398_vm15, %v1896_v4 }
 0x2c9   : > { %1403 = vst.msk [vmem:[%s1975_s26 + $0x20] sm:$0xff] (%p1968_p13), %vm1398_vm15, %v1896_v4  ;;  %1404 = vst.msk [vmem:[%s1975_s26 + $0x28] sm:$0xff] (%p1968_p13), %vm1398_vm15, %v1896_v4 }
 0x2cd PF: > { %s14_s19 = sadd.s32 1, %s1891_s19   ;;  %s2182_s15 = smov %s1883_s17 }
 0x2ce   : > { %p11_p0 = scmp.ge.s32.totalorder %s14_s19, 22   ;;  %s2183_s16 = smov %s1887_s18 }
 0x2cf   : > { %s2184_s17 = smov %s2187_s20  ;;  %s2185_s18 = smov %s2191_s21 }
 0x2d0   :  { %13 = sbr.rel (!%p11_p0) target bundleno = 3 (0x3), region = 81 }

// kernel: decoder_v3_forward.3
= control target key start
LH: loop header
LB: loop body
LE: loop exit
PB: predicated region body
PF: predicated region fallthrough
CT: control target
= control target key end

     0   :  { %s15389_s24 = smov 0   ;;  %s18533_s0 = inlined_call_operand.vmem [shape: f32[2,480,8], index: 0, kind: input, shape index: {}]   ;;  %s18534_s1 = inlined_call_operand.vmem [shape: f32[9,8,8], index: 1, kind: input, shape index: {}]   ;;  %s18535_s2 = inlined_call_operand.vmem [shape: f32[1,8], index: 2, kind: input, shape index: {}]   ;;  %s18536_s3 = inlined_call_operand.vmem [shape: f32[9,8,8], index: 3, kind: input, shape index: {}]   ;;  %s18537_s4 = inlined_call_operand.vmem [shape: f32[8,8], index: 4, kind: input, shape index: {}]   ;;  %s18538_s5 = inlined_call_operand.vmem [shape: f32[1,8], index: 5, kind: input, shape index: {}]   ;;  %s18539_s6 = inlined_call_operand.vmem [shape: f32[384,1], index: 6, kind: input, shape index: {}]   ;;  %s18540_s7 = inlined_call_operand.vmem [shape: f32[2,384,8], index: 7, kind: output, shape index: {}]  }
   0x1 LB: > { %s11231_s25 = sadd.s32 4294967295, %s15345_s24   ;;  %p11235_p0 = scmp.ge.s32.totalorder %s15345_s24, 1  ;;  %s15345_s24 = sphi %s15389_s24, %s17_s24  }
   0x2   : > { %p237_p1 = scmp.lt.s32.totalorder %s15345_s24, 3 }
   0x4   : > { %p238_p2 = pnand %p11235_p0, %p237_p1 }
   0x6   : > { %241 = sbr.rel (%p238_p2) target bundleno = 2185 (0x889), region = 48 }
   0xd   : > { %v11238_v0 = vld [vmem:[%s18534_s1 + $0x8] sm:$0xff]  ;;  %p269_p3 = scmp.lt.s32.totalorder %s11231_s25, 1  ;;  %v436_v1 = vld [vmem:[%s18534_s1] sm:$0xff]  ;;  %vm279_vm0 = vcmask 64512   ;;  %v15418_v5 = vld [vmem:[%s18534_s1 + $0x10] sm:$0xff] }
   0xe   : > { %13101 = vmatprep.subr.mxu0 %v11238_v0  ;;  %v15655_v54 = vld [vmem:[%s18534_s1 + $0x18] sm:$0xff] }
   0xf   : > { %13102 = vmatpush3.msra.mxu0 %v11238_v0  ;;  %s19019_s25 = smov (!%p269_p3, %s11231_s25), 1 }
  0x10   : > { %13175 = vmatprep.subr.mxu0 %v436_v1  ;;  %s15325_s30 = smul.u32 480, %s19019_s25 }
  0x11   : > { %s15326_s23 = smul.u32 384, %s19019_s25 }
  0x12   : > { %s15409_s10 = scalar_lea.vmem %s18533_s0, %s15325_s30 }
  0x13   : > { %v437_v2 = vld [vmem:[%s15409_s10 + $0x18] sm:$0xff]  ;;  %v438_v3 = vld [vmem:[%s15409_s10 + $0x20] sm:$0xff]  ;;  %v439_v4 = vld [vmem:[%s15409_s10 + $0x28] sm:$0xff] }
  0x14   : > { %13103 = vmatprep.mubr.msk.f32.mxu0 %vm279_vm0, %v437_v2  ;;  %v15423_v6 = vld [vmem:[%s15409_s10 + $0x30] sm:$0xff]  ;;  %v15426_v7 = vld [vmem:[%s15409_s10 + $0x38] sm:$0xff]  ;;  %v15434_v8 = vld [vmem:[%s15409_s10 + $0x40] sm:$0xff] }
  0x15   : > { %13104 = vmatmul.mubr.msk.f32.vlgmr.msra.gmra.mrb[0].mxu0 %vm279_vm0, %v438_v3  ;;  %v15437_v9 = vld [vmem:[%s15409_s10 + $0x48] sm:$0xff]  ;;  %v15444_v10 = vld [vmem:[%s15409_s10 + $0x50] sm:$0xff]  ;;  %v15447_v11 = vld [vmem:[%s15409_s10 + $0x58] sm:$0xff] }
  0x16   : > { %13176 = vmatpush3.msra.mxu0 %v436_v1  ;;  %13106 = vmatprep.mubr.msk.f32.mxu0 %vm279_vm0, %v439_v4  ;;  %v15454_v12 = vld [vmem:[%s15409_s10 + $0x60] sm:$0xff]  ;;  %v15457_v13 = vld [vmem:[%s15409_s10 + $0x68] sm:$0xff]  ;;  %v15464_v14 = vld [vmem:[%s15409_s10 + $0x70] sm:$0xff] }
  0x17   : > { %13249 = vmatprep.subr.mxu0 %v15418_v5  ;;  %v15467_v15 = vld [vmem:[%s15409_s10 + $0x78] sm:$0xff]  ;;  %v15474_v16 = vld [vmem:[%s15409_s10 + $0x80] sm:$0xff]  ;;  %v15477_v17 = vld [vmem:[%s15409_s10 + $0x88] sm:$0xff] }
  0x18   : > { %v15484_v18 = vld [vmem:[%s15409_s10 + $0x90] sm:$0xff]  ;;  %v15487_v19 = vld [vmem:[%s15409_s10 + $0x98] sm:$0xff]  ;;  %v15494_v20 = vld [vmem:[%s15409_s10 + $0xa0] sm:$0xff] }
  0x19   : > { %13107 = vmatmul.mubr.msk.f32.gmra.mrb[2].mxu0 %vm279_vm0, %v15423_v6  ;;  %18684 = vst [vmem:[#allocation3_spill] sm:$0xff] %v15484_v18  ;;  %18685 = vst [vmem:[#allocation4_spill] sm:$0xff] %v15487_v19  ;;  %v15497_v21 = vld [vmem:[%s15409_s10 + $0xa8] sm:$0xff]  ;;  %v15504_v22 = vld [vmem:[%s15409_s10 + $0xb0] sm:$0xff] }
  0x1a   : > { %13109 = vmatprep.mubr.msk.f32.mxu0 %vm279_vm0, %v15426_v7  ;;  %18686 = vst [vmem:[#allocation5_spill] sm:$0xff] %v15494_v20  ;;  %18687 = vst [vmem:[#allocation6_spill] sm:$0xff] %v15497_v21  ;;  %v15507_v23 = vld [vmem:[%s15409_s10 + $0xb8] sm:$0xff]  ;;  %v15514_v24 = vld [vmem:[%s15409_s10 + $0xc0] sm:$0xff] }
  0x1b   : > { %18688 = vst [vmem:[#allocation7_spill] sm:$0xff] %v15504_v22  ;;  %18689 = vst [vmem:[#allocation8_spill] sm:$0xff] %v15507_v23  ;;  %v15517_v25 = vld [vmem:[%s15409_s10 + $0xc8] sm:$0xff]  ;;  %v15524_v26 = vld [vmem:[%s15409_s10 + $0xd0] sm:$0xff] }
  0x1c   : > { %18690 = vst [vmem:[#allocation9_spill] sm:$0xff] %v15514_v24  ;;  %18691 = vst [vmem:[#allocation10_spill] sm:$0xff] %v15517_v25  ;;  %v15527_v27 = vld [vmem:[%s15409_s10 + $0xd8] sm:$0xff]  ;;  %v15534_v28 = vld [vmem:[%s15409_s10 + $0xe0] sm:$0xff] }
  0x1d   : > { %13110 = vmatmul.mubr.msk.f32.gmra.mrb[4].mxu0 %vm279_vm0, %v15434_v8  ;;  %18692 = vst [vmem:[#allocation11_spill] sm:$0xff] %v15524_v26  ;;  %18693 = vst [vmem:[#allocation12_spill] sm:$0xff] %v15527_v27  ;;  %v15537_v29 = vld [vmem:[%s15409_s10 + $0xe8] sm:$0xff]  ;;  %v15544_v30 = vld [vmem:[%s15409_s10 + $0xf0] sm:$0xff] }
  0x1e   : > { %13112 = vmatprep.mubr.msk.f32.mxu0 %vm279_vm0, %v15437_v9  ;;  %18694 = vst [vmem:[#allocation13_spill] sm:$0xff] %v15534_v28  ;;  %18695 = vst [vmem:[#allocation14_spill] sm:$0xff] %v15537_v29  ;;  %v15547_v31 = vld [vmem:[%s15409_s10 + $0xf8] sm:$0xff]  ;;  %v15554_v32 = vld [vmem:[%s15409_s10 + $0x100] sm:$0xff] }
  0x1f   : > { %18696 = vst [vmem:[#allocation15_spill] sm:$0xff] %v15544_v30  ;;  %18697 = vst [vmem:[#allocation16_spill] sm:$0xff] %v15547_v31  ;;  %v15557_v33 = vld [vmem:[%s15409_s10 + $0x108] sm:$0xff]  ;;  %v15564_v34 = vld [vmem:[%s15409_s10 + $0x110] sm:$0xff] }
  0x20   : > { %18698 = vst [vmem:[#allocation17_spill] sm:$0xff] %v15554_v32  ;;  %18699 = vst [vmem:[#allocation18_spill] sm:$0xff] %v15557_v33  ;;  %v15567_v35 = vld [vmem:[%s15409_s10 + $0x118] sm:$0xff]  ;;  %v15574_v36 = vld [vmem:[%s15409_s10 + $0x120] sm:$0xff] }
  0x21   : > { %13113 = vmatmul.mubr.msk.f32.gmra.mrb[6].mxu0 %vm279_vm0, %v15444_v10  ;;  %18700 = vst [vmem:[#allocation19_spill] sm:$0xff] %v15564_v34  ;;  %18701 = vst [vmem:[#allocation20_spill] sm:$0xff] %v15567_v35  ;;  %v15577_v37 = vld [vmem:[%s15409_s10 + $0x128] sm:$0xff]  ;;  %v15584_v38 = vld [vmem:[%s15409_s10 + $0x130] sm:$0xff] }
  0x22   : > { %13115 = vmatprep.mubr.msk.f32.mxu0 %vm279_vm0, %v15447_v11  ;;  %18702 = vst [vmem:[#allocation21_spill] sm:$0xff] %v15574_v36  ;;  %18703 = vst [vmem:[#allocation22_spill] sm:$0xff] %v15577_v37  ;;  %v15587_v39 = vld [vmem:[%s15409_s10 + $0x138] sm:$0xff]  ;;  %v15594_v40 = vld [vmem:[%s15409_s10 + $0x140] sm:$0xff] }
  0x23   : > { %18704 = vst [vmem:[#allocation23_spill] sm:$0xff] %v15584_v38  ;;  %18705 = vst [vmem:[#allocation24_spill] sm:$0xff] %v15587_v39  ;;  %v15597_v41 = vld [vmem:[%s15409_s10 + $0x148] sm:$0xff]  ;;  %v15604_v42 = vld [vmem:[%s15409_s10 + $0x150] sm:$0xff] }
  0x24   : > { %18706 = vst [vmem:[#allocation25_spill] sm:$0xff] %v15594_v40  ;;  %18707 = vst [vmem:[#allocation26_spill] sm:$0xff] %v15597_v41  ;;  %v15607_v43 = vld [vmem:[%s15409_s10 + $0x158] sm:$0xff]  ;;  %v15614_v44 = vld [vmem:[%s15409_s10 + $0x160] sm:$0xff] }
  0x25   : > { %13116 = vmatmul.mubr.msk.f32.gmra.mrb[8].mxu0 %vm279_vm0, %v15454_v12  ;;  %18708 = vst [vmem:[#allocation27_spill] sm:$0xff] %v15604_v42  ;;  %18709 = vst [vmem:[#allocation28_spill] sm:$0xff] %v15607_v43  ;;  %v15617_v45 = vld [vmem:[%s15409_s10 + $0x168] sm:$0xff]  ;;  %v15624_v46 = vld [vmem:[%s15409_s10 + $0x170] sm:$0xff] }
  0x26   : > { %13118 = vmatprep.mubr.msk.f32.mxu0 %vm279_vm0, %v15457_v13  ;;  %18710 = vst [vmem:[#allocation29_spill] sm:$0xff] %v15614_v44  ;;  %18711 = vst [vmem:[#allocation30_spill] sm:$0xff] %v15617_v45  ;;  %v15627_v47 = vld [vmem:[%s15409_s10 + $0x178] sm:$0xff]  ;;  %v15634_v48 = vld [vmem:[%s15409_s10 + $0x180] sm:$0xff] }
  0x27   : > { %18712 = vst [vmem:[#allocation31_spill] sm:$0xff] %v15624_v46  ;;  %18713 = vst [vmem:[#allocation32_spill] sm:$0xff] %v15627_v47  ;;  %v15637_v49 = vld [vmem:[%s15409_s10 + $0x188] sm:$0xff]  ;;  %v15644_v50 = vld [vmem:[%s15409_s10 + $0x190] sm:$0xff] }
  0x28   : > { %18714 = vst [vmem:[#allocation33_spill] sm:$0xff] %v15634_v48  ;;  %18715 = vst [vmem:[#allocation34_spill] sm:$0xff] %v15637_v49  ;;  %v388_v51 = vld [vmem:[%s15409_s10 + $0x17] sm:$0xff]  ;;  %v389_v52 = vld [vmem:[%s15409_s10 + $0x1f] sm:$0xff] }
  0x29   : > { %13119 = vmatmul.mubr.msk.f32.gmra.mrb[10].mxu0 %vm279_vm0, %v15464_v14  ;;  %18716 = vst [vmem:[#allocation35_spill] sm:$0xff] %v15644_v50  ;;  %v390_v53 = vld [vmem:[%s15409_s10 + $0x27] sm:$0xff]  ;;  %v15661_v55 = vld [vmem:[%s15409_s10 + $0x2f] sm:$0xff]  ;;  %v15664_v56 = vld [vmem:[%s15409_s10 + $0x37] sm:$0xff] }
  0x2a   : > { %13121 = vmatprep.mubr.msk.f32.mxu0 %vm279_vm0, %v15467_v15  ;;  %v15672_v57 = vld [vmem:[%s15409_s10 + $0x3f] sm:$0xff]  ;;  %v15675_v58 = vld [vmem:[%s15409_s10 + $0x47] sm:$0xff]  ;;  %v15682_v59 = vld [vmem:[%s15409_s10 + $0x4f] sm:$0xff] }
  0x2b   : > { %v15685_v60 = vld [vmem:[%s15409_s10 + $0x57] sm:$0xff]  ;;  %v15692_v61 = vld [vmem:[%s15409_s10 + $0x5f] sm:$0xff]  ;;  %v15695_v62 = vld [vmem:[%s15409_s10 + $0x67] sm:$0xff] }
  0x2c   : > { %v15702_v63 = vld [vmem:[%s15409_s10 + $0x6f] sm:$0xff]  ;;  %v15705_v0 = vld [vmem:[%s15409_s10 + $0x77] sm:$0xff]  ;;  %v15712_v1 = vld [vmem:[%s15409_s10 + $0x7f] sm:$0xff] }
  0x2d   : > { %13122 = vmatmul.mubr.msk.f32.gmra.mrb[12].mxu0 %vm279_vm0, %v15474_v16  ;;  %v15715_v2 = vld [vmem:[%s15409_s10 + $0x87] sm:$0xff]  ;;  %v15722_v3 = vld [vmem:[%s15409_s10 + $0x8f] sm:$0xff]  ;;  %v15725_v4 = vld [vmem:[%s15409_s10 + $0x97] sm:$0xff] }
  0x2e   : > { %13124 = vmatprep.mubr.msk.f32.mxu0 %vm279_vm0, %v15477_v17 }
  0x31   : > { %13125 = vmatmul.mubr.msk.f32.gmra.mrb[14].mxu0 %vm279_vm0, %v15484_v18  ;;  %v15923_v18 = vld [vmem:[%s15409_s10 + $0x59] sm:$0xff] }
  0x32   : > { %13127 = vmatprep.mubr.msk.f32.mxu0 %vm279_vm0, %v15487_v19  ;;  %v15899_v19 = vld [vmem:[%s15409_s10 + $0x31] sm:$0xff]  ;;  %18722 = vst [vmem:[#allocation41_spill] sm:$0xff] %v15923_v18 }
  0x33   : > { %18717 = vst [vmem:[#allocation36_spill] sm:$0xff] %v15899_v19 }
  0x35   : > { %13128 = vmatmul.mubr.msk.f32.gmra.mrb[16].mxu0 %vm279_vm0, %v15494_v20  ;;  %v15893_v20 = vld [vmem:[%s18534_s1 + $0x20] sm:$0xff] }
  0x36   : > { %13130 = vmatprep.mubr.msk.f32.mxu0 %vm279_vm0, %v15497_v21  ;;  %v1387_v21 = vld [vmem:[%s15409_s10 + $0x29] sm:$0xff] }
  0x39   : > { %13131 = vmatmul.mubr.msk.f32.gmra.mrb[18].mxu0 %vm279_vm0, %v15504_v22  ;;  %v1386_v22 = vld [vmem:[%s15409_s10 + $0x21] sm:$0xff] }
  0x3a   : > { %13133 = vmatprep.mubr.msk.f32.mxu0 %vm279_vm0, %v15507_v23  ;;  %v1385_v23 = vld [vmem:[%s15409_s10 + $0x19] sm:$0xff] }
  0x3d   : > { %13134 = vmatmul.mubr.msk.f32.gmra.mrb[20].mxu0 %vm279_vm0, %v15514_v24  ;;  %v15882_v24 = vld [vmem:[%s15409_s10 + $0x18f] sm:$0xff] }
  0x3e   : > { %13136 = vmatprep.mubr.msk.f32.mxu0 %vm279_vm0, %v15517_v25  ;;  %v15875_v25 = vld [vmem:[%s15409_s10 + $0x187] sm:$0xff] }
  0x41   : > { %13137 = vmatmul.mubr.msk.f32.gmra.mrb[22].mxu0 %vm279_vm0, %v15524_v26  ;;  %v15872_v26 = vld [vmem:[%s15409_s10 + $0x17f] sm:$0xff] }
  0x42   : > { %13139 = vmatprep.mubr.msk.f32.mxu0 %vm279_vm0, %v15527_v27  ;;  %v15865_v27 = vld [vmem:[%s15409_s10 + $0x177] sm:$0xff] }
  0x45   : > { %13140 = vmatmul.mubr.msk.f32.gmra.mrb[24].mxu0 %vm279_vm0, %v15534_v28  ;;  %v15862_v28 = vld [vmem:[%s15409_s10 + $0x16f] sm:$0xff] }
  0x46   : > { %13142 = vmatprep.mubr.msk.f32.mxu0 %vm279_vm0, %v15537_v29  ;;  %v15855_v29 = vld [vmem:[%s15409_s10 + $0x167] sm:$0xff] }
  0x49   : > { %13143 = vmatmul.mubr.msk.f32.gmra.mrb[26].mxu0 %vm279_vm0, %v15544_v30  ;;  %v15852_v30 = vld [vmem:[%s15409_s10 + $0x15f] sm:$0xff] }
  0x4a   : > { %13145 = vmatprep.mubr.msk.f32.mxu0 %vm279_vm0, %v15547_v31  ;;  %v15845_v31 = vld [vmem:[%s15409_s10 + $0x157] sm:$0xff] }
  0x4d   : > { %13146 = vmatmul.mubr.msk.f32.gmra.mrb[28].mxu0 %vm279_vm0, %v15554_v32  ;;  %v15842_v32 = vld [vmem:[%s15409_s10 + $0x14f] sm:$0xff] }
  0x4e   : > { %13148 = vmatprep.mubr.msk.f32.mxu0 %vm279_vm0, %v15557_v33  ;;  %v15835_v33 = vld [vmem:[%s15409_s10 + $0x147] sm:$0xff] }
  0x51   : > { %13149 = vmatmul.mubr.msk.f32.gmra.mrb[30].mxu0 %vm279_vm0, %v15564_v34  ;;  %v15832_v34 = vld [vmem:[%s15409_s10 + $0x13f] sm:$0xff] }
  0x52   : > { %13151 = vmatprep.mubr.msk.f32.mxu0 %vm279_vm0, %v15567_v35  ;;  %v15825_v35 = vld [vmem:[%s15409_s10 + $0x137] sm:$0xff] }
  0x55   : > { %13152 = vmatmul.mubr.msk.f32.gmra.mrb[32].mxu0 %vm279_vm0, %v15574_v36  ;;  %v15822_v36 = vld [vmem:[%s15409_s10 + $0x12f] sm:$0xff] }
  0x56   : > { %13154 = vmatprep.mubr.msk.f32.mxu0 %vm279_vm0, %v15577_v37  ;;  %v15815_v37 = vld [vmem:[%s15409_s10 + $0x127] sm:$0xff] }
  0x59   : > { %13155 = vmatmul.mubr.msk.f32.gmra.mrb[34].mxu0 %vm279_vm0, %v15584_v38  ;;  %v15812_v38 = vld [vmem:[%s15409_s10 + $0x11f] sm:$0xff] }
  0x5a   : > { %13157 = vmatprep.mubr.msk.f32.mxu0 %vm279_vm0, %v15587_v39  ;;  %v15805_v39 = vld [vmem:[%s15409_s10 + $0x117] sm:$0xff] }
  0x5d   : > { %13158 = vmatmul.mubr.msk.f32.gmra.mrb[36].mxu0 %vm279_vm0, %v15594_v40  ;;  %v15802_v40 = vld [vmem:[%s15409_s10 + $0x10f] sm:$0xff] }
  0x5e   : > { %13160 = vmatprep.mubr.msk.f32.mxu0 %vm279_vm0, %v15597_v41  ;;  %v15795_v41 = vld [vmem:[%s15409_s10 + $0x107] sm:$0xff] }
  0x61   : > { %13161 = vmatmul.mubr.msk.f32.gmra.mrb[38].mxu0 %vm279_vm0, %v15604_v42  ;;  %v15792_v42 = vld [vmem:[%s15409_s10 + $0xff] sm:$0xff] }
  0x62   : > { %13163 = vmatprep.mubr.msk.f32.mxu0 %vm279_vm0, %v15607_v43  ;;  %v15785_v43 = vld [vmem:[%s15409_s10 + $0xf7] sm:$0xff] }
  0x65   : > { %13164 = vmatmul.mubr.msk.f32.gmra.mrb[40].mxu0 %vm279_vm0, %v15614_v44  ;;  %v15782_v44 = vld [vmem:[%s15409_s10 + $0xef] sm:$0xff] }
  0x66   : > { %13166 = vmatprep.mubr.msk.f32.mxu0 %vm279_vm0, %v15617_v45  ;;  %v15775_v45 = vld [vmem:[%s15409_s10 + $0xe7] sm:$0xff] }
  0x69   : > { %13167 = vmatmul.mubr.msk.f32.gmra.mrb[42].mxu0 %vm279_vm0, %v15624_v46  ;;  %v15772_v46 = vld [vmem:[%s15409_s10 + $0xdf] sm:$0xff] }
  0x6a   : > { %13169 = vmatprep.mubr.msk.f32.mxu0 %vm279_vm0, %v15627_v47  ;;  %v15765_v47 = vld [vmem:[%s15409_s10 + $0xd7] sm:$0xff] }
  0x6d   : > { %13170 = vmatmul.mubr.msk.f32.gmra.mrb[44].mxu0 %vm279_vm0, %v15634_v48  ;;  %v15762_v48 = vld [vmem:[%s15409_s10 + $0xcf] sm:$0xff] }
  0x6e   : > { %13172 = vmatprep.mubr.msk.f32.mxu0 %vm279_vm0, %v15637_v49  ;;  %v15755_v49 = vld [vmem:[%s15409_s10 + $0xc7] sm:$0xff] }
  0x71   : > { %13173 = vmatmul.mubr.msk.f32.gmra.mrb[46].mxu0 %vm279_vm0, %v15644_v50  ;;  %v15752_v50 = vld [vmem:[%s15409_s10 + $0xbf] sm:$0xff] }
  0x72   : > { %13177 = vmatprep.mubr.msk.f32.mxu0 %vm279_vm0, %v388_v51  ;;  %v15735_v51 = vld [vmem:[%s15409_s10 + $0xa7] sm:$0xff] }
  0x75   : > { %13178 = vmatmul.mubr.msk.f32.vlgmr.msra.gmra.mrb[0].mxu0 %vm279_vm0, %v389_v52  ;;  %v15742_v52 = vld [vmem:[%s15409_s10 + $0xaf] sm:$0xff] }
  0x76   : > { %13250 = vmatpush3.msra.mxu0 %v15418_v5  ;;  %13180 = vmatprep.mubr.msk.f32.mxu0 %vm279_vm0, %v390_v53  ;;  %v15732_v5 = vld [vmem:[%s15409_s10 + $0x9f] sm:$0xff]  ;;  %v15745_v53 = vld [vmem:[%s15409_s10 + $0xb7] sm:$0xff] }
  0x77   : > { %13323 = vmatprep.subr.mxu0 %v15655_v54 }
  0x79   : > { %13181 = vmatmul.mubr.msk.f32.gmra.mrb[2].mxu0 %vm279_vm0, %v15661_v55 }
  0x7a   : > { %13183 = vmatprep.mubr.msk.f32.mxu0 %vm279_vm0, %v15664_v56 }
  0x7d   : > { %13184 = vmatmul.mubr.msk.f32.gmra.mrb[4].mxu0 %vm279_vm0, %v15672_v57 }
  0x7e   : > { %13186 = vmatprep.mubr.msk.f32.mxu0 %vm279_vm0, %v15675_v58 }
  0x81   : > { %13187 = vmatmul.mubr.msk.f32.gmra.mrb[6].mxu0 %vm279_vm0, %v15682_v59 }
  0x82   : > { %13189 = vmatprep.mubr.msk.f32.mxu0 %vm279_vm0, %v15685_v60 }
  0x85   : > { %13190 = vmatmul.mubr.msk.f32.gmra.mrb[8].mxu0 %vm279_vm0, %v15692_v61 }
  0x86   : > { %13192 = vmatprep.mubr.msk.f32.mxu0 %vm279_vm0, %v15695_v62 }
  0x89   : > { %13193 = vmatmul.mubr.msk.f32.gmra.mrb[10].mxu0 %vm279_vm0, %v15702_v63 }
  0x8a   : > { %13195 = vmatprep.mubr.msk.f32.mxu0 %vm279_vm0, %v15705_v0 }
  0x8d   : > { %13196 = vmatmul.mubr.msk.f32.gmra.mrb[12].mxu0 %vm279_vm0, %v15712_v1 }
  0x8e   : > { %13198 = vmatprep.mubr.msk.f32.mxu0 %vm279_vm0, %v15715_v2 }
  0x91   : > { %13199 = vmatmul.mubr.msk.f32.gmra.mrb[14].mxu0 %vm279_vm0, %v15722_v3 }
  0x92   : > { %13201 = vmatprep.mubr.msk.f32.mxu0 %vm279_vm0, %v15725_v4 }
  0x95   : > { %13202 = vmatmul.mubr.msk.f32.gmra.mrb[16].mxu0 %vm279_vm0, %v15732_v5 }
  0x96   : > { %13204 = vmatprep.mubr.msk.f32.mxu0 %vm279_vm0, %v15735_v51 }
  0x99   : > { %13205 = vmatmul.mubr.msk.f32.gmra.mrb[18].mxu0 %vm279_vm0, %v15742_v52 }
  0x9a   : > { %13207 = vmatprep.mubr.msk.f32.mxu0 %vm279_vm0, %v15745_v53 }
  0x9d   : > { %13208 = vmatmul.mubr.msk.f32.gmra.mrb[20].mxu0 %vm279_vm0, %v15752_v50 }
  0x9e   : > { %13210 = vmatprep.mubr.msk.f32.mxu0 %vm279_vm0, %v15755_v49 }
  0xa1   : > { %13211 = vmatmul.mubr.msk.f32.gmra.mrb[22].mxu0 %vm279_vm0, %v15762_v48 }
  0xa2   : > { %13213 = vmatprep.mubr.msk.f32.mxu0 %vm279_vm0, %v15765_v47 }
  0xa5   : > { %13214 = vmatmul.mubr.msk.f32.gmra.mrb[24].mxu0 %vm279_vm0, %v15772_v46 }
  0xa6   : > { %13216 = vmatprep.mubr.msk.f32.mxu0 %vm279_vm0, %v15775_v45 }
  0xa9   : > { %13217 = vmatmul.mubr.msk.f32.gmra.mrb[26].mxu0 %vm279_vm0, %v15782_v44 }
  0xaa   : > { %13219 = vmatprep.mubr.msk.f32.mxu0 %vm279_vm0, %v15785_v43 }
  0xad   : > { %13220 = vmatmul.mubr.msk.f32.gmra.mrb[28].mxu0 %vm279_vm0, %v15792_v42 }
  0xae   : > { %13222 = vmatprep.mubr.msk.f32.mxu0 %vm279_vm0, %v15795_v41 }
  0xb1   : > { %13223 = vmatmul.mubr.msk.f32.gmra.mrb[30].mxu0 %vm279_vm0, %v15802_v40 }
  0xb2   : > { %13225 = vmatprep.mubr.msk.f32.mxu0 %vm279_vm0, %v15805_v39 }
  0xb5   : > { %13226 = vmatmul.mubr.msk.f32.gmra.mrb[32].mxu0 %vm279_vm0, %v15812_v38 }
  0xb6   : > { %13228 = vmatprep.mubr.msk.f32.mxu0 %vm279_vm0, %v15815_v37 }
  0xb9   : > { %13229 = vmatmul.mubr.msk.f32.gmra.mrb[34].mxu0 %vm279_vm0, %v15822_v36 }
  0xba   : > { %13231 = vmatprep.mubr.msk.f32.mxu0 %vm279_vm0, %v15825_v35 }
  0xbd   : > { %13232 = vmatmul.mubr.msk.f32.gmra.mrb[36].mxu0 %vm279_vm0, %v15832_v34 }
  0xbe   : > { %13234 = vmatprep.mubr.msk.f32.mxu0 %vm279_vm0, %v15835_v33 }
  0xc1   : > { %13235 = vmatmul.mubr.msk.f32.gmra.mrb[38].mxu0 %vm279_vm0, %v15842_v32 }
  0xc2   : > { %13237 = vmatprep.mubr.msk.f32.mxu0 %vm279_vm0, %v15845_v31 }
  0xc5   : > { %13238 = vmatmul.mubr.msk.f32.gmra.mrb[40].mxu0 %vm279_vm0, %v15852_v30 }
  0xc6   : > { %13240 = vmatprep.mubr.msk.f32.mxu0 %vm279_vm0, %v15855_v29 }
  0xc9   : > { %13241 = vmatmul.mubr.msk.f32.gmra.mrb[42].mxu0 %vm279_vm0, %v15862_v28 }
  0xca   : > { %13243 = vmatprep.mubr.msk.f32.mxu0 %vm279_vm0, %v15865_v27 }
  0xcd   : > { %13244 = vmatmul.mubr.msk.f32.gmra.mrb[44].mxu0 %vm279_vm0, %v15872_v26 }
  0xce   : > { %13246 = vmatprep.mubr.msk.f32.mxu0 %vm279_vm0, %v15875_v25 }
  0xd1   : > { %13247 = vmatmul.mubr.msk.f32.gmra.mrb[46].mxu0 %vm279_vm0, %v15882_v24 }
  0xd2   : > { %13251 = vmatprep.mubr.msk.f32.mxu0 %vm279_vm0, %v1385_v23  ;;  %v15902_v23 = vld [vmem:[%s15409_s10 + $0x39] sm:$0xff] }
  0xd3   : > { %18718 = vst [vmem:[#allocation37_spill] sm:$0xff] %v15902_v23 }
  0xd5   : > { %13252 = vmatmul.mubr.msk.f32.vlgmr.msra.gmra.mrb[0].mxu0 %vm279_vm0, %v1386_v22  ;;  %v15910_v22 = vld [vmem:[%s15409_s10 + $0x41] sm:$0xff] }
  0xd6   : > { %13324 = vmatpush3.msra.mxu0 %v15655_v54  ;;  %13254 = vmatprep.mubr.msk.f32.mxu0 %vm279_vm0, %v1387_v21  ;;  %18719 = vst [vmem:[#allocation38_spill] sm:$0xff] %v15910_v22  ;;  %v15913_v54 = vld [vmem:[%s15409_s10 + $0x49] sm:$0xff]  ;;  %v15920_v21 = vld [vmem:[%s15409_s10 + $0x51] sm:$0xff] }
  0xd7   : > { %13397 = vmatprep.subr.mxu0 %v15893_v20  ;;  %18720 = vst [vmem:[#allocation39_spill] sm:$0xff] %v15913_v54  ;;  %18721 = vst [vmem:[#allocation40_spill] sm:$0xff] %v15920_v21 }
  0xd9   : > { %13255 = vmatmul.mubr.msk.f32.gmra.mrb[2].mxu0 %vm279_vm0, %v15899_v19  ;;  %v15933_v19 = vld [vmem:[%s15409_s10 + $0x69] sm:$0xff] }
  0xda   : > { %13257 = vmatprep.mubr.msk.f32.mxu0 %vm279_vm0, %v15902_v23  ;;  %v15930_v23 = vld [vmem:[%s15409_s10 + $0x61] sm:$0xff]  ;;  %18724 = vst [vmem:[#allocation43_spill] sm:$0xff] %v15933_v19 }
  0xdb   : > { %18723 = vst [vmem:[#allocation42_spill] sm:$0xff] %v15930_v23 }
  0xdd   : > { %13258 = vmatmul.mubr.msk.f32.gmra.mrb[4].mxu0 %vm279_vm0, %v15910_v22  ;;  %v15943_v22 = vld [vmem:[%s15409_s10 + $0x79] sm:$0xff] }
  0xde   : > { %13260 = vmatprep.mubr.msk.f32.mxu0 %vm279_vm0, %v15913_v54  ;;  %v15940_v54 = vld [vmem:[%s15409_s10 + $0x71] sm:$0xff]  ;;  %18726 = vst [vmem:[#allocation45_spill] sm:$0xff] %v15943_v22 }
  0xdf   : > { %18725 = vst [vmem:[#allocation44_spill] sm:$0xff] %v15940_v54 }
  0xe1   : > { %13261 = vmatmul.mubr.msk.f32.gmra.mrb[6].mxu0 %vm279_vm0, %v15920_v21  ;;  %v15953_v21 = vld [vmem:[%s15409_s10 + $0x89] sm:$0xff] }
  0xe2   : > { %13263 = vmatprep.mubr.msk.f32.mxu0 %vm279_vm0, %v15923_v18  ;;  %v15950_v18 = vld [vmem:[%s15409_s10 + $0x81] sm:$0xff]  ;;  %18728 = vst [vmem:[#allocation47_spill] sm:$0xff] %v15953_v21 }
  0xe3   : > { %18727 = vst [vmem:[#allocation46_spill] sm:$0xff] %v15950_v18 }
  0xe5   : > { %13264 = vmatmul.mubr.msk.f32.gmra.mrb[8].mxu0 %vm279_vm0, %v15930_v23  ;;  %v15963_v23 = vld [vmem:[%s15409_s10 + $0x99] sm:$0xff] }
  0xe6   : > { %13266 = vmatprep.mubr.msk.f32.mxu0 %vm279_vm0, %v15933_v19  ;;  %v15960_v19 = vld [vmem:[%s15409_s10 + $0x91] sm:$0xff]  ;;  %18730 = vst [vmem:[#allocation49_spill] sm:$0xff] %v15963_v23 }
  0xe7   : > { %18729 = vst [vmem:[#allocation48_spill] sm:$0xff] %v15960_v19 }
  0xe9   : > { %13267 = vmatmul.mubr.msk.f32.gmra.mrb[10].mxu0 %vm279_vm0, %v15940_v54  ;;  %v15973_v54 = vld [vmem:[%s15409_s10 + $0xa9] sm:$0xff] }
  0xea   : > { %13269 = vmatprep.mubr.msk.f32.mxu0 %vm279_vm0, %v15943_v22  ;;  %v15970_v22 = vld [vmem:[%s15409_s10 + $0xa1] sm:$0xff]  ;;  %18732 = vst [vmem:[#allocation51_spill] sm:$0xff] %v15973_v54 }
  0xeb   : > { %18731 = vst [vmem:[#allocation50_spill] sm:$0xff] %v15970_v22 }
  0xed   : > { %13270 = vmatmul.mubr.msk.f32.gmra.mrb[12].mxu0 %vm279_vm0, %v15950_v18  ;;  %v15983_v18 = vld [vmem:[%s15409_s10 + $0xb9] sm:$0xff] }
  0xee   : > { %13272 = vmatprep.mubr.msk.f32.mxu0 %vm279_vm0, %v15953_v21  ;;  %v15980_v21 = vld [vmem:[%s15409_s10 + $0xb1] sm:$0xff]  ;;  %18734 = vst [vmem:[#allocation53_spill] sm:$0xff] %v15983_v18 }
  0xef   : > { %18733 = vst [vmem:[#allocation52_spill] sm:$0xff] %v15980_v21 }
  0xf1   : > { %13273 = vmatmul.mubr.msk.f32.gmra.mrb[14].mxu0 %vm279_vm0, %v15960_v19  ;;  %v15993_v19 = vld [vmem:[%s15409_s10 + $0xc9] sm:$0xff] }
  0xf2   : > { %13275 = vmatprep.mubr.msk.f32.mxu0 %vm279_vm0, %v15963_v23  ;;  %v15990_v23 = vld [vmem:[%s15409_s10 + $0xc1] sm:$0xff]  ;;  %18736 = vst [vmem:[#allocation55_spill] sm:$0xff] %v15993_v19 }
  0xf3   : > { %18735 = vst [vmem:[#allocation54_spill] sm:$0xff] %v15990_v23 }
  0xf5   : > { %13276 = vmatmul.mubr.msk.f32.gmra.mrb[16].mxu0 %vm279_vm0, %v15970_v22  ;;  %v16003_v22 = vld [vmem:[%s15409_s10 + $0xd9] sm:$0xff] }
  0xf6   : > { %13278 = vmatprep.mubr.msk.f32.mxu0 %vm279_vm0, %v15973_v54  ;;  %v16000_v54 = vld [vmem:[%s15409_s10 + $0xd1] sm:$0xff]  ;;  %18738 = vst [vmem:[#allocation57_spill] sm:$0xff] %v16003_v22 }
  0xf7   : > { %18737 = vst [vmem:[#allocation56_spill] sm:$0xff] %v16000_v54 }
  0xf9   : > { %13279 = vmatmul.mubr.msk.f32.gmra.mrb[18].mxu0 %vm279_vm0, %v15980_v21  ;;  %v16013_v21 = vld [vmem:[%s15409_s10 + $0xe9] sm:$0xff] }
  0xfa   : > { %13281 = vmatprep.mubr.msk.f32.mxu0 %vm279_vm0, %v15983_v18  ;;  %v16010_v18 = vld [vmem:[%s15409_s10 + $0xe1] sm:$0xff]  ;;  %18740 = vst [vmem:[#allocation59_spill] sm:$0xff] %v16013_v21 }
  0xfb   : > { %18739 = vst [vmem:[#allocation58_spill] sm:$0xff] %v16010_v18 }
  0xfd   : > { %13282 = vmatmul.mubr.msk.f32.gmra.mrb[20].mxu0 %vm279_vm0, %v15990_v23  ;;  %v16023_v23 = vld [vmem:[%s15409_s10 + $0xf9] sm:$0xff] }
  0xfe   : > { %13284 = vmatprep.mubr.msk.f32.mxu0 %vm279_vm0, %v15993_v19  ;;  %v16020_v19 = vld [vmem:[%s15409_s10 + $0xf1] sm:$0xff]  ;;  %18742 = vst [vmem:[#allocation61_spill] sm:$0xff] %v16023_v23 }
  0xff   : > { %18741 = vst [vmem:[#allocation60_spill] sm:$0xff] %v16020_v19 }
 0x101   : > { %13285 = vmatmul.mubr.msk.f32.gmra.mrb[22].mxu0 %vm279_vm0, %v16000_v54  ;;  %v16033_v54 = vld [vmem:[%s15409_s10 + $0x109] sm:$0xff] }
 0x102   : > { %13287 = vmatprep.mubr.msk.f32.mxu0 %vm279_vm0, %v16003_v22  ;;  %v16030_v22 = vld [vmem:[%s15409_s10 + $0x101] sm:$0xff]  ;;  %18744 = vst [vmem:[#allocation63_spill] sm:$0xff] %v16033_v54 }
 0x103   : > { %18743 = vst [vmem:[#allocation62_spill] sm:$0xff] %v16030_v22 }
 0x105   : > { %13288 = vmatmul.mubr.msk.f32.gmra.mrb[24].mxu0 %vm279_vm0, %v16010_v18  ;;  %v16043_v18 = vld [vmem:[%s15409_s10 + $0x119] sm:$0xff] }
 0x106   : > { %13290 = vmatprep.mubr.msk.f32.mxu0 %vm279_vm0, %v16013_v21  ;;  %v16040_v21 = vld [vmem:[%s15409_s10 + $0x111] sm:$0xff]  ;;  %18746 = vst [vmem:[#allocation65_spill] sm:$0xff] %v16043_v18 }
 0x107   : > { %18745 = vst [vmem:[#allocation64_spill] sm:$0xff] %v16040_v21 }
 0x109   : > { %13291 = vmatmul.mubr.msk.f32.gmra.mrb[26].mxu0 %vm279_vm0, %v16020_v19  ;;  %v16053_v19 = vld [vmem:[%s15409_s10 + $0x129] sm:$0xff] }
 0x10a   : > { %13293 = vmatprep.mubr.msk.f32.mxu0 %vm279_vm0, %v16023_v23  ;;  %v16050_v23 = vld [vmem:[%s15409_s10 + $0x121] sm:$0xff]  ;;  %18748 = vst [vmem:[#allocation67_spill] sm:$0xff] %v16053_v19 }
 0x10b   : > { %18747 = vst [vmem:[#allocation66_spill] sm:$0xff] %v16050_v23 }
 0x10d   : > { %13294 = vmatmul.mubr.msk.f32.gmra.mrb[28].mxu0 %vm279_vm0, %v16030_v22  ;;  %v16063_v22 = vld [vmem:[%s15409_s10 + $0x139] sm:$0xff] }
 0x10e   : > { %13296 = vmatprep.mubr.msk.f32.mxu0 %vm279_vm0, %v16033_v54  ;;  %v16060_v54 = vld [vmem:[%s15409_s10 + $0x131] sm:$0xff]  ;;  %18750 = vst [vmem:[#allocation69_spill] sm:$0xff] %v16063_v22 }
 0x10f   : > { %18749 = vst [vmem:[#allocation68_spill] sm:$0xff] %v16060_v54 }
 0x111   : > { %13297 = vmatmul.mubr.msk.f32.gmra.mrb[30].mxu0 %vm279_vm0, %v16040_v21  ;;  %v16073_v21 = vld [vmem:[%s15409_s10 + $0x149] sm:$0xff] }
 0x112   : > { %13299 = vmatprep.mubr.msk.f32.mxu0 %vm279_vm0, %v16043_v18  ;;  %v16070_v18 = vld [vmem:[%s15409_s10 + $0x141] sm:$0xff]  ;;  %18752 = vst [vmem:[#allocation71_spill] sm:$0xff] %v16073_v21 }
 0x113   : > { %18751 = vst [vmem:[#allocation70_spill] sm:$0xff] %v16070_v18 }
 0x115   : > { %13300 = vmatmul.mubr.msk.f32.gmra.mrb[32].mxu0 %vm279_vm0, %v16050_v23  ;;  %v16083_v23 = vld [vmem:[%s15409_s10 + $0x159] sm:$0xff] }
 0x116   : > { %13302 = vmatprep.mubr.msk.f32.mxu0 %vm279_vm0, %v16053_v19  ;;  %v16080_v19 = vld [vmem:[%s15409_s10 + $0x151] sm:$0xff]  ;;  %18754 = vst [vmem:[#allocation73_spill] sm:$0xff] %v16083_v23 }
 0x117   : > { %18753 = vst [vmem:[#allocation72_spill] sm:$0xff] %v16080_v19 }
 0x119   : > { %13303 = vmatmul.mubr.msk.f32.gmra.mrb[34].mxu0 %vm279_vm0, %v16060_v54  ;;  %v16093_v54 = vld [vmem:[%s15409_s10 + $0x169] sm:$0xff] }
 0x11a   : > { %13305 = vmatprep.mubr.msk.f32.mxu0 %vm279_vm0, %v16063_v22  ;;  %v16090_v22 = vld [vmem:[%s15409_s10 + $0x161] sm:$0xff]  ;;  %18755 = vst [vmem:[#allocation74_spill] sm:$0xff] %v16093_v54 }
 0x11d   : > { %13306 = vmatmul.mubr.msk.f32.gmra.mrb[36].mxu0 %vm279_vm0, %v16070_v18  ;;  %v16103_v18 = vld [vmem:[%s15409_s10 + $0x179] sm:$0xff] }
 0x11e   : > { %13308 = vmatprep.mubr.msk.f32.mxu0 %vm279_vm0, %v16073_v21  ;;  %v16100_v21 = vld [vmem:[%s15409_s10 + $0x171] sm:$0xff]  ;;  %18756 = vst [vmem:[#allocation75_spill] sm:$0xff] %v16103_v18 }
 0x121   : > { %13309 = vmatmul.mubr.msk.f32.gmra.mrb[38].mxu0 %vm279_vm0, %v16080_v19  ;;  %v16113_v19 = vld [vmem:[%s15409_s10 + $0x189] sm:$0xff] }
 0x122   : > { %13311 = vmatprep.mubr.msk.f32.mxu0 %vm279_vm0, %v16083_v23  ;;  %v16110_v23 = vld [vmem:[%s15409_s10 + $0x181] sm:$0xff] }
 0x125   : > { %13312 = vmatmul.mubr.msk.f32.gmra.mrb[40].mxu0 %vm279_vm0, %v16090_v22 }
 0x126   : > { %13314 = vmatprep.mubr.msk.f32.mxu0 %vm279_vm0, %v16093_v54  ;;  %v16120_v54 = vld [vmem:[%s15409_s10 + $0x191] sm:$0xff] }
 0x129   : > { %13315 = vmatmul.mubr.msk.f32.gmra.mrb[42].mxu0 %vm279_vm0, %v16100_v21 }
 0x12a   : > { %13317 = vmatprep.mubr.msk.f32.mxu0 %vm279_vm0, %v16103_v18  ;;  %v11482_v18 = vld [vmem:[%s18534_s1 + $0x28] sm:$0xff] }
 0x12d   : > { %13318 = vmatmul.mubr.msk.f32.gmra.mrb[44].mxu0 %vm279_vm0, %v16110_v23 }
 0x12e   : > { %13320 = vmatprep.mubr.msk.f32.mxu0 %vm279_vm0, %v16113_v19 }
 0x131   : > { %13321 = vmatmul.mubr.msk.f32.gmra.mrb[46].mxu0 %vm279_vm0, %v16120_v54 }
 0x132   : > { %13325 = vmatprep.mubr.msk.f32.mxu0 %vm279_vm0, %v15661_v55  ;;  %v16222_v55 = vld [vmem:[%s15409_s10 + $0x19f] sm:$0xff] }
 0x135   : > { %13326 = vmatmul.mubr.msk.f32.vlgmr.msra.gmra.mrb[0].mxu0 %vm279_vm0, %v15664_v56  ;;  %v16229_v56 = vld [vmem:[%s15409_s10 + $0x1a7] sm:$0xff] }
 0x136   : > { %13398 = vmatpush3.msra.mxu0 %v15893_v20  ;;  %13328 = vmatprep.mubr.msk.f32.mxu0 %vm279_vm0, %v15672_v57  ;;  %v16219_v20 = vld [vmem:[%s15409_s10 + $0x197] sm:$0xff] }
 0x137   : > { %13471 = vmatprep.subr.mxu0 %v11482_v18  ;;  %v11531_v57 = vld [vmem:[%s18534_s1 + $0x30] sm:$0xff] }
 0x139   : > { %13329 = vmatmul.mubr.msk.f32.gmra.mrb[2].mxu0 %vm279_vm0, %v15675_v58 }
 0x13a   : > { %13331 = vmatprep.mubr.msk.f32.mxu0 %vm279_vm0, %v15682_v59 }
 0x13d   : > { %13332 = vmatmul.mubr.msk.f32.gmra.mrb[4].mxu0 %vm279_vm0, %v15685_v60 }
 0x13e   : > { %13334 = vmatprep.mubr.msk.f32.mxu0 %vm279_vm0, %v15692_v61 }
 0x141   : > { %13335 = vmatmul.mubr.msk.f32.gmra.mrb[6].mxu0 %vm279_vm0, %v15695_v62 }
 0x142   : > { %13337 = vmatprep.mubr.msk.f32.mxu0 %vm279_vm0, %v15702_v63 }
 0x145   : > { %13338 = vmatmul.mubr.msk.f32.gmra.mrb[8].mxu0 %vm279_vm0, %v15705_v0 }
 0x146   : > { %13340 = vmatprep.mubr.msk.f32.mxu0 %vm279_vm0, %v15712_v1 }
 0x149   : > { %13341 = vmatmul.mubr.msk.f32.gmra.mrb[10].mxu0 %vm279_vm0, %v15715_v2 }
 0x14a   : > { %13343 = vmatprep.mubr.msk.f32.mxu0 %vm279_vm0, %v15722_v3 }
 0x14d   : > { %13344 = vmatmul.mubr.msk.f32.gmra.mrb[12].mxu0 %vm279_vm0, %v15725_v4 }
 0x14e   : > { %13346 = vmatprep.mubr.msk.f32.mxu0 %vm279_vm0, %v15732_v5 }
 0x151   : > { %13347 = vmatmul.mubr.msk.f32.gmra.mrb[14].mxu0 %vm279_vm0, %v15735_v51 }
 0x152   : > { %13349 = vmatprep.mubr.msk.f32.mxu0 %vm279_vm0, %v15742_v52 }
 0x155   : > { %13350 = vmatmul.mubr.msk.f32.gmra.mrb[16].mxu0 %vm279_vm0, %v15745_v53 }
 0x156   : > { %13352 = vmatprep.mubr.msk.f32.mxu0 %vm279_vm0, %v15752_v50 }
 0x159   : > { %13353 = vmatmul.mubr.msk.f32.gmra.mrb[18].mxu0 %vm279_vm0, %v15755_v49 }
 0x15a   : > { %13355 = vmatprep.mubr.msk.f32.mxu0 %vm279_vm0, %v15762_v48 }
 0x15d   : > { %13356 = vmatmul.mubr.msk.f32.gmra.mrb[20].mxu0 %vm279_vm0, %v15765_v47 }
 0x15e   : > { %13358 = vmatprep.mubr.msk.f32.mxu0 %vm279_vm0, %v15772_v46 }
 0x161   : > { %13359 = vmatmul.mubr.msk.f32.gmra.mrb[22].mxu0 %vm279_vm0, %v15775_v45 }
 0x162   : > { %13361 = vmatprep.mubr.msk.f32.mxu0 %vm279_vm0, %v15782_v44 }
 0x165   : > { %13362 = vmatmul.mubr.msk.f32.gmra.mrb[24].mxu0 %vm279_vm0, %v15785_v43 }
 0x166   : > { %13364 = vmatprep.mubr.msk.f32.mxu0 %vm279_vm0, %v15792_v42 }
 0x169   : > { %13365 = vmatmul.mubr.msk.f32.gmra.mrb[26].mxu0 %vm279_vm0, %v15795_v41 }
 0x16a   : > { %13367 = vmatprep.mubr.msk.f32.mxu0 %vm279_vm0, %v15802_v40 }
 0x16d   : > { %13368 = vmatmul.mubr.msk.f32.gmra.mrb[28].mxu0 %vm279_vm0, %v15805_v39 }
 0x16e   : > { %13370 = vmatprep.mubr.msk.f32.mxu0 %vm279_vm0, %v15812_v38 }
 0x171   : > { %13371 = vmatmul.mubr.msk.f32.gmra.mrb[30].mxu0 %vm279_vm0, %v15815_v37 }
 0x172   : > { %13373 = vmatprep.mubr.msk.f32.mxu0 %vm279_vm0, %v15822_v36 }
 0x175   : > { %13374 = vmatmul.mubr.msk.f32.gmra.mrb[32].mxu0 %vm279_vm0, %v15825_v35 }
 0x176   : > { %13376 = vmatprep.mubr.msk.f32.mxu0 %vm279_vm0, %v15832_v34 }
 0x179   : > { %13377 = vmatmul.mubr.msk.f32.gmra.mrb[34].mxu0 %vm279_vm0, %v15835_v33 }
 0x17a   : > { %13379 = vmatprep.mubr.msk.f32.mxu0 %vm279_vm0, %v15842_v32 }
 0x17d   : > { %13380 = vmatmul.mubr.msk.f32.gmra.mrb[36].mxu0 %vm279_vm0, %v15845_v31 }
 0x17e   : > { %13382 = vmatprep.mubr.msk.f32.mxu0 %vm279_vm0, %v15852_v30 }
 0x181   : > { %13383 = vmatmul.mubr.msk.f32.gmra.mrb[38].mxu0 %vm279_vm0, %v15855_v29 }
 0x182   : > { %13385 = vmatprep.mubr.msk.f32.mxu0 %vm279_vm0, %v15862_v28 }
 0x185   : > { %13386 = vmatmul.mubr.msk.f32.gmra.mrb[40].mxu0 %vm279_vm0, %v15865_v27 }
 0x186   : > { %13388 = vmatprep.mubr.msk.f32.mxu0 %vm279_vm0, %v15872_v26 }
 0x189   : > { %13389 = vmatmul.mubr.msk.f32.gmra.mrb[42].mxu0 %vm279_vm0, %v15875_v25 }
 0x18a   : > { %13391 = vmatprep.mubr.msk.f32.mxu0 %vm279_vm0, %v15882_v24 }
 0x18d   : > { %13392 = vmatmul.mubr.msk.f32.gmra.mrb[44].mxu0 %vm279_vm0, %v16219_v20 }
 0x18e   : > { %13394 = vmatprep.mubr.msk.f32.mxu0 %vm279_vm0, %v16222_v55 }
 0x191   : > { %13395 = vmatmul.mubr.msk.f32.gmra.mrb[46].mxu0 %vm279_vm0, %v16229_v56 }
 0x192   : > { %13399 = vmatprep.mubr.msk.f32.mxu0 %vm279_vm0, %v15423_v6  ;;  %v18757_v6 = vld [vmem:[#allocation3_spill] sm:$0xff] }
 0x195   : > { %13400 = vmatmul.mubr.msk.f32.vlgmr.msra.gmra.mrb[0].mxu0 %vm279_vm0, %v15426_v7  ;;  %v18758_v7 = vld [vmem:[#allocation4_spill] sm:$0xff] }
 0x196   : > { %13472 = vmatpush3.msra.mxu0 %v11482_v18  ;;  %13402 = vmatprep.mubr.msk.f32.mxu0 %vm279_vm0, %v15434_v8  ;;  %v18759_v8 = vld [vmem:[#allocation5_spill] sm:$0xff]  ;;  %v18769_v18 = vld [vmem:[#allocation15_spill] sm:$0xff] }
 0x197   : > { %13545 = vmatprep.subr.mxu0 %v11531_v57 }
 0x199   : > { %13403 = vmatmul.mubr.msk.f32.gmra.mrb[2].mxu0 %vm279_vm0, %v15437_v9  ;;  %v18760_v9 = vld [vmem:[#allocation6_spill] sm:$0xff] }
 0x19a   : > { %13405 = vmatprep.mubr.msk.f32.mxu0 %vm279_vm0, %v15444_v10  ;;  %v18761_v10 = vld [vmem:[#allocation7_spill] sm:$0xff] }
 0x19d   : > { %13406 = vmatmul.mubr.msk.f32.gmra.mrb[4].mxu0 %vm279_vm0, %v15447_v11  ;;  %v18762_v11 = vld [vmem:[#allocation8_spill] sm:$0xff] }
 0x19e   : > { %13408 = vmatprep.mubr.msk.f32.mxu0 %vm279_vm0, %v15454_v12  ;;  %v18763_v12 = vld [vmem:[#allocation9_spill] sm:$0xff] }
 0x1a1   : > { %13409 = vmatmul.mubr.msk.f32.gmra.mrb[6].mxu0 %vm279_vm0, %v15457_v13  ;;  %v18764_v13 = vld [vmem:[#allocation10_spill] sm:$0xff] }
 0x1a2   : > { %13411 = vmatprep.mubr.msk.f32.mxu0 %vm279_vm0, %v15464_v14  ;;  %v18765_v14 = vld [vmem:[#allocation11_spill] sm:$0xff] }
 0x1a5   : > { %13412 = vmatmul.mubr.msk.f32.gmra.mrb[8].mxu0 %vm279_vm0, %v15467_v15  ;;  %v18766_v15 = vld [vmem:[#allocation12_spill] sm:$0xff] }
 0x1a6   : > { %13414 = vmatprep.mubr.msk.f32.mxu0 %vm279_vm0, %v15474_v16  ;;  %v18767_v16 = vld [vmem:[#allocation13_spill] sm:$0xff] }
 0x1a9   : > { %13415 = vmatmul.mubr.msk.f32.gmra.mrb[10].mxu0 %vm279_vm0, %v15477_v17  ;;  %v18768_v17 = vld [vmem:[#allocation14_spill] sm:$0xff] }
 0x1aa   : > { %13417 = vmatprep.mubr.msk.f32.mxu0 %vm279_vm0, %v18757_v6  ;;  %v18770_v6 = vld [vmem:[#allocation16_spill] sm:$0xff] }
 0x1ad   : > { %13418 = vmatmul.mubr.msk.f32.gmra.mrb[12].mxu0 %vm279_vm0, %v18758_v7  ;;  %v18771_v7 = vld [vmem:[#allocation17_spill] sm:$0xff] }
 0x1ae   : > { %13420 = vmatprep.mubr.msk.f32.mxu0 %vm279_vm0, %v18759_v8  ;;  %v18772_v8 = vld [vmem:[#allocation18_spill] sm:$0xff] }
 0x1b1   : > { %13421 = vmatmul.mubr.msk.f32.gmra.mrb[14].mxu0 %vm279_vm0, %v18760_v9  ;;  %v18773_v9 = vld [vmem:[#allocation19_spill] sm:$0xff] }
 0x1b2   : > { %13423 = vmatprep.mubr.msk.f32.mxu0 %vm279_vm0, %v18761_v10  ;;  %v18774_v10 = vld [vmem:[#allocation20_spill] sm:$0xff] }
 0x1b5   : > { %13424 = vmatmul.mubr.msk.f32.gmra.mrb[16].mxu0 %vm279_vm0, %v18762_v11  ;;  %v18775_v11 = vld [vmem:[#allocation21_spill] sm:$0xff] }
 0x1b6   : > { %13426 = vmatprep.mubr.msk.f32.mxu0 %vm279_vm0, %v18763_v12  ;;  %v18776_v12 = vld [vmem:[#allocation22_spill] sm:$0xff] }
 0x1b9   : > { %13427 = vmatmul.mubr.msk.f32.gmra.mrb[18].mxu0 %vm279_vm0, %v18764_v13  ;;  %v18777_v13 = vld [vmem:[#allocation23_spill] sm:$0xff] }
 0x1ba   : > { %13429 = vmatprep.mubr.msk.f32.mxu0 %vm279_vm0, %v18765_v14  ;;  %v18778_v14 = vld [vmem:[#allocation24_spill] sm:$0xff] }
 0x1bd   : > { %13430 = vmatmul.mubr.msk.f32.gmra.mrb[20].mxu0 %vm279_vm0, %v18766_v15  ;;  %v18779_v15 = vld [vmem:[#allocation25_spill] sm:$0xff] }
 0x1be   : > { %13432 = vmatprep.mubr.msk.f32.mxu0 %vm279_vm0, %v18767_v16  ;;  %v18780_v16 = vld [vmem:[#allocation26_spill] sm:$0xff] }
 0x1c1   : > { %13433 = vmatmul.mubr.msk.f32.gmra.mrb[22].mxu0 %vm279_vm0, %v18768_v17  ;;  %v18781_v17 = vld [vmem:[#allocation27_spill] sm:$0xff] }
 0x1c2   : > { %13435 = vmatprep.mubr.msk.f32.mxu0 %vm279_vm0, %v18769_v18  ;;  %v18782_v18 = vld [vmem:[#allocation28_spill] sm:$0xff] }
 0x1c5   : > { %13436 = vmatmul.mubr.msk.f32.gmra.mrb[24].mxu0 %vm279_vm0, %v18770_v6  ;;  %v18783_v6 = vld [vmem:[#allocation29_spill] sm:$0xff] }
 0x1c6   : > { %13438 = vmatprep.mubr.msk.f32.mxu0 %vm279_vm0, %v18771_v7  ;;  %v18784_v7 = vld [vmem:[#allocation30_spill] sm:$0xff] }
 0x1c9   : > { %13439 = vmatmul.mubr.msk.f32.gmra.mrb[26].mxu0 %vm279_vm0, %v18772_v8  ;;  %v18785_v8 = vld [vmem:[#allocation31_spill] sm:$0xff] }
 0x1ca   : > { %13441 = vmatprep.mubr.msk.f32.mxu0 %vm279_vm0, %v18773_v9  ;;  %v18786_v9 = vld [vmem:[#allocation32_spill] sm:$0xff] }
 0x1cd   : > { %13442 = vmatmul.mubr.msk.f32.gmra.mrb[28].mxu0 %vm279_vm0, %v18774_v10  ;;  %v18787_v10 = vld [vmem:[#allocation33_spill] sm:$0xff] }
 0x1ce   : > { %13444 = vmatprep.mubr.msk.f32.mxu0 %vm279_vm0, %v18775_v11  ;;  %v18788_v11 = vld [vmem:[#allocation34_spill] sm:$0xff] }
 0x1d1   : > { %13445 = vmatmul.mubr.msk.f32.gmra.mrb[30].mxu0 %vm279_vm0, %v18776_v12  ;;  %v18789_v12 = vld [vmem:[#allocation35_spill] sm:$0xff] }
 0x1d2   : > { %13447 = vmatprep.mubr.msk.f32.mxu0 %vm279_vm0, %v18777_v13  ;;  %v16327_v13 = vld [vmem:[%s15409_s10 + $0x198] sm:$0xff] }
 0x1d5   : > { %13448 = vmatmul.mubr.msk.f32.gmra.mrb[32].mxu0 %vm279_vm0, %v18778_v14  ;;  %v16330_v14 = vld [vmem:[%s15409_s10 + $0x1a0] sm:$0xff] }
 0x1d6   : > { %13450 = vmatprep.mubr.msk.f32.mxu0 %vm279_vm0, %v18779_v15  ;;  %v16337_v15 = vld [vmem:[%s15409_s10 + $0x1a8] sm:$0xff] }
 0x1d9   : > { %13451 = vmatmul.mubr.msk.f32.gmra.mrb[34].mxu0 %vm279_vm0, %v18780_v16  ;;  %v18790_v16 = vld [vmem:[#allocation36_spill] sm:$0xff] }
 0x1da   : > { %13453 = vmatprep.mubr.msk.f32.mxu0 %vm279_vm0, %v18781_v17  ;;  %v11580_v17 = vld [vmem:[%s18534_s1 + $0x38] sm:$0xff] }
 0x1dd   : > { %13454 = vmatmul.mubr.msk.f32.gmra.mrb[36].mxu0 %vm279_vm0, %v18782_v18  ;;  %v18791_v18 = vld [vmem:[#allocation37_spill] sm:$0xff] }
 0x1de   : > { %13456 = vmatprep.mubr.msk.f32.mxu0 %vm279_vm0, %v18783_v6  ;;  %v18792_v6 = vld [vmem:[#allocation38_spill] sm:$0xff] }
 0x1e1   : > { %13457 = vmatmul.mubr.msk.f32.gmra.mrb[38].mxu0 %vm279_vm0, %v18784_v7  ;;  %v18793_v7 = vld [vmem:[#allocation39_spill] sm:$0xff] }
 0x1e2   : > { %13459 = vmatprep.mubr.msk.f32.mxu0 %vm279_vm0, %v18785_v8  ;;  %v18794_v8 = vld [vmem:[#allocation40_spill] sm:$0xff] }
 0x1e5   : > { %13460 = vmatmul.mubr.msk.f32.gmra.mrb[40].mxu0 %vm279_vm0, %v18786_v9  ;;  %v18795_v9 = vld [vmem:[#allocation41_spill] sm:$0xff] }
 0x1e6   : > { %13462 = vmatprep.mubr.msk.f32.mxu0 %vm279_vm0, %v18787_v10  ;;  %v18796_v10 = vld [vmem:[#allocation42_spill] sm:$0xff] }
 0x1e9   : > { %13463 = vmatmul.mubr.msk.f32.gmra.mrb[42].mxu0 %vm279_vm0, %v18788_v11  ;;  %v18797_v11 = vld [vmem:[#allocation43_spill] sm:$0xff] }
 0x1ea   : > { %13465 = vmatprep.mubr.msk.f32.mxu0 %vm279_vm0, %v18789_v12  ;;  %v18799_v12 = vld [vmem:[#allocation45_spill] sm:$0xff] }
 0x1ed   : > { %13466 = vmatmul.mubr.msk.f32.gmra.mrb[44].mxu0 %vm279_vm0, %v16327_v13 }
 0x1ee   : > { %13468 = vmatprep.mubr.msk.f32.mxu0 %vm279_vm0, %v16330_v14 }
 0x1f1   : > { %13469 = vmatmul.mubr.msk.f32.gmra.mrb[46].mxu0 %vm279_vm0, %v16337_v15 }
 0x1f2   : > { %13473 = vmatprep.mubr.msk.f32.mxu0 %vm279_vm0, %v18790_v16  ;;  %v18800_v16 = vld [vmem:[#allocation46_spill] sm:$0xff] }
 0x1f5   : > { %13474 = vmatmul.mubr.msk.f32.vlgmr.msra.gmra.mrb[0].mxu0 %vm279_vm0, %v18791_v18  ;;  %v18801_v18 = vld [vmem:[#allocation47_spill] sm:$0xff] }
 0x1f6   : > { %13546 = vmatpush3.msra.mxu0 %v11531_v57  ;;  %13476 = vmatprep.mubr.msk.f32.mxu0 %vm279_vm0, %v18792_v6  ;;  %v18798_v57 = vld [vmem:[#allocation44_spill] sm:$0xff] }
 0x1f7   : > { %13619 = vmatprep.subr.mxu0 %v11580_v17  ;;  %v18802_v6 = vld [vmem:[#allocation48_spill] sm:$0xff] }
 0x1f9   : > { %13477 = vmatmul.mubr.msk.f32.gmra.mrb[2].mxu0 %vm279_vm0, %v18793_v7  ;;  %v18803_v7 = vld [vmem:[#allocation49_spill] sm:$0xff] }
 0x1fa   : > { %13479 = vmatprep.mubr.msk.f32.mxu0 %vm279_vm0, %v18794_v8  ;;  %v18804_v8 = vld [vmem:[#allocation50_spill] sm:$0xff] }
 0x1fd   : > { %13480 = vmatmul.mubr.msk.f32.gmra.mrb[4].mxu0 %vm279_vm0, %v18795_v9  ;;  %v18805_v9 = vld [vmem:[#allocation51_spill] sm:$0xff] }
 0x1fe   : > { %13482 = vmatprep.mubr.msk.f32.mxu0 %vm279_vm0, %v18796_v10  ;;  %v18806_v10 = vld [vmem:[#allocation52_spill] sm:$0xff] }
 0x201   : > { %13483 = vmatmul.mubr.msk.f32.gmra.mrb[6].mxu0 %vm279_vm0, %v18797_v11  ;;  %v18807_v11 = vld [vmem:[#allocation53_spill] sm:$0xff] }
 0x202   : > { %13485 = vmatprep.mubr.msk.f32.mxu0 %vm279_vm0, %v18798_v57  ;;  %v18808_v57 = vld [vmem:[#allocation54_spill] sm:$0xff] }
 0x205   : > { %13486 = vmatmul.mubr.msk.f32.gmra.mrb[8].mxu0 %vm279_vm0, %v18799_v12  ;;  %v18809_v12 = vld [vmem:[#allocation55_spill] sm:$0xff] }
 0x206   : > { %13488 = vmatprep.mubr.msk.f32.mxu0 %vm279_vm0, %v18800_v16  ;;  %v18810_v16 = vld [vmem:[#allocation56_spill] sm:$0xff] }
 0x209   : > { %13489 = vmatmul.mubr.msk.f32.gmra.mrb[10].mxu0 %vm279_vm0, %v18801_v18  ;;  %v18811_v18 = vld [vmem:[#allocation57_spill] sm:$0xff] }
 0x20a   : > { %13491 = vmatprep.mubr.msk.f32.mxu0 %vm279_vm0, %v18802_v6  ;;  %v18812_v6 = vld [vmem:[#allocation58_spill] sm:$0xff] }
 0x20d   : > { %13492 = vmatmul.mubr.msk.f32.gmra.mrb[12].mxu0 %vm279_vm0, %v18803_v7  ;;  %v18813_v7 = vld [vmem:[#allocation59_spill] sm:$0xff] }
 0x20e   : > { %13494 = vmatprep.mubr.msk.f32.mxu0 %vm279_vm0, %v18804_v8  ;;  %v18814_v8 = vld [vmem:[#allocation60_spill] sm:$0xff] }
 0x211   : > { %13495 = vmatmul.mubr.msk.f32.gmra.mrb[14].mxu0 %vm279_vm0, %v18805_v9  ;;  %v18815_v9 = vld [vmem:[#allocation61_spill] sm:$0xff] }
 0x212   : > { %13497 = vmatprep.mubr.msk.f32.mxu0 %vm279_vm0, %v18806_v10  ;;  %v18816_v10 = vld [vmem:[#allocation62_spill] sm:$0xff] }
 0x215   : > { %13498 = vmatmul.mubr.msk.f32.gmra.mrb[16].mxu0 %vm279_vm0, %v18807_v11  ;;  %v18817_v11 = vld [vmem:[#allocation63_spill] sm:$0xff] }
 0x216   : > { %13500 = vmatprep.mubr.msk.f32.mxu0 %vm279_vm0, %v18808_v57  ;;  %v18818_v57 = vld [vmem:[#allocation64_spill] sm:$0xff] }
 0x219   : > { %13501 = vmatmul.mubr.msk.f32.gmra.mrb[18].mxu0 %vm279_vm0, %v18809_v12  ;;  %v18819_v12 = vld [vmem:[#allocation65_spill] sm:$0xff] }
 0x21a   : > { %13503 = vmatprep.mubr.msk.f32.mxu0 %vm279_vm0, %v18810_v16  ;;  %v18820_v16 = vld [vmem:[#allocation66_spill] sm:$0xff] }
 0x21d   : > { %13504 = vmatmul.mubr.msk.f32.gmra.mrb[20].mxu0 %vm279_vm0, %v18811_v18  ;;  %v18821_v18 = vld [vmem:[#allocation67_spill] sm:$0xff] }
 0x21e   : > { %13506 = vmatprep.mubr.msk.f32.mxu0 %vm279_vm0, %v18812_v6  ;;  %v18822_v6 = vld [vmem:[#allocation68_spill] sm:$0xff] }
 0x221   : > { %13507 = vmatmul.mubr.msk.f32.gmra.mrb[22].mxu0 %vm279_vm0, %v18813_v7  ;;  %v18823_v7 = vld [vmem:[#allocation69_spill] sm:$0xff] }
 0x222   : > { %13509 = vmatprep.mubr.msk.f32.mxu0 %vm279_vm0, %v18814_v8  ;;  %v18824_v8 = vld [vmem:[#allocation70_spill] sm:$0xff] }
 0x225   : > { %13510 = vmatmul.mubr.msk.f32.gmra.mrb[24].mxu0 %vm279_vm0, %v18815_v9  ;;  %v18825_v9 = vld [vmem:[#allocation71_spill] sm:$0xff] }
 0x226   : > { %13512 = vmatprep.mubr.msk.f32.mxu0 %vm279_vm0, %v18816_v10  ;;  %v18826_v10 = vld [vmem:[#allocation72_spill] sm:$0xff] }
 0x229   : > { %13513 = vmatmul.mubr.msk.f32.gmra.mrb[26].mxu0 %vm279_vm0, %v18817_v11  ;;  %v18827_v11 = vld [vmem:[#allocation73_spill] sm:$0xff] }
 0x22a   : > { %13515 = vmatprep.mubr.msk.f32.mxu0 %vm279_vm0, %v18818_v57  ;;  %v18828_v57 = vld [vmem:[#allocation74_spill] sm:$0xff] }
 0x22d   : > { %13516 = vmatmul.mubr.msk.f32.gmra.mrb[28].mxu0 %vm279_vm0, %v18819_v12  ;;  %v18829_v12 = vld [vmem:[#allocation75_spill] sm:$0xff] }
 0x22e   : > { %13518 = vmatprep.mubr.msk.f32.mxu0 %vm279_vm0, %v18820_v16  ;;  %v16435_v16 = vld [vmem:[%s15409_s10 + $0x199] sm:$0xff] }
 0x231   : > { %13519 = vmatmul.mubr.msk.f32.gmra.mrb[30].mxu0 %vm279_vm0, %v18821_v18  ;;  %v4137_v18 = vld [vmem:[%s15409_s10 + $0xd0] sm:$0xff] }
 0x232   : > { %13521 = vmatprep.mubr.msk.f32.mxu0 %vm279_vm0, %v18822_v6  ;;  %v327_v6 = vld [vmem:[%s18539_s6 + $0x118] sm:$0xff] }
 0x233   : > { %vm375_vm15 = vcmp.gt.f32.partialorder %v327_v6, 0.5  ;;  %v4155_v6 = vld [vmem:[%s15409_s10 + $0x160] sm:$0xff] }
 0x235   : > { %13522 = vmatmul.mubr.msk.f32.gmra.mrb[32].mxu0 %vm279_vm0, %v18823_v7  ;;  %v4138_v7 = vld [vmem:[%s15409_s10 + $0xd8] sm:$0xff] }
 0x236   : > { %13524 = vmatprep.mubr.msk.f32.mxu0 %vm279_vm0, %v18824_v8 }
 0x239   : > { %13525 = vmatmul.mubr.msk.f32.gmra.mrb[34].mxu0 %vm279_vm0, %v18825_v9 }
 0x23a   : > { %13527 = vmatprep.mubr.msk.f32.mxu0 %vm279_vm0, %v18826_v10  ;;  %v328_v10 = vld [vmem:[%s18539_s6 + $0x120] sm:$0xff] }
 0x23d   : > { %13528 = vmatmul.mubr.msk.f32.gmra.mrb[36].mxu0 %vm279_vm0, %v18827_v11  ;;  %v4139_v11 = vld [vmem:[%s15409_s10 + $0xe0] sm:$0xff] }
 0x23e   : > { %13530 = vmatprep.mubr.msk.f32.mxu0 %vm279_vm0, %v16090_v22  ;;  %v16438_v22 = vld [vmem:[%s15409_s10 + $0x1a1] sm:$0xff] }
 0x241   : > { %13531 = vmatmul.mubr.msk.f32.gmra.mrb[38].mxu0 %vm279_vm0, %v18828_v57  ;;  %v329_v57 = vld [vmem:[%s18539_s6 + $0x128] sm:$0xff] }
 0x242   : > { %13533 = vmatprep.mubr.msk.f32.mxu0 %vm279_vm0, %v16100_v21  ;;  %v16445_v21 = vld [vmem:[%s15409_s10 + $0x1a9] sm:$0xff] }
 0x245   : > { %13534 = vmatmul.mubr.msk.f32.gmra.mrb[40].mxu0 %vm279_vm0, %v18829_v12  ;;  %v4140_v12 = vld [vmem:[%s15409_s10 + $0xe8] sm:$0xff] }
 0x246   : > { %13536 = vmatprep.mubr.msk.f32.mxu0 %vm279_vm0, %v16110_v23  ;;  %v4135_v23 = vld [vmem:[%s15409_s10 + $0xc0] sm:$0xff] }
 0x249   : > { %13537 = vmatmul.mubr.msk.f32.gmra.mrb[42].mxu0 %vm279_vm0, %v16113_v19  ;;  %v11629_v19 = vld [vmem:[%s18534_s1 + $0x40] sm:$0xff] }
 0x24a   : > { %13539 = vmatprep.mubr.msk.f32.mxu0 %vm279_vm0, %v16120_v54  ;;  %v325_v54 = vld [vmem:[%s18539_s6 + $0x108] sm:$0xff] }
 0x24b   : > { %vm373_vm13 = vcmp.gt.f32.partialorder %v325_v54, 0.5  ;;  %v4154_v54 = vld [vmem:[%s15409_s10 + $0x158] sm:$0xff] }
 0x24d   : > { %13540 = vmatmul.mubr.msk.f32.gmra.mrb[44].mxu0 %vm279_vm0, %v16435_v16 }
 0x24e   : > { %13542 = vmatprep.mubr.msk.f32.mxu0 %vm279_vm0, %v16438_v22 }
 0x251   : > { %13543 = vmatmul.mubr.msk.f32.gmra.mrb[46].mxu0 %vm279_vm0, %v16445_v21 }
 0x252   : > { %13547 = vmatprep.mubr.msk.f32.mxu0 %vm279_vm0, %v15675_v58 }
 0x255   : > { %13548 = vmatmul.mubr.msk.f32.vlgmr.msra.gmra.mrb[0].mxu0 %vm279_vm0, %v15682_v59 }
 0x256   : > { %13620 = vmatpush3.msra.mxu0 %v11580_v17  ;;  %13550 = vmatprep.mubr.msk.f32.mxu0 %vm279_vm0, %v15685_v60  ;;  %v320_v60 = vld [vmem:[%s18539_s6 + $0xe0] sm:$0xff]  ;;  %v326_v17 = vld [vmem:[%s18539_s6 + $0x110] sm:$0xff] }
 0x257   : > { %13693 = vmatprep.subr.mxu0 %v11629_v19  ;;  %vm368_vm8 = vcmp.gt.f32.partialorder %v320_v60, 0.5  ;;  %vm374_vm14 = vcmp.gt.f32.partialorder %v326_v17, 0.5  ;;  %v4150_v60 = vld [vmem:[%s15409_s10 + $0x138] sm:$0xff]  ;;  %v302_v17 = vld [vmem:[%s18539_s6 + $0x50] sm:$0xff] }
 0x259   : > { %13551 = vmatmul.mubr.msk.f32.gmra.mrb[2].mxu0 %vm279_vm0, %v15692_v61  ;;  %v4131_v61 = vld [vmem:[%s15409_s10 + $0xa0] sm:$0xff] }
 0x25a   : > { %13553 = vmatprep.mubr.msk.f32.mxu0 %vm279_vm0, %v15695_v62  ;;  %v321_v62 = vld [vmem:[%s18539_s6 + $0xe8] sm:$0xff] }
 0x25b   : > { %vm369_vm9 = vcmp.gt.f32.partialorder %v321_v62, 0.5 }
 0x25d   : > { %13554 = vmatmul.mubr.msk.f32.gmra.mrb[4].mxu0 %vm279_vm0, %v15702_v63  ;;  %v4132_v63 = vld [vmem:[%s15409_s10 + $0xa8] sm:$0xff] }
 0x25e   : > { %13556 = vmatprep.mubr.msk.f32.mxu0 %vm279_vm0, %v15705_v0 }
 0x261   : > { %13557 = vmatmul.mubr.msk.f32.gmra.mrb[6].mxu0 %vm279_vm0, %v15712_v1 }
 0x262   : > { %13559 = vmatprep.mubr.msk.f32.mxu0 %vm279_vm0, %v15715_v2  ;;  %v322_v2 = vld [vmem:[%s18539_s6 + $0xf0] sm:$0xff] }
 0x263   : > { %vm370_vm10 = vcmp.gt.f32.partialorder %v322_v2, 0.5  ;;  %v4152_v2 = vld [vmem:[%s15409_s10 + $0x148] sm:$0xff] }
 0x265   : > { %13560 = vmatmul.mubr.msk.f32.gmra.mrb[8].mxu0 %vm279_vm0, %v15722_v3  ;;  %v4133_v3 = vld [vmem:[%s15409_s10 + $0xb0] sm:$0xff] }
 0x266   : > { %13562 = vmatprep.mubr.msk.f32.mxu0 %vm279_vm0, %v15725_v4  ;;  %v323_v4 = vld [vmem:[%s18539_s6 + $0xf8] sm:$0xff] }
 0x267   : > { %vm371_vm11 = vcmp.gt.f32.partialorder %v323_v4, 0.5 }
 0x269   : > { %13563 = vmatmul.mubr.msk.f32.gmra.mrb[10].mxu0 %vm279_vm0, %v15732_v5  ;;  %v4134_v5 = vld [vmem:[%s15409_s10 + $0xb8] sm:$0xff] }
 0x26a   : > { %13565 = vmatprep.mubr.msk.f32.mxu0 %vm279_vm0, %v15735_v51 }
 0x26d   : > { %13566 = vmatmul.mubr.msk.f32.gmra.mrb[12].mxu0 %vm279_vm0, %v15742_v52 }
 0x26e   : > { %13568 = vmatprep.mubr.msk.f32.mxu0 %vm279_vm0, %v15745_v53  ;;  %v324_v53 = vld [vmem:[%s18539_s6 + $0x100] sm:$0xff] }
 0x26f   : > { %vm372_vm12 = vcmp.gt.f32.partialorder %v324_v53, 0.5  ;;  %v4153_v53 = vld [vmem:[%s15409_s10 + $0x150] sm:$0xff] }
 0x271   : > { %13569 = vmatmul.mubr.msk.f32.gmra.mrb[14].mxu0 %vm279_vm0, %v15752_v50  ;;  %v4130_v50 = vld [vmem:[%s15409_s10 + $0x98] sm:$0xff] }
 0x272   : > { %13571 = vmatprep.mubr.msk.f32.mxu0 %vm279_vm0, %v15755_v49  ;;  %v319_v49 = vld [vmem:[%s18539_s6 + $0xd8] sm:$0xff] }
 0x273   : > { %vm367_vm7 = vcmp.gt.f32.partialorder %v319_v49, 0.5 }
 0x275   : > { %13572 = vmatmul.mubr.msk.f32.gmra.mrb[16].mxu0 %vm279_vm0, %v15762_v48  ;;  %v4129_v48 = vld [vmem:[%s15409_s10 + $0x90] sm:$0xff] }
 0x276   : > { %13574 = vmatprep.mubr.msk.f32.mxu0 %vm279_vm0, %v15765_v47  ;;  %v318_v47 = vld [vmem:[%s18539_s6 + $0xd0] sm:$0xff] }
 0x277   : > { %vm366_vm6 = vcmp.gt.f32.partialorder %v318_v47, 0.5  ;;  %v4148_v47 = vld [vmem:[%s15409_s10 + $0x128] sm:$0xff] }
 0x279   : > { %13575 = vmatmul.mubr.msk.f32.gmra.mrb[18].mxu0 %vm279_vm0, %v15772_v46 }
 0x27a   : > { %13577 = vmatprep.mubr.msk.f32.mxu0 %vm279_vm0, %v15775_v45 }
 0x27d   : > { %13578 = vmatmul.mubr.msk.f32.gmra.mrb[20].mxu0 %vm279_vm0, %v15782_v44  ;;  %v4128_v44 = vld [vmem:[%s15409_s10 + $0x88] sm:$0xff] }
 0x27e   : > { %13580 = vmatprep.mubr.msk.f32.mxu0 %vm279_vm0, %v15785_v43  ;;  %v317_v43 = vld [vmem:[%s18539_s6 + $0xc8] sm:$0xff] }
 0x27f   : > { %vm365_vm5 = vcmp.gt.f32.partialorder %v317_v43, 0.5 }
 0x281   : > { %13581 = vmatmul.mubr.msk.f32.gmra.mrb[22].mxu0 %vm279_vm0, %v15792_v42  ;;  %v4127_v42 = vld [vmem:[%s15409_s10 + $0x80] sm:$0xff] }
 0x282   : > { %13583 = vmatprep.mubr.msk.f32.mxu0 %vm279_vm0, %v15795_v41  ;;  %v316_v41 = vld [vmem:[%s18539_s6 + $0xc0] sm:$0xff] }
 0x283   : > { %vm364_vm4 = vcmp.gt.f32.partialorder %v316_v41, 0.5  ;;  %v4146_v41 = vld [vmem:[%s15409_s10 + $0x118] sm:$0xff] }
 0x285   : > { %13584 = vmatmul.mubr.msk.f32.gmra.mrb[24].mxu0 %vm279_vm0, %v15802_v40 }
 0x286   : > { %13586 = vmatprep.mubr.msk.f32.mxu0 %vm279_vm0, %v15805_v39 }
 0x289   : > { %13587 = vmatmul.mubr.msk.f32.gmra.mrb[26].mxu0 %vm279_vm0, %v15812_v38  ;;  %v4126_v38 = vld [vmem:[%s15409_s10 + $0x78] sm:$0xff] }
 0x28a   : > { %13589 = vmatprep.mubr.msk.f32.mxu0 %vm279_vm0, %v15815_v37  ;;  %v314_v37 = vld [vmem:[%s18539_s6 + $0xb0] sm:$0xff] }
 0x28b   : > { %vm362_vm3 = vcmp.gt.f32.partialorder %v314_v37, 0.5 }
 0x28d   : > { %13590 = vmatmul.mubr.msk.f32.gmra.mrb[28].mxu0 %vm279_vm0, %v15822_v36  ;;  %v4125_v36 = vld [vmem:[%s15409_s10 + $0x70] sm:$0xff] }
 0x28e   : > { %13592 = vmatprep.mubr.msk.f32.mxu0 %vm279_vm0, %v15825_v35  ;;  %v315_v35 = vld [vmem:[%s18539_s6 + $0xb8] sm:$0xff] }
 0x28f   : > { %vm363_vm2 = vcmp.gt.f32.partialorder %v315_v35, 0.5  ;;  %v4144_v35 = vld [vmem:[%s15409_s10 + $0x108] sm:$0xff] }
 0x291   : > { %13593 = vmatmul.mubr.msk.f32.gmra.mrb[30].mxu0 %vm279_vm0, %v15832_v34 }
 0x292   : > { %13595 = vmatprep.mubr.msk.f32.mxu0 %vm279_vm0, %v15835_v33  ;;  %v15347_v33 = vmov 0  }
 0x293   : > { %15337 = vset.pattern.permute.xlu0 %v15347_v33  ;;  %15338 = vset.pattern.permute.xlu1 %v15347_v33  ;;  %v5340_v39 = vsel %vm363_vm2, 1, %v15347_v33  ;;  %v5339_v40 = vsel %vm362_vm3, 1, %v15347_v33  ;;  %v5341_v45 = vsel %vm364_vm4, 1, %v15347_v33  ;;  %v5342_v46 = vsel %vm365_vm5, 1, %v15347_v33 }
 0x294   : > { %5435 = vperm.xlu1 %15338, %v5340_v39   ;;  %v5343_v58 = vsel %vm366_vm6, 1, %v15347_v33  ;;  %v5344_v59 = vsel %vm367_vm7, 1, %v15347_v33  ;;  %v5345_v0 = vsel %vm368_vm8, 1, %v15347_v33  ;;  %v5346_v1 = vsel %vm369_vm9, 1, %v15347_v33  ;;  %v4145_v39 = vld [vmem:[%s15409_s10 + $0x110] sm:$0xff] }
 0x295   : > { %13596 = vmatmul.mubr.msk.f32.gmra.mrb[32].mxu0 %vm279_vm0, %v15842_v32  ;;  %v4124_v32 = vld [vmem:[%s15409_s10 + $0x68] sm:$0xff]  ;;  %v5347_v51 = vsel %vm370_vm10, 1, %v15347_v33  ;;  %v5348_v52 = vsel %vm371_vm11, 1, %v15347_v33  ;;  %v5351_v8 = vsel %vm374_vm14, 1, %v15347_v33  ;;  %v5352_v9 = vsel %vm375_vm15, 1, %v15347_v33 }
 0x296   : > { %13598 = vmatprep.mubr.msk.f32.mxu0 %vm279_vm0, %v15845_v31  ;;  %v313_v31 = vld [vmem:[%s18539_s6 + $0xa8] sm:$0xff]  ;;  %vm377_vm2 = vcmp.gt.f32.partialorder %v329_v57, 0.5  ;;  %v4157_v57 = vld [vmem:[%s15409_s10 + $0x170] sm:$0xff] }
 0x297   : > { %vm361_vm1 = vcmp.gt.f32.partialorder %v313_v31, 0.5  ;;  %v332_v31 = vld [vmem:[%s18539_s6 + $0x140] sm:$0xff] }
 0x298   : > { %v5338_v34 = vsel %vm361_vm1, 1, %v15347_v33  ;;  %5438 = vperm.xlu1 %15338, %v5341_v45   ;;  %vm376_vm1 = vcmp.gt.f32.partialorder %v328_v10, 0.5  ;;  %vm380_vm5 = vcmp.gt.f32.partialorder %v332_v31, 0.5  ;;  %v4147_v45 = vld [vmem:[%s15409_s10 + $0x120] sm:$0xff] }
 0x299   : > { %13599 = vmatmul.mubr.msk.f32.gmra.mrb[34].mxu0 %vm279_vm0, %v15852_v30  ;;  %v4123_v30 = vld [vmem:[%s15409_s10 + $0x60] sm:$0xff]  ;;  %5429 = vperm.xlu0 %15337, %v5338_v34   ;;  %v333_v34 = vld [vmem:[%s18539_s6 + $0x148] sm:$0xff] }
 0x29a   : > { %13601 = vmatprep.mubr.msk.f32.mxu0 %vm279_vm0, %v15855_v29  ;;  %v4122_v29 = vld [vmem:[%s15409_s10 + $0x58] sm:$0xff]  ;;  %vm381_vm6 = vcmp.gt.f32.partialorder %v333_v34, 0.5  ;;  %v304_v10 = vld [vmem:[%s18539_s6 + $0x60] sm:$0xff]  ;;  %v4161_v34 = vld [vmem:[%s15409_s10 + $0x190] sm:$0xff] }
 0x29b   : > { %v5358_v37 = vsel %vm381_vm6, 1, %v15347_v33  ;;  %v308_v31 = vld [vmem:[%s18539_s6 + $0x80] sm:$0xff] }
 0x29c   : > { %5444 = vperm.xlu1 %15338, %v5343_v58   ;;  %v4149_v58 = vld [vmem:[%s15409_s10 + $0x130] sm:$0xff] }
 0x29d   : > { %13602 = vmatmul.mubr.msk.f32.gmra.mrb[36].mxu0 %vm279_vm0, %v15862_v28  ;;  %v3619_v28 = vld [vmem:[%s15409_s10 + $0x1b7] sm:$0xff]  ;;  %5432 = vperm.xlu0 %15337, %v5339_v40  }
 0x29e   : > { %13604 = vmatprep.mubr.msk.f32.mxu0 %vm279_vm0, %v15865_v27  ;;  %v3618_v27 = vld [vmem:[%s15409_s10 + $0x1af] sm:$0xff]  ;;  %v335_v40 = vld [vmem:[%s18539_s6 + $0x158] sm:$0xff] }
 0x29f   : > { %vm383_vm8 = vcmp.gt.f32.partialorder %v335_v40, 0.5  ;;  %v311_v40 = vld [vmem:[%s18539_s6 + $0x98] sm:$0xff] }
 0x2a0   : > { %5450 = vperm.xlu1 %15338, %v5345_v0   ;;  %v5360_v43 = vsel %vm383_vm8, 1, %v15347_v33  ;;  %v4151_v0 = vld [vmem:[%s15409_s10 + $0x140] sm:$0xff] }
 0x2a1   : > { %13605 = vmatmul.mubr.msk.f32.gmra.mrb[38].mxu0 %vm279_vm0, %v15872_v26  ;;  %v4120_v26 = vld [vmem:[%s15409_s10 + $0x48] sm:$0xff]  ;;  %5441 = vperm.xlu0 %15337, %v5342_v46   ;;  %v292_v46 = vld [vmem:[%s18539_s6] sm:$0xff] }
 0x2a2   : > { %13607 = vmatprep.mubr.msk.f32.mxu0 %vm279_vm0, %v15875_v25  ;;  %v3620_v25 = vld [vmem:[%s15409_s10 + $0x1bf] sm:$0xff]  ;;  %vm340_vm10 = vcmp.gt.f32.partialorder %v292_v46, 0.5 }
 0x2a3   : > { %v5317_v49 = vsel %vm340_vm10, 1, %v15347_v33  ;;  %v4167_v46 = vld [vmem:[%s15409_s10 + $0x1c0] sm:$0xff] }
 0x2a4   : > { %5456 = vperm.xlu1 %15338, %v5347_v51   ;;  %v298_v51 = vld [vmem:[%s18539_s6 + $0x30] sm:$0xff] }
 0x2a5   : > { %13608 = vmatmul.mubr.msk.f32.gmra.mrb[40].mxu0 %vm279_vm0, %v15882_v24  ;;  %v4121_v24 = vld [vmem:[%s15409_s10 + $0x50] sm:$0xff]  ;;  %5447 = vperm.xlu0 %15337, %v5344_v59  }
 0x2a6   : > { %13610 = vmatprep.mubr.msk.f32.mxu0 %vm279_vm0, %v16219_v20  ;;  %v4136_v20 = vld [vmem:[%s15409_s10 + $0xc8] sm:$0xff]  ;;  %v294_v59 = vld [vmem:[%s18539_s6 + $0x10] sm:$0xff] }
 0x2a9   : > { %13611 = vmatmul.mubr.msk.f32.gmra.mrb[42].mxu0 %vm279_vm0, %v16222_v55  ;;  %5453 = vperm.xlu0 %15337, %v5346_v1   ;;  %v5349_v55 = vsel %vm372_vm12, 1, %v15347_v33  ;;  %vm342_vm12 = vcmp.gt.f32.partialorder %v294_v59, 0.5  ;;  %v296_v1 = vld [vmem:[%s18539_s6 + $0x20] sm:$0xff] }
 0x2aa   : > { %13613 = vmatprep.mubr.msk.f32.mxu0 %vm279_vm0, %v16229_v56  ;;  %5462 = vperm.xlu1 %15338, %v5349_v55   ;;  %v5350_v56 = vsel %vm373_vm13, 1, %v15347_v33  ;;  %v5319_v62 = vsel %vm342_vm12, 1, %v15347_v33  ;;  %vm344_vm14 = vcmp.gt.f32.partialorder %v296_v1, 0.5  ;;  %v4673_v1 = vld [vmem:[%s15409_s10 + $0x79] sm:$0xff] }
 0x2ab   : > { %v5321_v4 = vsel %vm344_vm14, 1, %v15347_v33  ;;  %vm359_vm14 = vcmp.gt.f32.partialorder %v311_v40, 0.5 }
 0x2ad   : > { %13614 = vmatmul.mubr.msk.f32.gmra.mrb[44].mxu0 %vm279_vm0, %v3618_v27  ;;  %5459 = vperm.xlu0 %15337, %v5348_v52   ;;  %v5354_v27 = vsel %vm377_vm2, 1, %v15347_v33  ;;  %v299_v52 = vld [vmem:[%s18539_s6 + $0x38] sm:$0xff] }
 0x2ae   : > { %13616 = vmatprep.mubr.msk.f32.mxu0 %vm279_vm0, %v3619_v28  ;;  %5468 = vperm.xlu1 %15338, %v5351_v8   ;;  %v330_v28 = vld [vmem:[%s18539_s6 + $0x130] sm:$0xff]  ;;  %vm347_vm2 = vcmp.gt.f32.partialorder %v299_v52, 0.5  ;;  %v4156_v8 = vld [vmem:[%s15409_s10 + $0x168] sm:$0xff] }
 0x2af   : > { %vm378_vm3 = vcmp.gt.f32.partialorder %v330_v28, 0.5  ;;  %v306_v28 = vld [vmem:[%s18539_s6 + $0x70] sm:$0xff] }
 0x2b0   : > { %v4680_v52 = vld [vmem:[%s15409_s10 + $0xb1] sm:$0xff] }
 0x2b1   : > { %13617 = vmatmul.mubr.msk.f32.gmra.mrb[46].mxu0 %vm279_vm0, %v3620_v25  ;;  %5465 = vperm.xlu0 %15337, %v5350_v56   ;;  %v4141_v25 = vld [vmem:[%s15409_s10 + $0xf0] sm:$0xff]  ;;  %v301_v56 = vld [vmem:[%s18539_s6 + $0x48] sm:$0xff] }
 0x2b2   : > { %13621 = vmatprep.mubr.msk.f32.mxu0 %vm279_vm0, %v4120_v26  ;;  %v331_v26 = vld [vmem:[%s18539_s6 + $0x138] sm:$0xff] }
 0x2b3   : > { %vm379_vm4 = vcmp.gt.f32.partialorder %v331_v26, 0.5  ;;  %v4159_v26 = vld [vmem:[%s15409_s10 + $0x180] sm:$0xff] }
 0x2b5   : > { %13622 = vmatmul.mubr.msk.f32.vlgmr.msra.gmra.mrb[0].mxu0 %vm279_vm0, %v4121_v24  ;;  %5471 = vperm.xlu0 %15337, %v5352_v9   ;;  %v4142_v24 = vld [vmem:[%s15409_s10 + $0xf8] sm:$0xff] }
 0x2b6   : > { %13694 = vmatpush3.msra.mxu0 %v11629_v19  ;;  %13624 = vmatprep.mubr.msk.f32.mxu0 %vm279_vm0, %v4122_v29  ;;  %v5353_v19 = vsel %vm376_vm1, 1, %v15347_v33  ;;  %v5355_v29 = vsel %vm378_vm3, 1, %v15347_v33  ;;  %vm346_vm1 = vcmp.gt.f32.partialorder %v298_v51, 0.5  ;;  %v303_v9 = vld [vmem:[%s18539_s6 + $0x58] sm:$0xff]  ;;  %v4679_v51 = vld [vmem:[%s15409_s10 + $0xa9] sm:$0xff] }
 0x2b7   : > { %5474 = vperm.xlu1 %15338, %v5353_v19   ;;  %v5323_v55 = vsel %vm346_vm1, 1, %v15347_v33  ;;  %vm351_vm6 = vcmp.gt.f32.partialorder %v303_v9, 0.5  ;;  %v4158_v19 = vld [vmem:[%s15409_s10 + $0x178] sm:$0xff] }
 0x2b8   : > { %v4692_v9 = vld [vmem:[%s15409_s10 + $0x111] sm:$0xff] }
 0x2b9   : > { %13625 = vmatmul.mubr.msk.f32.gmra.mrb[2].mxu0 %vm279_vm0, %v4123_v30  ;;  %5477 = vperm.xlu0 %15337, %v5354_v27   ;;  %v5356_v30 = vsel %vm379_vm4, 1, %v15347_v33  ;;  %vm349_vm4 = vcmp.gt.f32.partialorder %v301_v56, 0.5  ;;  %v305_v27 = vld [vmem:[%s18539_s6 + $0x68] sm:$0xff] }
 0x2ba   : > { %13627 = vmatprep.mubr.msk.f32.mxu0 %vm279_vm0, %v4124_v32  ;;  %v4143_v32 = vld [vmem:[%s15409_s10 + $0x100] sm:$0xff]  ;;  %vm353_vm8 = vcmp.gt.f32.partialorder %v305_v27, 0.5 }
 0x2bb   : > { %5480 = vperm.xlu1 %15338, %v5355_v29   ;;  %v4160_v29 = vld [vmem:[%s15409_s10 + $0x188] sm:$0xff] }
 0x2bc   : > { %v4686_v56 = vld [vmem:[%s15409_s10 + $0xe1] sm:$0xff] }
 0x2bd   : > { %13628 = vmatmul.mubr.msk.f32.gmra.mrb[4].mxu0 %vm279_vm0, %v4125_v36  ;;  %5483 = vperm.xlu0 %15337, %v5356_v30   ;;  %v5357_v36 = vsel %vm380_vm5, 1, %v15347_v33  ;;  %vm350_vm5 = vcmp.gt.f32.partialorder %v302_v17, 0.5  ;;  %v307_v30 = vld [vmem:[%s18539_s6 + $0x78] sm:$0xff]  ;;  %v4687_v17 = vld [vmem:[%s15409_s10 + $0xe9] sm:$0xff]  ;;  %v4698_v27 = vld [vmem:[%s15409_s10 + $0x141] sm:$0xff] }
 0x2be   : > { %13630 = vmatprep.mubr.msk.f32.mxu0 %vm279_vm0, %v4126_v38  ;;  %v334_v38 = vld [vmem:[%s18539_s6 + $0x150] sm:$0xff]  ;;  %vm355_vm10 = vcmp.gt.f32.partialorder %v307_v30, 0.5 }
 0x2bf   : > { %5486 = vperm.xlu1 %15338, %v5357_v36   ;;  %vm382_vm7 = vcmp.gt.f32.partialorder %v334_v38, 0.5  ;;  %v309_v36 = vld [vmem:[%s18539_s6 + $0x88] sm:$0xff]  ;;  %v5332_v38 = vsel %vm355_vm10, 1, %v15347_v33  ;;  %v4704_v30 = vld [vmem:[%s15409_s10 + $0x171] sm:$0xff] }
 0x2c0   : > { %vm357_vm12 = vcmp.gt.f32.partialorder %v309_v36, 0.5  ;;  %v4712_v36 = vld [vmem:[%s15409_s10 + $0x1b1] sm:$0xff] }
 0x2c1   : > { %13631 = vmatmul.mubr.msk.f32.gmra.mrb[6].mxu0 %vm279_vm0, %v4127_v42  ;;  %5489 = vperm.xlu0 %15337, %v5358_v37   ;;  %v5359_v42 = vsel %vm382_vm7, 1, %v15347_v33  ;;  %vm352_vm7 = vcmp.gt.f32.partialorder %v304_v10, 0.5  ;;  %v310_v37 = vld [vmem:[%s18539_s6 + $0x90] sm:$0xff]  ;;  %v4693_v10 = vld [vmem:[%s15409_s10 + $0x119] sm:$0xff] }
 0x2c2   : > { %13633 = vmatprep.mubr.msk.f32.mxu0 %vm279_vm0, %v4128_v44  ;;  %v336_v44 = vld [vmem:[%s18539_s6 + $0x160] sm:$0xff] }
 0x2c3   : > { %5492 = vperm.xlu1 %15338, %v5359_v42   ;;  %vm384_vm9 = vcmp.gt.f32.partialorder %v336_v44, 0.5  ;;  %v4165_v42 = vld [vmem:[%s15409_s10 + $0x1b0] sm:$0xff]  ;;  %v4166_v44 = vld [vmem:[%s15409_s10 + $0x1b8] sm:$0xff] }
 0x2c5   : > { %13634 = vmatmul.mubr.msk.f32.gmra.mrb[8].mxu0 %vm279_vm0, %v4129_v48  ;;  %5495 = vperm.xlu0 %15337, %v5360_v43   ;;  %v5361_v48 = vsel %vm384_vm9, 1, %v15347_v33  ;;  %vm354_vm9 = vcmp.gt.f32.partialorder %v306_v28, 0.5  ;;  %v4699_v28 = vld [vmem:[%s15409_s10 + $0x149] sm:$0xff] }
 0x2c6   : > { %13636 = vmatprep.mubr.msk.f32.mxu0 %vm279_vm0, %v4130_v50  ;;  %v293_v50 = vld [vmem:[%s18539_s6 + $0x8] sm:$0xff] }
 0x2c7   : > { %5498 = vperm.xlu1 %15338, %v5361_v48   ;;  %vm341_vm11 = vcmp.gt.f32.partialorder %v293_v50, 0.5  ;;  %v4667_v48 = vld [vmem:[%s15409_s10 + $0x49] sm:$0xff] }
 0x2c9   : > { %13637 = vmatmul.mubr.msk.f32.gmra.mrb[10].mxu0 %vm279_vm0, %v4131_v61  ;;  %5366 = vperm.xlu0 %15337, %v5317_v49   ;;  %v5318_v61 = vsel %vm341_vm11, 1, %v15347_v33  ;;  %vm356_vm11 = vcmp.gt.f32.partialorder %v308_v31, 0.5  ;;  %v339_v49 = vld [vmem:[%s18539_s6 + $0x178] sm:$0xff] }
 0x2ca   : > { %13639 = vmatprep.mubr.msk.f32.mxu0 %vm279_vm0, %v4132_v63  ;;  %v295_v63 = vld [vmem:[%s18539_s6 + $0x18] sm:$0xff] }
 0x2cb   : > { %5369 = vperm.xlu1 %15338, %v5318_v61   ;;  %vm343_vm13 = vcmp.gt.f32.partialorder %v295_v63, 0.5  ;;  %v4671_v63 = vld [vmem:[%s15409_s10 + $0x69] sm:$0xff]  ;;  %v4705_v31 = vld [vmem:[%s15409_s10 + $0x179] sm:$0xff] }
 0x2cd   : > { %13640 = vmatmul.mubr.msk.f32.gmra.mrb[12].mxu0 %vm279_vm0, %v4133_v3  ;;  %5372 = vperm.xlu0 %15337, %v5319_v62   ;;  %v5320_v3 = vsel %vm343_vm13, 1, %v15347_v33  ;;  %vm358_vm13 = vcmp.gt.f32.partialorder %v310_v37, 0.5  ;;  %v4670_v62 = vld [vmem:[%s15409_s10 + $0x61] sm:$0xff]  ;;  %v15348_v37 = vmov 0.0  }
 0x2ce   : > { %13642 = vmatprep.mubr.msk.f32.mxu0 %vm279_vm0, %v4134_v5  ;;  %v297_v5 = vld [vmem:[%s18539_s6 + $0x28] sm:$0xff]  ;;  %v5335_v43 = vsel %vm358_vm13, 1, %v15347_v33  ;;  %283 = vst.msk [vmem:[#allocation2 + $0x18] sm:$0xff] %vm279_vm0, %v15348_v37  ;;  %282 = vst.msk [vmem:[#allocation2 + $0x10] sm:$0xff] %vm279_vm0, %v15348_v37 }
 0x2cf   : > { %5375 = vperm.xlu1 %15338, %v5320_v3   ;;  %vm345_vm15 = vcmp.gt.f32.partialorder %v297_v5, 0.5  ;;  %v4676_v3 = vld [vmem:[%s15409_s10 + $0x91] sm:$0xff]  ;;  %v4678_v5 = vld [vmem:[%s15409_s10 + $0xa1] sm:$0xff]  ;;  %284 = vst.msk [vmem:[#allocation2 + $0x20] sm:$0xff] %vm279_vm0, %v15348_v37  ;;  %285 = vst.msk [vmem:[#allocation2 + $0x28] sm:$0xff] %vm279_vm0, %v15348_v37 }
 0x2d0   : > { %286 = vst.msk [vmem:[#allocation2 + $0x1b0] sm:$0xff] %vm279_vm0, %v15348_v37  ;;  %287 = vst.msk [vmem:[#allocation2 + $0x1b8] sm:$0xff] %vm279_vm0, %v15348_v37 }
 0x2d1   : > { %13643 = vmatmul.mubr.msk.f32.gmra.mrb[14].mxu0 %vm279_vm0, %v4135_v23  ;;  %5378 = vperm.xlu0 %15337, %v5321_v4   ;;  %v300_v23 = vld [vmem:[%s18539_s6 + $0x40] sm:$0xff]  ;;  %288 = vst.msk [vmem:[#allocation2 + $0x1c0] sm:$0xff] %vm279_vm0, %v15348_v37  ;;  %289 = vst.msk [vmem:[#allocation2 + $0x1c8] sm:$0xff] %vm279_vm0, %v15348_v37 }
 0x2d2   : > { %13645 = vmatprep.mubr.msk.f32.mxu0 %vm279_vm0, %v4136_v20  ;;  %v5322_v20 = vsel %vm345_vm15, 1, %v15347_v33  ;;  %vm348_vm3 = vcmp.gt.f32.partialorder %v300_v23, 0.5  ;;  %v4677_v4 = vld [vmem:[%s15409_s10 + $0x99] sm:$0xff]  ;;  %v4682_v23 = vld [vmem:[%s15409_s10 + $0xc1] sm:$0xff] }
 0x2d3   : > { %5381 = vperm.xlu1 %15338, %v5322_v20   ;;  %v4684_v20 = vld [vmem:[%s15409_s10 + $0xd1] sm:$0xff] }
 0x2d5   : > { %13646 = vmatmul.mubr.msk.f32.gmra.mrb[16].mxu0 %vm279_vm0, %v4137_v18  ;;  %5384 = vperm.xlu0 %15337, %v5323_v55   ;;  %v5324_v18 = vsel %vm347_vm2, 1, %v15347_v33  ;;  %v4685_v55 = vld [vmem:[%s15409_s10 + $0xd9] sm:$0xff] }
 0x2d6   : > { %13648 = vmatprep.mubr.msk.f32.mxu0 %vm279_vm0, %v4138_v7  ;;  %v5325_v7 = vsel %vm348_vm3, 1, %v15347_v33  ;;  %vm387_vm3 = vcmp.gt.f32.partialorder %v339_v49, 0.5  ;;  %v5704_v40 = vld [vmem:[#allocation2 + $0x28] sm:$0xff] }
 0x2d7   : > { %5387 = vperm.xlu1 %15338, %v5324_v18   ;;  %v5364_v61 = vsel %vm387_vm3, 1, %v15347_v33  ;;  %v4688_v18 = vld [vmem:[%s15409_s10 + $0xf1] sm:$0xff] }
 0x2d9   : > { %13649 = vmatmul.mubr.msk.f32.gmra.mrb[18].mxu0 %vm279_vm0, %v4139_v11  ;;  %5390 = vperm.xlu0 %15337, %v5325_v7   ;;  %v5326_v11 = vsel %vm349_vm4, 1, %v15347_v33  ;;  %v4690_v7 = vld [vmem:[%s15409_s10 + $0x101] sm:$0xff] }
 0x2da   : > { %13651 = vmatprep.mubr.msk.f32.mxu0 %vm279_vm0, %v4140_v12  ;;  %v5327_v12 = vsel %vm350_vm5, 1, %v15347_v33 }
 0x2db   : > { %5393 = vperm.xlu1 %15338, %v5326_v11   ;;  %v4694_v11 = vld [vmem:[%s15409_s10 + $0x121] sm:$0xff] }
 0x2dd   : > { %13652 = vmatmul.mubr.msk.f32.gmra.mrb[20].mxu0 %vm279_vm0, %v4141_v25  ;;  %5396 = vperm.xlu0 %15337, %v5327_v12   ;;  %v5328_v25 = vsel %vm351_vm6, 1, %v15347_v33  ;;  %v4696_v12 = vld [vmem:[%s15409_s10 + $0x131] sm:$0xff] }
 0x2de   : > { %13654 = vmatprep.mubr.msk.f32.mxu0 %vm279_vm0, %v4142_v24  ;;  %v5329_v24 = vsel %vm352_vm7, 1, %v15347_v33 }
 0x2df   : > { %5399 = vperm.xlu1 %15338, %v5328_v25   ;;  %v4700_v25 = vld [vmem:[%s15409_s10 + $0x151] sm:$0xff] }
 0x2e1   : > { %13655 = vmatmul.mubr.msk.f32.gmra.mrb[22].mxu0 %vm279_vm0, %v4143_v32  ;;  %5402 = vperm.xlu0 %15337, %v5329_v24   ;;  %v5330_v32 = vsel %vm353_vm8, 1, %v15347_v33  ;;  %v4702_v24 = vld [vmem:[%s15409_s10 + $0x161] sm:$0xff] }
 0x2e2   : > { %13657 = vmatprep.mubr.msk.f32.mxu0 %vm279_vm0, %v4144_v35  ;;  %v5331_v35 = vsel %vm354_vm9, 1, %v15347_v33 }
 0x2e3   : > { %5405 = vperm.xlu1 %15338, %v5330_v32   ;;  %v4706_v32 = vld [vmem:[%s15409_s10 + $0x181] sm:$0xff] }
 0x2e5   : > { %13658 = vmatmul.mubr.msk.f32.gmra.mrb[24].mxu0 %vm279_vm0, %v4145_v39  ;;  %5408 = vperm.xlu0 %15337, %v5331_v35   ;;  %v5333_v39 = vsel %vm356_vm11, 1, %v15347_v33  ;;  %v4708_v35 = vld [vmem:[%s15409_s10 + $0x191] sm:$0xff] }
 0x2e6   : > { %13660 = vmatprep.mubr.msk.f32.mxu0 %vm279_vm0, %v4146_v41  ;;  %v312_v41 = vld [vmem:[%s18539_s6 + $0xa0] sm:$0xff] }
 0x2e7   : > { %5411 = vperm.xlu1 %15338, %v5332_v38   ;;  %vm360_vm15 = vcmp.gt.f32.partialorder %v312_v41, 0.5  ;;  %v5702_v38 = vld [vmem:[#allocation2 + $0x18] sm:$0xff] }
 0x2e9   : > { %13661 = vmatmul.mubr.msk.f32.gmra.mrb[26].mxu0 %vm279_vm0, %v4147_v45  ;;  %5414 = vperm.xlu0 %15337, %v5333_v39   ;;  %v337_v45 = vld [vmem:[%s18539_s6 + $0x168] sm:$0xff]  ;;  %v5703_v39 = vld [vmem:[#allocation2 + $0x20] sm:$0xff] }
 0x2ea   : > { %13663 = vmatprep.mubr.msk.f32.mxu0 %vm279_vm0, %v4148_v47  ;;  %v5337_v47 = vsel %vm360_vm15, 1, %v15347_v33  ;;  %vm385_vm1 = vcmp.gt.f32.partialorder %v337_v45, 0.5 }
 0x2eb   : > { %v5362_v50 = vsel %vm385_vm1, 1, %v15347_v33 }
 0x2ed   : > { %13664 = vmatmul.mubr.msk.f32.gmra.mrb[28].mxu0 %vm279_vm0, %v4149_v58  ;;  %5420 = vperm.xlu0 %15337, %v5335_v43   ;;  %v4668_v58 = vld [vmem:[%s15409_s10 + $0x51] sm:$0xff] }
 0x2ee   : > { %13666 = vmatprep.mubr.msk.f32.mxu0 %vm279_vm0, %v4150_v60  ;;  %v4669_v60 = vld [vmem:[%s15409_s10 + $0x59] sm:$0xff] }
 0x2f1   : > { %13667 = vmatmul.mubr.msk.f32.gmra.mrb[30].mxu0 %vm279_vm0, %v4151_v0  ;;  %5426 = vperm.xlu0 %15337, %v5337_v47   ;;  %v4672_v0 = vld [vmem:[%s15409_s10 + $0x71] sm:$0xff] }
 0x2f2   : > { %13669 = vmatprep.mubr.msk.f32.mxu0 %vm279_vm0, %v4152_v2  ;;  %v4675_v2 = vld [vmem:[%s15409_s10 + $0x89] sm:$0xff] }
 0x2f5   : > { %13670 = vmatmul.mubr.msk.f32.gmra.mrb[32].mxu0 %vm279_vm0, %v4153_v53  ;;  %v4681_v53 = vld [vmem:[%s15409_s10 + $0xb9] sm:$0xff] }
 0x2f6   : > { %13672 = vmatprep.mubr.msk.f32.mxu0 %vm279_vm0, %v4154_v54  ;;  %v4683_v54 = vld [vmem:[%s15409_s10 + $0xc9] sm:$0xff] }
 0x2f9   : > { %13673 = vmatmul.mubr.msk.f32.gmra.mrb[34].mxu0 %vm279_vm0, %v4155_v6  ;;  %v4689_v6 = vld [vmem:[%s15409_s10 + $0xf9] sm:$0xff] }
 0x2fa   : > { %13675 = vmatprep.mubr.msk.f32.mxu0 %vm279_vm0, %v4156_v8  ;;  %v4691_v8 = vld [vmem:[%s15409_s10 + $0x109] sm:$0xff] }
 0x2fd   : > { %13676 = vmatmul.mubr.msk.f32.gmra.mrb[36].mxu0 %vm279_vm0, %v4157_v57  ;;  %v4695_v57 = vld [vmem:[%s15409_s10 + $0x129] sm:$0xff] }
 0x2fe   : > { %13678 = vmatprep.mubr.msk.f32.mxu0 %vm279_vm0, %v4158_v19  ;;  %v4697_v19 = vld [vmem:[%s15409_s10 + $0x139] sm:$0xff] }
 0x301   : > { %13679 = vmatmul.mubr.msk.f32.gmra.mrb[38].mxu0 %vm279_vm0, %v4159_v26  ;;  %v4701_v26 = vld [vmem:[%s15409_s10 + $0x159] sm:$0xff] }
 0x302   : > { %13681 = vmatprep.mubr.msk.f32.mxu0 %vm279_vm0, %v4160_v29  ;;  %v4703_v29 = vld [vmem:[%s15409_s10 + $0x169] sm:$0xff] }
 0x305   : > { %13682 = vmatmul.mubr.msk.f32.gmra.mrb[40].mxu0 %vm279_vm0, %v4161_v34  ;;  %v4707_v34 = vld [vmem:[%s15409_s10 + $0x189] sm:$0xff] }
 0x306   : > { %13684 = vmatprep.mubr.msk.f32.mxu0 %vm279_vm0, %v16327_v13  ;;  %v5334_v13 = vsel %vm357_vm12, 1, %v15347_v33 }
 0x307   : > { %5417 = vperm.xlu1 %15338, %v5334_v13  }
 0x309   : > { %13685 = vmatmul.mubr.msk.f32.gmra.mrb[42].mxu0 %vm279_vm0, %v16330_v14  ;;  %v338_v14 = vld [vmem:[%s18539_s6 + $0x170] sm:$0xff] }
 0x30a   : > { %13687 = vmatprep.mubr.msk.f32.mxu0 %vm279_vm0, %v16337_v15  ;;  %v5336_v15 = vsel %vm359_vm14, 1, %v15347_v33  ;;  %vm386_vm2 = vcmp.gt.f32.partialorder %v338_v14, 0.5 }
 0x30b   : > { %5423 = vperm.xlu1 %15338, %v5336_v15   ;;  %v5363_v59 = vsel %vm386_vm2, 1, %v15347_v33  ;;  %v4674_v33 = vld [vmem:[%s15409_s10 + $0x81] sm:$0xff] }
 0x30c   : > { %5504 = vperm.xlu0 %15337, %v5363_v59  }
 0x30d   : > { %13688 = vmatmul.mubr.msk.f32.gmra.mrb[44].mxu0 %vm279_vm0, %v4165_v42 }
 0x30e   : > { %13690 = vmatprep.mubr.msk.f32.mxu0 %vm279_vm0, %v4166_v44 }
 0x30f   : > { %5501 = vperm.xlu1 %15338, %v5362_v50  }
 0x311   : > { %13691 = vmatmul.mubr.msk.f32.gmra.mrb[46].mxu0 %vm279_vm0, %v4167_v46 }
 0x312   : > { %13695 = vmatprep.mubr.msk.f32.mxu0 %vm279_vm0, %v4667_v48  ;;  %v16971_v48 = vld [vmem:[%s18536_s3] sm:$0xff] }
 0x313   : > { %5507 = vperm.xlu1 %15338, %v5364_v61   ;;  %v16948_v41 = vpop.permute.xlu1 %5435 }
 0x315   : > { %13696 = vmatmul.mubr.msk.f32.vlgmr.msra.gmra.mrb[0].mxu0 %vm279_vm0, %v4668_v58 }
 0x316   : > { %13698 = vmatprep.mubr.msk.f32.mxu0 %vm279_vm0, %v4669_v60 }
 0x317   : > { %v16952_v42 = vpop.permute.xlu1 %5438 }
 0x318   : > { %v16950_v13 = vpop.permute.xlu0 %5429 }
 0x319   : > { %13699 = vmatmul.mubr.msk.f32.gmra.mrb[2].mxu0 %vm279_vm0, %v4670_v62 }
 0x31a   : > { %13701 = vmatprep.mubr.msk.f32.mxu0 %vm279_vm0, %v4671_v63 }
 0x31b   : > { %v16956_v44 = vpop.permute.xlu1 %5444 }
 0x31c   : > { %v16954_v43 = vpop.permute.xlu0 %5432 }
 0x31d   : > { %13702 = vmatmul.mubr.msk.f32.gmra.mrb[4].mxu0 %vm279_vm0, %v4672_v0 }
 0x31e   : > { %13704 = vmatprep.mubr.msk.f32.mxu0 %vm279_vm0, %v4673_v1 }
 0x31f   : > { %v16960_v14 = vpop.permute.xlu1 %5450 }
 0x320   : > { %v16958_v45 = vpop.permute.xlu0 %5441 }
 0x321   : > { %13705 = vmatmul.mubr.msk.f32.gmra.mrb[6].mxu0 %vm279_vm0, %v4674_v33 }
 0x322   : > { %13707 = vmatprep.mubr.msk.f32.mxu0 %vm279_vm0, %v4675_v2 }
 0x323   : > { %v16964_v46 = vpop.permute.xlu1 %5456 }
 0x324   : > { %v16962_v15 = vpop.permute.xlu0 %5447 }
 0x325   : > { %13708 = vmatmul.mubr.msk.f32.gmra.mrb[8].mxu0 %vm279_vm0, %v4676_v3 }
 0x326   : > { %13710 = vmatprep.mubr.msk.f32.mxu0 %vm279_vm0, %v4677_v4 }
 0x328   : > { %v16966_v47 = vpop.permute.xlu0 %5453 }
 0x329   : > { %13711 = vmatmul.mubr.msk.f32.gmra.mrb[10].mxu0 %vm279_vm0, %v4678_v5  ;;  %v16974_v49 = vpop.permute.xlu1 %5462 }
 0x32a   : > { %13713 = vmatprep.mubr.msk.f32.mxu0 %vm279_vm0, %v4679_v51 }
 0x32c   : > { %v16976_v50 = vpop.permute.xlu0 %5459 }
 0x32d   : > { %13714 = vmatmul.mubr.msk.f32.gmra.mrb[12].mxu0 %vm279_vm0, %v4680_v52  ;;  %v16978_v58 = vpop.permute.xlu1 %5468 }
 0x32e   : > { %13716 = vmatprep.mubr.msk.f32.mxu0 %vm279_vm0, %v4681_v53 }
 0x330   : > { %v16980_v59 = vpop.permute.xlu0 %5465 }
 0x331   : > { %13717 = vmatmul.mubr.msk.f32.gmra.mrb[14].mxu0 %vm279_vm0, %v4682_v23 }
 0x332   : > { %13719 = vmatprep.mubr.msk.f32.mxu0 %vm279_vm0, %v4683_v54 }
 0x334   : > { %v16984_v61 = vpop.permute.xlu0 %5471 }
 0x335   : > { %13720 = vmatmul.mubr.msk.f32.gmra.mrb[16].mxu0 %vm279_vm0, %v4684_v20  ;;  %v17005_v20 = vld [vmem:[%s18535_s2] ss:$0 sm:$0xff] }
 0x336   : > { %13722 = vmatprep.mubr.msk.f32.mxu0 %vm279_vm0, %v4685_v55  ;;  %v16982_v60 = vpop.permute.xlu1 %5474 }
 0x338   : > { %v16988_v63 = vpop.permute.xlu0 %5477 }
 0x339   : > { %13723 = vmatmul.mubr.msk.f32.gmra.mrb[18].mxu0 %vm279_vm0, %v4686_v56 }
 0x33a   : > { %13725 = vmatprep.mubr.msk.f32.mxu0 %vm279_vm0, %v4687_v17  ;;  %v16986_v62 = vpop.permute.xlu1 %5480 }
 0x33c   : > { %v16992_v1 = vpop.permute.xlu0 %5483 }
 0x33d   : > { %13726 = vmatmul.mubr.msk.f32.gmra.mrb[20].mxu0 %vm279_vm0, %v4688_v18 }
 0x33e   : > { %13728 = vmatprep.mubr.msk.f32.mxu0 %vm279_vm0, %v4689_v6  ;;  %v16990_v0 = vpop.permute.xlu1 %5486 }
 0x340   : > { %v16996_v2 = vpop.permute.xlu0 %5489 }
 0x341   : > { %13729 = vmatmul.mubr.msk.f32.gmra.mrb[22].mxu0 %vm279_vm0, %v4690_v7 }
 0x342   : > { %13731 = vmatprep.mubr.msk.f32.mxu0 %vm279_vm0, %v4691_v8  ;;  %v16994_v33 = vpop.permute.xlu1 %5492 }
 0x344   : > { %v17000_v4 = vpop.permute.xlu0 %5495 }
 0x345   : > { %13732 = vmatmul.mubr.msk.f32.gmra.mrb[24].mxu0 %vm279_vm0, %v4692_v9 }
 0x346   : > { %13734 = vmatprep.mubr.msk.f32.mxu0 %vm279_vm0, %v4693_v10  ;;  %v16998_v3 = vpop.permute.xlu1 %5498 }
 0x348   : > { %v5367_v51 = vpop.permute.xlu0 %5366 }
 0x349   : > { %13735 = vmatmul.mubr.msk.f32.gmra.mrb[26].mxu0 %vm279_vm0, %v4694_v11  ;;  %vm5509_vm5 = vcmp.eq.s32.totalorder %v5367_v51, 1 }
 0x34a   : > { %13737 = vmatprep.mubr.msk.f32.mxu0 %vm279_vm0, %v4695_v57  ;;  %v5370_v5 = vpop.permute.xlu1 %5369 }
 0x34b   : > { %vm5510_vm4 = vcmp.eq.s32.totalorder %v5370_v5, 1 }
 0x34c   : > { %v5373_v53 = vpop.permute.xlu0 %5372 }
 0x34d   : > { %13738 = vmatmul.mubr.msk.f32.gmra.mrb[28].mxu0 %vm279_vm0, %v4696_v12  ;;  %vm5511_vm7 = vcmp.eq.s32.totalorder %v5373_v53, 1 }
 0x34e   : > { %13740 = vmatprep.mubr.msk.f32.mxu0 %vm279_vm0, %v4697_v19  ;;  %v5376_v52 = vpop.permute.xlu1 %5375 }
 0x34f   : > { %vm5512_vm6 = vcmp.eq.s32.totalorder %v5376_v52, 1 }
 0x350   : > { %v5379_v54 = vpop.permute.xlu0 %5378 }
 0x351   : > { %13741 = vmatmul.mubr.msk.f32.gmra.mrb[30].mxu0 %vm279_vm0, %v4698_v27  ;;  %vm5513_vm9 = vcmp.eq.s32.totalorder %v5379_v54, 1 }
 0x352   : > { %13743 = vmatprep.mubr.msk.f32.mxu0 %vm279_vm0, %v4699_v28  ;;  %v5382_v23 = vpop.permute.xlu1 %5381 }
 0x353   : > { %vm5514_vm8 = vcmp.eq.s32.totalorder %v5382_v23, 1 }
 0x354   : > { %v5385_v17 = vpop.permute.xlu0 %5384 }
 0x355   : > { %13744 = vmatmul.mubr.msk.f32.gmra.mrb[32].mxu0 %vm279_vm0, %v4700_v25  ;;  %vm5515_vm11 = vcmp.eq.s32.totalorder %v5385_v17, 1 }
 0x356   : > { %13746 = vmatprep.mubr.msk.f32.mxu0 %vm279_vm0, %v4701_v26  ;;  %v5388_v55 = vpop.permute.xlu1 %5387 }
 0x357   : > { %vm5516_vm10 = vcmp.eq.s32.totalorder %v5388_v55, 1 }
 0x358   : > { %v5391_v25 = vpop.permute.xlu0 %5390 }
 0x359   : > { %13747 = vmatmul.mubr.msk.f32.gmra.mrb[34].mxu0 %vm279_vm0, %v4702_v24  ;;  %vm5517_vm13 = vcmp.eq.s32.totalorder %v5391_v25, 1 }
 0x35a   : > { %13749 = vmatprep.mubr.msk.f32.mxu0 %vm279_vm0, %v4703_v29  ;;  %v5394_v19 = vpop.permute.xlu1 %5393 }
 0x35b   : > { %vm5518_vm12 = vcmp.eq.s32.totalorder %v5394_v19, 1 }
 0x35d   : > { %13750 = vmatmul.mubr.msk.f32.gmra.mrb[36].mxu0 %vm279_vm0, %v4704_v30 }
 0x35e   : > { %13752 = vmatprep.mubr.msk.f32.mxu0 %vm279_vm0, %v4705_v31  ;;  %v5400_v37 = vpop.permute.xlu1 %5399 }
 0x35f   : > { %vm5520_vm14 = vcmp.eq.s32.totalorder %v5400_v37, 1 }
 0x361   : > { %13753 = vmatmul.mubr.msk.f32.gmra.mrb[38].mxu0 %vm279_vm0, %v4706_v32 }
 0x362   : > { %13755 = vmatprep.mubr.msk.f32.mxu0 %vm279_vm0, %v4707_v34 }
 0x365   : > { %13756 = vmatmul.mubr.msk.f32.gmra.mrb[40].mxu0 %vm279_vm0, %v4708_v35 }
 0x366   : > { %13758 = vmatprep.mubr.msk.f32.mxu0 %vm279_vm0, %v16435_v16  ;;  %v4713_v16 = vld [vmem:[%s15409_s10 + $0x1b9] sm:$0xff] }
 0x369   : > { %13759 = vmatmul.mubr.msk.f32.gmra.mrb[42].mxu0 %vm279_vm0, %v16438_v22  ;;  %v4714_v22 = vld [vmem:[%s15409_s10 + $0x1c1] sm:$0xff] }
 0x36a   : > { %13761 = vmatprep.mubr.msk.f32.mxu0 %vm279_vm0, %v16445_v21  ;;  %v11679_v21 = vld [vmem:[%s18536_s3 + $0x8] sm:$0xff] }
 0x36b   : > { %13767 = vmatprep.subr.mxu0 %v11679_v21  ;;  %14507 = vmatprep.subr.mxu1 %v11679_v21 }
 0x36c   : > { %13768 = vmatpush3.msra.mxu0 %v11679_v21  ;;  %14508 = vmatpush3.msra.mxu1 %v11679_v21  ;;  %v5397_v21 = vpop.permute.xlu0 %5396 }
 0x36d   : > { %13762 = vmatmul.mubr.msk.f32.gmra.mrb[44].mxu0 %vm279_vm0, %v4712_v36  ;;  %13841 = vmatprep.subr.mxu1 %v16971_v48  ;;  %vm5519_vm15 = vcmp.eq.s32.totalorder %v5397_v21, 1 }
 0x36e   : > { %13764 = vmatprep.mubr.msk.f32.mxu0 %vm279_vm0, %v4713_v16 }
 0x371   : > { %13765 = vmatmul.mubr.msk.f32.gmra.mrb[46].mxu0 %vm279_vm0, %v4714_v22 }
 0x372   : > { %13769 = vmatprep.mubr.msk.f32.mxu0 %vm279_vm0, %v5702_v38 }
 0x375   : > { %13770 = vmatmul.mubr.msk.f32.vlgmr.msra.gmra.mrb[48].mxu0 %vm279_vm0, %v5703_v39 }
 0x376   : > { %13772 = vmatprep.mubr.msk.f32.mxu0 %vm279_vm0, %v5704_v40 }
 0x3e8   : > { %v13697_v56 = vpop.f32.mrb[0].mxu0 }
 0x3e9   : > { %v5222_v18 = vadd.f32 %v13697_v56, %v17005_v20  ;;  %v4927_v6 = vpop.f32.mrb[1].mxu0 }
 0x3ea   : > { %v5221_v7 = vadd.f32 %v17005_v20, %v4927_v6 }
 0x3eb   : > { %v5270_v8 = vmax.f32 %v5222_v18, 0.0 }
 0x3ec   : > { %v5269_v9 = vmax.f32 %v5221_v7, 0.0  ;;  %v13700_v10 = vpop.f32.mrb[2].mxu0 }
 0x3ed   : > { %v5558_v11 = vsel %vm5510_vm4, %v5270_v8, 0.0  ;;  %v5224_v57 = vadd.f32 %v13700_v10, %v17005_v20  ;;  %v4937_v12 = vpop.f32.mrb[3].mxu0  ;;  %v5406_v8 = vpop.permute.xlu1 %5405 }
 0x3ee   : > { %v5557_v27 = vsel %vm5509_vm5, %v5269_v9, 0.0  ;;  %5606 = vst.msk [vmem:[#allocation2 + $0x38] sm:$0xff] %vm279_vm0, %v5558_v11  ;;  %v5223_v28 = vadd.f32 %v17005_v20, %v4937_v12  ;;  %v5403_v10 = vpop.permute.xlu0 %5402  ;;  %vm5522_vm1 = vcmp.eq.s32.totalorder %v5406_v8, 1 }
 0x3ef   : > { %5605 = vst.msk [vmem:[#allocation2 + $0x30] sm:$0xff] %vm279_vm0, %v5557_v27  ;;  %v5272_v26 = vmax.f32 %v5224_v57, 0.0  ;;  %vm5521_vm2 = vcmp.eq.s32.totalorder %v5403_v10, 1 }
 0x3f0   : > { %v5271_v24 = vmax.f32 %v5223_v28, 0.0  ;;  %v13703_v29 = vpop.f32.mrb[4].mxu0 }
 0x3f1   : > { %v5560_v30 = vsel %vm5512_vm6, %v5272_v26, 0.0  ;;  %v5226_v31 = vadd.f32 %v13703_v29, %v17005_v20  ;;  %v4947_v32 = vpop.f32.mrb[5].mxu0 }
 0x3f2   : > { %v5559_v34 = vsel %vm5511_vm7, %v5271_v24, 0.0  ;;  %5608 = vst.msk [vmem:[#allocation2 + $0x48] sm:$0xff] %vm279_vm0, %v5560_v30  ;;  %v5225_v35 = vadd.f32 %v17005_v20, %v4947_v32  ;;  %v5412_v32 = vpop.permute.xlu1 %5411 }
 0x3f3   : > { %5607 = vst.msk [vmem:[#allocation2 + $0x40] sm:$0xff] %vm279_vm0, %v5559_v34  ;;  %v5274_v36 = vmax.f32 %v5226_v31, 0.0  ;;  %vm5524_vm3 = vcmp.eq.s32.totalorder %v5412_v32, 1 }
 0x3f4   : > { %v5273_v16 = vmax.f32 %v5225_v35, 0.0  ;;  %v13706_v22 = vpop.f32.mrb[6].mxu0 }
 0x3f5   : > { %v5562_v38 = vsel %vm5514_vm8, %v5274_v36, 0.0  ;;  %v5228_v39 = vadd.f32 %v13706_v22, %v17005_v20  ;;  %v4957_v40 = vpop.f32.mrb[7].mxu0  ;;  %v5706_v23 = vld [vmem:[#allocation2 + $0x38] sm:$0xff]  ;;  %v5409_v36 = vpop.permute.xlu0 %5408 }
 0x3f6   : > { %v5561_v5 = vsel %vm5513_vm9, %v5273_v16, 0.0  ;;  %5610 = vst.msk [vmem:[#allocation2 + $0x58] sm:$0xff] %vm279_vm0, %v5562_v38  ;;  %v5227_v51 = vadd.f32 %v17005_v20, %v4957_v40  ;;  %v5705_v52 = vld [vmem:[#allocation2 + $0x30] sm:$0xff]  ;;  %vm5523_vm4 = vcmp.eq.s32.totalorder %v5409_v36, 1  ;;  %vm5530_vm9 = vcmp.eq.s32.totalorder %v16950_v13, 1 }
 0x3f7   : > { %5609 = vst.msk [vmem:[#allocation2 + $0x50] sm:$0xff] %vm279_vm0, %v5561_v5  ;;  %v5276_v53 = vmax.f32 %v5228_v39, 0.0  ;;  %13773 = vmatmul.mubr.msk.f32.gmra.mrb[50].mxu0 %vm279_vm0, %v5705_v52 }
 0x3f8   : > { %v5275_v54 = vmax.f32 %v5227_v51, 0.0  ;;  %v13709_v56 = vpop.f32.mrb[8].mxu0  ;;  %13775 = vmatprep.mubr.msk.f32.mxu0 %vm279_vm0, %v5706_v23 }
 0x3f9   : > { %v5564_v18 = vsel %vm5516_vm10, %v5276_v53, 0.0  ;;  %v5230_v6 = vadd.f32 %v13709_v56, %v17005_v20  ;;  %v4967_v7 = vpop.f32.mrb[9].mxu0  ;;  %v5708_v57 = vld [vmem:[#allocation2 + $0x48] sm:$0xff]  ;;  %v5418_v56 = vpop.permute.xlu1 %5417 }
 0x3fa   : > { %v5563_v9 = vsel %vm5515_vm11, %v5275_v54, 0.0  ;;  %5612 = vst.msk [vmem:[#allocation2 + $0x68] sm:$0xff] %vm279_vm0, %v5564_v18  ;;  %v5229_v55 = vadd.f32 %v17005_v20, %v4967_v7  ;;  %v5707_v17 = vld [vmem:[#allocation2 + $0x40] sm:$0xff]  ;;  %v5415_v8 = vpop.permute.xlu0 %5414  ;;  %vm5526_vm5 = vcmp.eq.s32.totalorder %v5418_v56, 1  ;;  %vm5532_vm11 = vcmp.eq.s32.totalorder %v16948_v41, 1 }
 0x3fb   : > { %5611 = vst.msk [vmem:[#allocation2 + $0x60] sm:$0xff] %vm279_vm0, %v5563_v9  ;;  %v5278_v11 = vmax.f32 %v5230_v6, 0.0  ;;  %13776 = vmatmul.mubr.msk.f32.gmra.mrb[52].mxu0 %vm279_vm0, %v5707_v17  ;;  %vm5525_vm6 = vcmp.eq.s32.totalorder %v5415_v8, 1 }
 0x3fc   : > { %v5277_v12 = vmax.f32 %v5229_v55, 0.0  ;;  %v13712_v27 = vpop.f32.mrb[10].mxu0  ;;  %13778 = vmatprep.mubr.msk.f32.mxu0 %vm279_vm0, %v5708_v57 }
 0x3fd   : > { %v5566_v28 = vsel %vm5518_vm12, %v5278_v11, 0.0  ;;  %v5232_v26 = vadd.f32 %v13712_v27, %v17005_v20  ;;  %v4977_v24 = vpop.f32.mrb[11].mxu0  ;;  %v5710_v31 = vld [vmem:[#allocation2 + $0x58] sm:$0xff]  ;;  %vm5531_vm12 = vcmp.eq.s32.totalorder %v16954_v43, 1 }
 0x3fe   : > { %v5565_v29 = vsel %vm5517_vm13, %v5277_v12, 0.0  ;;  %5614 = vst.msk [vmem:[#allocation2 + $0x78] sm:$0xff] %vm279_vm0, %v5566_v28  ;;  %v5231_v19 = vadd.f32 %v17005_v20, %v4977_v24  ;;  %v5709_v30 = vld [vmem:[#allocation2 + $0x50] sm:$0xff]  ;;  %vm5534_vm13 = vcmp.eq.s32.totalorder %v16958_v45, 1 }
 0x3ff   : > { %5613 = vst.msk [vmem:[#allocation2 + $0x70] sm:$0xff] %vm279_vm0, %v5565_v29  ;;  %v5280_v25 = vmax.f32 %v5232_v26, 0.0  ;;  %13779 = vmatmul.mubr.msk.f32.gmra.mrb[54].mxu0 %vm279_vm0, %v5709_v30 }
 0x400   : > { %v5279_v34 = vmax.f32 %v5231_v19, 0.0  ;;  %v13715_v35 = vpop.f32.mrb[12].mxu0  ;;  %13781 = vmatprep.mubr.msk.f32.mxu0 %vm279_vm0, %v5710_v31  ;;  %v5424_v19 = vpop.permute.xlu1 %5423 }
 0x401   : > { %v5568_v16 = vsel %vm5520_vm14, %v5280_v25, 0.0  ;;  %v5234_v22 = vadd.f32 %v13715_v35, %v17005_v20  ;;  %v4987_v38 = vpop.f32.mrb[13].mxu0  ;;  %v5712_v5 = vld [vmem:[#allocation2 + $0x68] sm:$0xff]  ;;  %v5421_v25 = vpop.permute.xlu0 %5420  ;;  %vm5528_vm7 = vcmp.eq.s32.totalorder %v5424_v19, 1  ;;  %vm5533_vm14 = vcmp.eq.s32.totalorder %v16952_v42, 1 }
 0x402   : > { %v5567_v39 = vsel %vm5519_vm15, %v5279_v34, 0.0  ;;  %5616 = vst.msk [vmem:[#allocation2 + $0x88] sm:$0xff] %vm279_vm0, %v5568_v16  ;;  %v5233_v37 = vadd.f32 %v17005_v20, %v4987_v38  ;;  %v5711_v21 = vld [vmem:[#allocation2 + $0x60] sm:$0xff]  ;;  %vm5527_vm8 = vcmp.eq.s32.totalorder %v5421_v25, 1  ;;  %vm5536_vm15 = vcmp.eq.s32.totalorder %v16962_v15, 1 }
 0x403   : > { %5615 = vst.msk [vmem:[#allocation2 + $0x80] sm:$0xff] %vm279_vm0, %v5567_v39  ;;  %v5282_v40 = vmax.f32 %v5234_v22, 0.0  ;;  %13782 = vmatmul.mubr.msk.f32.gmra.mrb[56].mxu0 %vm279_vm0, %v5711_v21 }
 0x404   : > { %v5281_v51 = vmax.f32 %v5233_v37, 0.0  ;;  %v13718_v52 = vpop.f32.mrb[14].mxu0  ;;  %13784 = vmatprep.mubr.msk.f32.mxu0 %vm279_vm0, %v5712_v5 }
 0x405   : > { %v5570_v53 = vsel %vm5522_vm1, %v5282_v40, 0.0  ;;  %v5236_v23 = vadd.f32 %v13718_v52, %v17005_v20  ;;  %v4997_v54 = vpop.f32.mrb[15].mxu0  ;;  %v5714_v55 = vld [vmem:[#allocation2 + $0x78] sm:$0xff]  ;;  %vm5535_vm1 = vcmp.eq.s32.totalorder %v16956_v44, 1 }
 0x406   : > { %v5569_v18 = vsel %vm5521_vm2, %v5281_v51, 0.0  ;;  %5618 = vst.msk [vmem:[#allocation2 + $0x98] sm:$0xff] %vm279_vm0, %v5570_v53  ;;  %v5235_v6 = vadd.f32 %v17005_v20, %v4997_v54  ;;  %v5713_v7 = vld [vmem:[#allocation2 + $0x70] sm:$0xff]  ;;  %v5427_v53 = vpop.permute.xlu0 %5426  ;;  %vm5538_vm2 = vcmp.eq.s32.totalorder %v16966_v47, 1 }
 0x407   : > { %5617 = vst.msk [vmem:[#allocation2 + $0x90] sm:$0xff] %vm279_vm0, %v5569_v18  ;;  %v5284_v9 = vmax.f32 %v5236_v23, 0.0  ;;  %13785 = vmatmul.mubr.msk.f32.gmra.mrb[58].mxu0 %vm279_vm0, %v5713_v7  ;;  %vm5529_vm10 = vcmp.eq.s32.totalorder %v5427_v53, 1  ;;  %v17098_v53 = vld [vmem:[%s18536_s3 + $0x10] sm:$0xff] }
 0x408   : > { %v5283_v17 = vmax.f32 %v5235_v6, 0.0  ;;  %v13721_v10 = vpop.f32.mrb[16].mxu0  ;;  %13787 = vmatprep.mubr.msk.f32.mxu0 %vm279_vm0, %v5714_v55 }
 0x409   : > { %v5572_v11 = vsel %vm5524_vm3, %v5284_v9, 0.0  ;;  %v5238_v57 = vadd.f32 %v13721_v10, %v17005_v20  ;;  %v5007_v12 = vpop.f32.mrb[17].mxu0  ;;  %v5716_v29 = vld [vmem:[#allocation2 + $0x88] sm:$0xff]  ;;  %vm5537_vm3 = vcmp.eq.s32.totalorder %v16960_v14, 1 }
 0x40a   : > { %v5571_v27 = vsel %vm5523_vm4, %v5283_v17, 0.0  ;;  %5620 = vst.msk [vmem:[#allocation2 + $0xa8] sm:$0xff] %vm279_vm0, %v5572_v11  ;;  %v5237_v28 = vadd.f32 %v17005_v20, %v5007_v12  ;;  %v5715_v26 = vld [vmem:[#allocation2 + $0x80] sm:$0xff]  ;;  %vm5540_vm4 = vcmp.eq.s32.totalorder %v16976_v50, 1 }
 0x40b   : > { %5619 = vst.msk [vmem:[#allocation2 + $0xa0] sm:$0xff] %vm279_vm0, %v5571_v27  ;;  %v5286_v24 = vmax.f32 %v5238_v57, 0.0  ;;  %13788 = vmatmul.mubr.msk.f32.gmra.mrb[60].mxu0 %vm279_vm0, %v5715_v26 }
 0x40c   : > { %v5285_v30 = vmax.f32 %v5237_v28, 0.0  ;;  %v13724_v31 = vpop.f32.mrb[18].mxu0  ;;  %13790 = vmatprep.mubr.msk.f32.mxu0 %vm279_vm0, %v5716_v29 }
 0x40d   : > { %v5574_v32 = vsel %vm5526_vm5, %v5286_v24, 0.0  ;;  %v5240_v34 = vadd.f32 %v13724_v31, %v17005_v20  ;;  %v5017_v35 = vpop.f32.mrb[19].mxu0  ;;  %v5718_v39 = vld [vmem:[#allocation2 + $0x98] sm:$0xff]  ;;  %vm5539_vm5 = vcmp.eq.s32.totalorder %v16964_v46, 1 }
 0x40e   : > { %v5573_v36 = vsel %vm5525_vm6, %v5285_v30, 0.0  ;;  %5622 = vst.msk [vmem:[#allocation2 + $0xb8] sm:$0xff] %vm279_vm0, %v5574_v32  ;;  %v5239_v16 = vadd.f32 %v17005_v20, %v5017_v35  ;;  %v5717_v22 = vld [vmem:[#allocation2 + $0x90] sm:$0xff]  ;;  %vm5542_vm6 = vcmp.eq.s32.totalorder %v16980_v59, 1 }
 0x40f   : > { %5621 = vst.msk [vmem:[#allocation2 + $0xb0] sm:$0xff] %vm279_vm0, %v5573_v36  ;;  %v5288_v38 = vmax.f32 %v5240_v34, 0.0  ;;  %13791 = vmatmul.mubr.msk.f32.gmra.mrb[62].mxu0 %vm279_vm0, %v5717_v22 }
 0x410   : > { %v5287_v37 = vmax.f32 %v5239_v16, 0.0  ;;  %v13727_v21 = vpop.f32.mrb[20].mxu0  ;;  %13793 = vmatprep.mubr.msk.f32.mxu0 %vm279_vm0, %v5718_v39 }
 0x411   : > { %v5576_v40 = vsel %vm5528_vm7, %v5288_v38, 0.0  ;;  %v5242_v5 = vadd.f32 %v13727_v21, %v17005_v20  ;;  %v5027_v51 = vpop.f32.mrb[21].mxu0  ;;  %v5720_v18 = vld [vmem:[#allocation2 + $0xa8] sm:$0xff]  ;;  %vm5541_vm7 = vcmp.eq.s32.totalorder %v16974_v49, 1 }
 0x412   : > { %v5575_v52 = vsel %vm5527_vm8, %v5287_v37, 0.0  ;;  %5624 = vst.msk [vmem:[#allocation2 + $0xc8] sm:$0xff] %vm279_vm0, %v5576_v40  ;;  %v5241_v23 = vadd.f32 %v17005_v20, %v5027_v51  ;;  %v5719_v54 = vld [vmem:[#allocation2 + $0xa0] sm:$0xff]  ;;  %vm5544_vm8 = vcmp.eq.s32.totalorder %v16984_v61, 1 }
 0x413   : > { %5623 = vst.msk [vmem:[#allocation2 + $0xc0] sm:$0xff] %vm279_vm0, %v5575_v52  ;;  %v5290_v56 = vmax.f32 %v5242_v5, 0.0  ;;  %13794 = vmatmul.mubr.msk.f32.gmra.mrb[64].mxu0 %vm279_vm0, %v5719_v54 }
 0x414   : > { %v5289_v6 = vmax.f32 %v5241_v23, 0.0  ;;  %v13730_v7 = vpop.f32.mrb[22].mxu0  ;;  %13796 = vmatprep.mubr.msk.f32.mxu0 %vm279_vm0, %v5720_v18 }
 0x415   : > { %v5578_v8 = vsel %vm5530_vm9, %v5290_v56, 0.0  ;;  %v5244_v13 = vadd.f32 %v13730_v7, %v17005_v20  ;;  %v5037_v9 = vpop.f32.mrb[23].mxu0  ;;  %v5722_v57 = vld [vmem:[#allocation2 + $0xb8] sm:$0xff]  ;;  %vm5543_vm9 = vcmp.eq.s32.totalorder %v16978_v58, 1 }
 0x416   : > { %5626 = vst.msk [vmem:[#allocation2 + $0xd8] sm:$0xff] %vm279_vm0, %v5578_v8  ;;  %v5577_v55 = vsel %vm5529_vm10, %v5289_v6, 0.0  ;;  %v5243_v17 = vadd.f32 %v17005_v20, %v5037_v9  ;;  %v5721_v10 = vld [vmem:[#allocation2 + $0xb0] sm:$0xff]  ;;  %vm5546_vm10 = vcmp.eq.s32.totalorder %v16988_v63, 1 }
 0x417   : > { %5625 = vst.msk [vmem:[#allocation2 + $0xd0] sm:$0xff] %vm279_vm0, %v5577_v55  ;;  %v5292_v11 = vmax.f32 %v5244_v13, 0.0  ;;  %13797 = vmatmul.mubr.msk.f32.gmra.mrb[66].mxu0 %vm279_vm0, %v5721_v10 }
 0x418   : > { %v5291_v12 = vmax.f32 %v5243_v17, 0.0  ;;  %v13733_v27 = vpop.f32.mrb[24].mxu0  ;;  %13799 = vmatprep.mubr.msk.f32.mxu0 %vm279_vm0, %v5722_v57 }
 0x419   : > { %v5580_v28 = vsel %vm5532_vm11, %v5292_v11, 0.0  ;;  %v5246_v41 = vadd.f32 %v13733_v27, %v17005_v20  ;;  %v5047_v26 = vpop.f32.mrb[25].mxu0  ;;  %v5724_v25 = vld [vmem:[#allocation2 + $0xc8] sm:$0xff]  ;;  %vm5545_vm11 = vcmp.eq.s32.totalorder %v16982_v60, 1 }
 0x41a   : > { %5628 = vst.msk [vmem:[#allocation2 + $0xe8] sm:$0xff] %vm279_vm0, %v5580_v28  ;;  %v5579_v24 = vsel %vm5531_vm12, %v5291_v12, 0.0  ;;  %v5245_v29 = vadd.f32 %v17005_v20, %v5047_v26  ;;  %v5723_v19 = vld [vmem:[#allocation2 + $0xc0] sm:$0xff]  ;;  %vm5548_vm12 = vcmp.eq.s32.totalorder %v16992_v1, 1 }
 0x41b   : > { %5627 = vst.msk [vmem:[#allocation2 + $0xe0] sm:$0xff] %vm279_vm0, %v5579_v24  ;;  %v5294_v30 = vmax.f32 %v5246_v41, 0.0  ;;  %13800 = vmatmul.mubr.msk.f32.gmra.mrb[68].mxu0 %vm279_vm0, %v5723_v19 }
 0x41c   : > { %v5293_v31 = vmax.f32 %v5245_v29, 0.0  ;;  %v13736_v43 = vpop.f32.mrb[26].mxu0  ;;  %13802 = vmatprep.mubr.msk.f32.mxu0 %vm279_vm0, %v5724_v25 }
 0x41d   : > { %v5582_v32 = vsel %vm5534_vm13, %v5294_v30, 0.0  ;;  %v5248_v34 = vadd.f32 %v13736_v43, %v17005_v20  ;;  %v5057_v35 = vpop.f32.mrb[27].mxu0  ;;  %v5726_v36 = vld [vmem:[#allocation2 + $0xd8] sm:$0xff]  ;;  %vm5547_vm13 = vcmp.eq.s32.totalorder %v16986_v62, 1 }
 0x41e   : > { %5630 = vst.msk [vmem:[#allocation2 + $0xf8] sm:$0xff] %vm279_vm0, %v5582_v32  ;;  %v5581_v16 = vsel %vm5533_vm14, %v5293_v31, 0.0  ;;  %v5247_v22 = vadd.f32 %v17005_v20, %v5057_v35  ;;  %13805 = vmatprep.mubr.msk.f32.mxu1 %vm279_vm0, %v5726_v36  ;;  %v5725_v38 = vld [vmem:[#allocation2 + $0xd0] sm:$0xff]  ;;  %vm5550_vm14 = vcmp.eq.s32.totalorder %v16996_v2, 1 }
 0x41f   : > { %5629 = vst.msk [vmem:[#allocation2 + $0xf0] sm:$0xff] %vm279_vm0, %v5581_v16  ;;  %v5296_v45 = vmax.f32 %v5248_v34, 0.0  ;;  %13803 = vmatmul.mubr.msk.f32.gmra.mrb[70].mxu0 %vm279_vm0, %v5725_v38 }
 0x420   : > { %v5295_v42 = vmax.f32 %v5247_v22, 0.0  ;;  %v13739_v39 = vpop.f32.mrb[28].mxu0 }
 0x421   : > { %v5584_v37 = vsel %vm5536_vm15, %v5296_v45, 0.0  ;;  %v5250_v21 = vadd.f32 %v13739_v39, %v17005_v20  ;;  %v5067_v40 = vpop.f32.mrb[29].mxu0  ;;  %v17103_v44 = vld [vmem:[#allocation2 + $0xe8] sm:$0xff]  ;;  %vm5549_vm15 = vcmp.eq.s32.totalorder %v16990_v0, 1 }
 0x422   : > { %5632 = vst.msk [vmem:[#allocation2 + $0x108] sm:$0xff] %vm279_vm0, %v5584_v37  ;;  %v5583_v5 = vsel %vm5535_vm1, %v5295_v42, 0.0  ;;  %v5249_v51 = vadd.f32 %v17005_v20, %v5067_v40  ;;  %v17093_v52 = vld [vmem:[#allocation2 + $0xe0] sm:$0xff]  ;;  %vm5552_vm1 = vcmp.eq.s32.totalorder %v17000_v4, 1 }
 0x423   : > { %5631 = vst.msk [vmem:[#allocation2 + $0x100] sm:$0xff] %vm279_vm0, %v5583_v5  ;;  %v5298_v15 = vmax.f32 %v5250_v21, 0.0  ;;  %13806 = vmatmul.mubr.msk.f32.vlgmr.msra.gmra.mrb[0].mxu1 %vm279_vm0, %v17093_v52 }
 0x424   : > { %v5297_v23 = vmax.f32 %v5249_v51, 0.0  ;;  %13842 = vmatpush3.msra.mxu1 %v16971_v48  ;;  %v13742_v54 = vpop.f32.mrb[30].mxu0  ;;  %13808 = vmatprep.mubr.msk.f32.mxu1 %vm279_vm0, %v17103_v44 }
 0x425   : > { %v5586_v56 = vsel %vm5538_vm2, %v5298_v15, 0.0  ;;  %v5252_v18 = vadd.f32 %v13742_v54, %v17005_v20  ;;  %v5077_v6 = vpop.f32.mrb[31].mxu0  ;;  %13915 = vmatprep.subr.mxu1 %v17098_v53  ;;  %v17119_v14 = vld [vmem:[#allocation2 + $0xf8] sm:$0xff]  ;;  %vm5551_vm2 = vcmp.eq.s32.totalorder %v16994_v33, 1 }
 0x426   : > { %5634 = vst.msk [vmem:[#allocation2 + $0x118] sm:$0xff] %vm279_vm0, %v5586_v56  ;;  %v5585_v7 = vsel %vm5537_vm3, %v5297_v23, 0.0  ;;  %v5251_v47 = vadd.f32 %v17005_v20, %v5077_v6  ;;  %v17114_v8 = vld [vmem:[#allocation2 + $0xf0] sm:$0xff] }
 0x427   : > { %5633 = vst.msk [vmem:[#allocation2 + $0x110] sm:$0xff] %vm279_vm0, %v5585_v7  ;;  %v5300_v48 = vmax.f32 %v5252_v18, 0.0  ;;  %13809 = vmatmul.mubr.msk.f32.gmra.mrb[2].mxu1 %vm279_vm0, %v17114_v8 }
 0x428   : > { %v5299_v13 = vmax.f32 %v5251_v47, 0.0  ;;  %v13745_v9 = vpop.f32.mrb[32].mxu0  ;;  %13811 = vmatprep.mubr.msk.f32.mxu1 %vm279_vm0, %v17119_v14 }
 0x429   : > { %v5588_v55 = vsel %vm5540_vm4, %v5300_v48, 0.0  ;;  %v5254_v17 = vadd.f32 %v13745_v9, %v17005_v20  ;;  %v5087_v10 = vpop.f32.mrb[33].mxu0  ;;  %v17133_v27 = vld [vmem:[#allocation2 + $0x108] sm:$0xff]  ;;  %vm5553_vm4 = vcmp.eq.s32.totalorder %v16998_v3, 1 }
 0x42a   : > { %5636 = vst.msk [vmem:[#allocation2 + $0x128] sm:$0xff] %vm279_vm0, %v5588_v55  ;;  %v5587_v11 = vsel %vm5539_vm5, %v5299_v13, 0.0  ;;  %v5253_v57 = vadd.f32 %v17005_v20, %v5087_v10  ;;  %v17128_v12 = vld [vmem:[#allocation2 + $0x100] sm:$0xff] }
 0x42b   : > { %5635 = vst.msk [vmem:[#allocation2 + $0x120] sm:$0xff] %vm279_vm0, %v5587_v11  ;;  %v5302_v50 = vmax.f32 %v5254_v17, 0.0  ;;  %13812 = vmatmul.mubr.msk.f32.gmra.mrb[4].mxu1 %vm279_vm0, %v17128_v12  ;;  %v5502_v11 = vpop.permute.xlu1 %5501 }
 0x42c   : > { %v5301_v46 = vmax.f32 %v5253_v57, 0.0  ;;  %v13748_v28 = vpop.f32.mrb[34].mxu0  ;;  %13814 = vmatprep.mubr.msk.f32.mxu1 %vm279_vm0, %v17133_v27  ;;  %vm5554_vm3 = vcmp.eq.s32.totalorder %v5502_v11, 1  ;;  %v17310_v11 = vld [vmem:[#allocation2 + $0x8f] sm:$0xff] }
 0x42d   : > { %v5590_v41 = vsel %vm5542_vm6, %v5302_v50, 0.0  ;;  %v5256_v26 = vadd.f32 %v13748_v28, %v17005_v20  ;;  %v5097_v24 = vpop.f32.mrb[35].mxu0  ;;  %v17147_v25 = vld [vmem:[#allocation2 + $0x118] sm:$0xff] }
 0x42e   : > { %5638 = vst.msk [vmem:[#allocation2 + $0x138] sm:$0xff] %vm279_vm0, %v5590_v41  ;;  %v5589_v29 = vsel %vm5541_vm7, %v5301_v46, 0.0  ;;  %v5255_v19 = vadd.f32 %v17005_v20, %v5097_v24  ;;  %v17142_v30 = vld [vmem:[#allocation2 + $0x110] sm:$0xff] }
 0x42f   : > { %5637 = vst.msk [vmem:[#allocation2 + $0x130] sm:$0xff] %vm279_vm0, %v5589_v29  ;;  %v5304_v59 = vmax.f32 %v5256_v26, 0.0  ;;  %13815 = vmatmul.mubr.msk.f32.gmra.mrb[6].mxu1 %vm279_vm0, %v17142_v30 }
 0x430   : > { %v5303_v49 = vmax.f32 %v5255_v19, 0.0  ;;  %v13751_v31 = vpop.f32.mrb[36].mxu0  ;;  %13817 = vmatprep.mubr.msk.f32.mxu1 %vm279_vm0, %v17147_v25 }
 0x431   : > { %v5592_v43 = vsel %vm5544_vm8, %v5304_v59, 0.0  ;;  %v5258_v32 = vadd.f32 %v13751_v31, %v17005_v20  ;;  %v5107_v34 = vpop.f32.mrb[37].mxu0  ;;  %v17161_v22 = vld [vmem:[#allocation2 + $0x128] sm:$0xff] }
 0x432   : > { %5640 = vst.msk [vmem:[#allocation2 + $0x148] sm:$0xff] %vm279_vm0, %v5592_v43  ;;  %v5591_v35 = vsel %vm5543_vm9, %v5303_v49, 0.0  ;;  %v5257_v36 = vadd.f32 %v17005_v20, %v5107_v34  ;;  %v17156_v16 = vld [vmem:[#allocation2 + $0x120] sm:$0xff]  ;;  %v5508_v49 = vpop.permute.xlu1 %5507  ;;  %v5505_v34 = vpop.permute.xlu0 %5504 }
 0x433   : > { %5639 = vst.msk [vmem:[#allocation2 + $0x140] sm:$0xff] %vm279_vm0, %v5591_v35  ;;  %v5306_v61 = vmax.f32 %v5258_v32, 0.0  ;;  %13818 = vmatmul.mubr.msk.f32.gmra.mrb[8].mxu1 %vm279_vm0, %v17156_v16  ;;  %vm5556_vm5 = vcmp.eq.s32.totalorder %v5508_v49, 1  ;;  %vm5555_vm6 = vcmp.eq.s32.totalorder %v5505_v34, 1  ;;  %v17358_v49 = vld [vmem:[#allocation2 + $0xef] sm:$0xff] }
 0x434   : > { %v5305_v58 = vmax.f32 %v5257_v36, 0.0  ;;  %v13754_v38 = vpop.f32.mrb[38].mxu0  ;;  %13820 = vmatprep.mubr.msk.f32.mxu1 %vm279_vm0, %v17161_v22  ;;  %v17374_v34 = vld [vmem:[#allocation2 + $0x10f] sm:$0xff] }
 0x435   : > { %v5594_v45 = vsel %vm5546_vm10, %v5306_v61, 0.0  ;;  %v5260_v42 = vadd.f32 %v13754_v38, %v17005_v20  ;;  %v5117_v39 = vpop.f32.mrb[39].mxu0  ;;  %v17175_v5 = vld [vmem:[#allocation2 + $0x138] sm:$0xff] }
 0x436   : > { %5642 = vst.msk [vmem:[#allocation2 + $0x158] sm:$0xff] %vm279_vm0, %v5594_v45  ;;  %v5593_v37 = vsel %vm5545_vm11, %v5305_v58, 0.0  ;;  %v5259_v21 = vadd.f32 %v17005_v20, %v5117_v39  ;;  %v17170_v40 = vld [vmem:[#allocation2 + $0x130] sm:$0xff]  ;;  %18831 = vst [vmem:[#allocation4_spill] sm:$0xff] %v17175_v5 }
 0x437   : > { %18830 = vst [vmem:[#allocation3_spill] sm:$0xff] %v17170_v40  ;;  %5641 = vst.msk [vmem:[#allocation2 + $0x150] sm:$0xff] %vm279_vm0, %v5593_v37  ;;  %v5308_v63 = vmax.f32 %v5260_v42, 0.0  ;;  %13821 = vmatmul.mubr.msk.f32.gmra.mrb[10].mxu1 %vm279_vm0, %v17170_v40 }
 0x438   : > { %v5307_v60 = vmax.f32 %v5259_v21, 0.0  ;;  %v13757_v51 = vpop.f32.mrb[40].mxu0  ;;  %13823 = vmatprep.mubr.msk.f32.mxu1 %vm279_vm0, %v17175_v5  ;;  %v17506_v5 = vld [vmem:[#allocation2 + $0x91] sm:$0xff] }
 0x439   : > { %v5596_v15 = vsel %vm5548_vm12, %v5308_v63, 0.0  ;;  %v5262_v23 = vadd.f32 %v13757_v51, %v17005_v20  ;;  %v5127_v54 = vpop.f32.mrb[41].mxu0  ;;  %v17189_v7 = vld [vmem:[#allocation2 + $0x148] sm:$0xff]  ;;  %v5653_v63 = vld [vmem:[#allocation2 + $0x17] sm:$0xff]  ;;  %v5654_v51 = vld [vmem:[#allocation2 + $0x1f] sm:$0xff]  ;;  %18862 = vst [vmem:[#allocation35_spill] sm:$0xff] %v17506_v5 }
 0x43a   : > { %5644 = vst.msk [vmem:[#allocation2 + $0x168] sm:$0xff] %vm279_vm0, %v5596_v15  ;;  %v5595_v56 = vsel %vm5547_vm13, %v5307_v60, 0.0  ;;  %v5261_v18 = vadd.f32 %v17005_v20, %v5127_v54  ;;  %v17184_v6 = vld [vmem:[#allocation2 + $0x140] sm:$0xff]  ;;  %18833 = vst [vmem:[#allocation6_spill] sm:$0xff] %v17189_v7  ;;  %v17262_v54 = vld [vmem:[#allocation2 + $0x2f] sm:$0xff] }
 0x43b   : > { %18832 = vst [vmem:[#allocation5_spill] sm:$0xff] %v17184_v6  ;;  %5643 = vst.msk [vmem:[#allocation2 + $0x160] sm:$0xff] %vm279_vm0, %v5595_v56  ;;  %v5310_v1 = vmax.f32 %v5262_v23, 0.0  ;;  %13824 = vmatmul.mubr.msk.f32.gmra.mrb[12].mxu1 %vm279_vm0, %v17184_v6  ;;  %v5655_v15 = vld [vmem:[#allocation2 + $0x27] sm:$0xff]  ;;  %v17256_v23 = vld [vmem:[%s18536_s3 + $0x18] sm:$0xff] }
 0x43c   : > { %v5309_v62 = vmax.f32 %v5261_v18, 0.0  ;;  %v13760_v47 = vpop.f32.mrb[42].mxu0  ;;  %13826 = vmatprep.mubr.msk.f32.mxu1 %vm279_vm0, %v17189_v7  ;;  %v17266_v56 = vld [vmem:[#allocation2 + $0x37] sm:$0xff]  ;;  %v17270_v18 = vld [vmem:[#allocation2 + $0x3f] sm:$0xff] }
 0x43d   : > { %v5598_v48 = vsel %vm5550_vm14, %v5310_v1, 0.0  ;;  %v5264_v13 = vadd.f32 %v13760_v47, %v17005_v20  ;;  %v5137_v9 = vpop.f32.mrb[43].mxu0  ;;  %v17203_v57 = vld [vmem:[#allocation2 + $0x158] sm:$0xff]  ;;  %v17278_v1 = vld [vmem:[#allocation2 + $0x4f] sm:$0xff]  ;;  %v17460_v6 = vld [vmem:[#allocation2 + $0x41] sm:$0xff] }
 0x43e   : > { %5646 = vst.msk [vmem:[#allocation2 + $0x178] sm:$0xff] %vm279_vm0, %v5598_v48  ;;  %v5597_v55 = vsel %vm5549_vm15, %v5309_v62, 0.0  ;;  %v5263_v17 = vadd.f32 %v17005_v20, %v5137_v9  ;;  %v17198_v10 = vld [vmem:[#allocation2 + $0x150] sm:$0xff]  ;;  %18835 = vst [vmem:[#allocation8_spill] sm:$0xff] %v17203_v57  ;;  %v17286_v47 = vld [vmem:[#allocation2 + $0x5f] sm:$0xff] }
 0x43f   : > { %18834 = vst [vmem:[#allocation7_spill] sm:$0xff] %v17198_v10  ;;  %5645 = vst.msk [vmem:[#allocation2 + $0x170] sm:$0xff] %vm279_vm0, %v5597_v55  ;;  %v5312_v2 = vmax.f32 %v5264_v13, 0.0  ;;  %13827 = vmatmul.mubr.msk.f32.gmra.mrb[14].mxu1 %vm279_vm0, %v17198_v10  ;;  %v17282_v62 = vld [vmem:[#allocation2 + $0x57] sm:$0xff]  ;;  %v17290_v48 = vld [vmem:[#allocation2 + $0x67] sm:$0xff] }
 0x440   : > { %v5311_v0 = vmax.f32 %v5263_v17, 0.0  ;;  %v13763_v50 = vpop.f32.mrb[44].mxu0  ;;  %13829 = vmatprep.mubr.msk.f32.mxu1 %vm279_vm0, %v17203_v57  ;;  %v17294_v13 = vld [vmem:[#allocation2 + $0x6f] sm:$0xff]  ;;  %v17298_v9 = vld [vmem:[#allocation2 + $0x77] sm:$0xff]  ;;  %v17302_v55 = vld [vmem:[#allocation2 + $0x7f] sm:$0xff]  ;;  %18849 = vst [vmem:[#allocation22_spill] sm:$0xff] %v17460_v6 }
 0x441   : > { %v5600_v46 = vsel %vm5552_vm1, %v5312_v2, 0.0  ;;  %v5266_v28 = vadd.f32 %v13763_v50, %v17005_v20  ;;  %v5147_v41 = vpop.f32.mrb[45].mxu0  ;;  %v17217_v19 = vld [vmem:[#allocation2 + $0x168] sm:$0xff]  ;;  %v17314_v2 = vld [vmem:[#allocation2 + $0x97] sm:$0xff]  ;;  %v17446_v57 = vld [vmem:[%s18536_s3 + $0x20] sm:$0xff] }
 0x442   : > { %5648 = vst.msk [vmem:[#allocation2 + $0x188] sm:$0xff] %vm279_vm0, %v5600_v46  ;;  %v5599_v26 = vsel %vm5551_vm2, %v5311_v0, 0.0  ;;  %v5265_v24 = vadd.f32 %v17005_v20, %v5147_v41  ;;  %v17212_v29 = vld [vmem:[#allocation2 + $0x160] sm:$0xff]  ;;  %18837 = vst [vmem:[#allocation10_spill] sm:$0xff] %v17217_v19  ;;  %v17326_v46 = vld [vmem:[#allocation2 + $0xaf] sm:$0xff] }
 0x443   : > { %18836 = vst [vmem:[#allocation9_spill] sm:$0xff] %v17212_v29  ;;  %5647 = vst.msk [vmem:[#allocation2 + $0x180] sm:$0xff] %vm279_vm0, %v5599_v26  ;;  %v5314_v4 = vmax.f32 %v5266_v28, 0.0  ;;  %13830 = vmatmul.mubr.msk.f32.gmra.mrb[16].mxu1 %vm279_vm0, %v17212_v29  ;;  %v17306_v17 = vld [vmem:[#allocation2 + $0x87] sm:$0xff]  ;;  %v17318_v0 = vld [vmem:[#allocation2 + $0x9f] sm:$0xff] }
 0x444   : > { %v5313_v33 = vmax.f32 %v5265_v24, 0.0  ;;  %v13766_v59 = vpop.f32.mrb[46].mxu0  ;;  %13832 = vmatprep.mubr.msk.f32.mxu1 %vm279_vm0, %v17217_v19  ;;  %v17322_v50 = vld [vmem:[#allocation2 + $0xa7] sm:$0xff]  ;;  %v17330_v28 = vld [vmem:[#allocation2 + $0xb7] sm:$0xff]  ;;  %v17334_v41 = vld [vmem:[#allocation2 + $0xbf] sm:$0xff] }
 0x445   : > { %v5602_v31 = vsel %vm5554_vm3, %v5314_v4, 0.0  ;;  %v5268_v43 = vadd.f32 %v13766_v59, %v17005_v20  ;;  %v5157_v32 = vpop.f32.mrb[47].mxu0  ;;  %v17230_v3 = vld [vmem:[#allocation2 + $0x178] sm:$0xff]  ;;  %v17338_v26 = vld [vmem:[#allocation2 + $0xc7] sm:$0xff]  ;;  %v17342_v24 = vld [vmem:[#allocation2 + $0xcf] sm:$0xff] }
 0x446   : > { %5650 = vst.msk [vmem:[#allocation2 + $0x198] sm:$0xff] %vm279_vm0, %v5602_v31  ;;  %v5601_v35 = vsel %vm5553_vm4, %v5313_v33, 0.0  ;;  %v5267_v36 = vadd.f32 %v17005_v20, %v5157_v32  ;;  %v17225_v61 = vld [vmem:[#allocation2 + $0x170] sm:$0xff]  ;;  %18839 = vst [vmem:[#allocation12_spill] sm:$0xff] %v17230_v3  ;;  %v17350_v33 = vld [vmem:[#allocation2 + $0xdf] sm:$0xff] }
 0x447   : > { %18838 = vst [vmem:[#allocation11_spill] sm:$0xff] %v17225_v61  ;;  %5649 = vst.msk [vmem:[#allocation2 + $0x190] sm:$0xff] %vm279_vm0, %v5601_v35  ;;  %v5316_v58 = vmax.f32 %v5268_v43, 0.0  ;;  %13833 = vmatmul.mubr.msk.f32.gmra.mrb[18].mxu1 %vm279_vm0, %v17225_v61  ;;  %v17346_v4 = vld [vmem:[#allocation2 + $0xd7] sm:$0xff]  ;;  %v17354_v59 = vld [vmem:[#allocation2 + $0xe7] sm:$0xff] }
 0x448   : > { %v5315_v38 = vmax.f32 %v5267_v36, 0.0  ;;  %13835 = vmatprep.mubr.msk.f32.mxu1 %vm279_vm0, %v17230_v3  ;;  %v17234_v45 = vpop.f32.mrb[48].mxu0  ;;  %v17362_v31 = vld [vmem:[#allocation2 + $0xf7] sm:$0xff]  ;;  %v17366_v43 = vld [vmem:[#allocation2 + $0xff] sm:$0xff]  ;;  %v17370_v32 = vld [vmem:[#allocation2 + $0x107] sm:$0xff] }
 0x449   : > { %18840 = vst [vmem:[#allocation13_spill] sm:$0xff] %v17234_v45  ;;  %v5604_v42 = vsel %vm5556_vm5, %v5316_v58, 0.0  ;;  %v17236_v20 = vpop.f32.mrb[49].mxu0  ;;  %v17244_v21 = vld [vmem:[#allocation2 + $0x188] sm:$0xff]  ;;  %v17378_v35 = vld [vmem:[#allocation2 + $0x117] sm:$0xff]  ;;  %v17382_v36 = vld [vmem:[#allocation2 + $0x11f] sm:$0xff] }
 0x44a   : > { %18841 = vst [vmem:[#allocation14_spill] sm:$0xff] %v17236_v20  ;;  %5652 = vst.msk [vmem:[#allocation2 + $0x1a8] sm:$0xff] %vm279_vm0, %v5604_v42  ;;  %v5603_v39 = vsel %vm5555_vm6, %v5315_v38, 0.0  ;;  %v17239_v37 = vld [vmem:[#allocation2 + $0x180] sm:$0xff]  ;;  %v17390_v38 = vld [vmem:[#allocation2 + $0x12f] sm:$0xff] }
 0x44b   : > { %18842 = vst [vmem:[#allocation15_spill] sm:$0xff] %v17239_v37  ;;  %5651 = vst.msk [vmem:[#allocation2 + $0x1a0] sm:$0xff] %vm279_vm0, %v5603_v39  ;;  %13836 = vmatmul.mubr.msk.f32.gmra.mrb[20].mxu1 %vm279_vm0, %v17239_v37  ;;  %v17386_v58 = vld [vmem:[#allocation2 + $0x127] sm:$0xff]  ;;  %v17394_v42 = vld [vmem:[#allocation2 + $0x137] sm:$0xff] }
 0x44c   : > { %18843 = vst [vmem:[#allocation16_spill] sm:$0xff] %v17244_v21  ;;  %13838 = vmatprep.mubr.msk.f32.mxu1 %vm279_vm0, %v17244_v21  ;;  %v17398_v39 = vld [vmem:[#allocation2 + $0x13f] sm:$0xff]  ;;  %v17418_v45 = vld [vmem:[#allocation2 + $0x167] sm:$0xff]  ;;  %v17426_v21 = vld [vmem:[#allocation2 + $0x177] sm:$0xff] }
 0x44d   : > { %v17414_v20 = vld [vmem:[#allocation2 + $0x15f] sm:$0xff]  ;;  %v17434_v3 = vld [vmem:[#allocation2 + $0x187] sm:$0xff]  ;;  %v17452_v7 = vld [vmem:[#allocation2 + $0x31] sm:$0xff] }
 0x44e   : > { %v17248_v60 = vld [vmem:[#allocation2 + $0x190] sm:$0xff]  ;;  %v17430_v37 = vld [vmem:[#allocation2 + $0x17f] sm:$0xff]  ;;  %18845 = vst [vmem:[#allocation18_spill] sm:$0xff] %v17434_v3  ;;  %18847 = vst [vmem:[#allocation20_spill] sm:$0xff] %v17452_v7 }
 0x44f   : > { %18844 = vst [vmem:[#allocation17_spill] sm:$0xff] %v17248_v60  ;;  %13839 = vmatmul.mubr.msk.f32.gmra.mrb[22].mxu1 %vm279_vm0, %v17248_v60  ;;  %v17422_v60 = vld [vmem:[#allocation2 + $0x16f] sm:$0xff]  ;;  %v6650_v61 = vld [vmem:[#allocation2 + $0x19] sm:$0xff]  ;;  %v6651_v29 = vld [vmem:[#allocation2 + $0x21] sm:$0xff] }
 0x450   : > { %13843 = vmatprep.mubr.msk.f32.mxu1 %vm279_vm0, %v5653_v63  ;;  %v17402_v63 = vld [vmem:[#allocation2 + $0x147] sm:$0xff]  ;;  %v17438_v19 = vld [vmem:[#allocation2 + $0x18f] sm:$0xff] }
 0x451   : > { %18846 = vst [vmem:[#allocation19_spill] sm:$0xff] %v17438_v19  ;;  %v6652_v10 = vld [vmem:[#allocation2 + $0x29] sm:$0xff] }
 0x453   : > { %13844 = vmatmul.mubr.msk.f32.vlgmr.msra.gmra.mrb[24].mxu1 %vm279_vm0, %v5654_v51  ;;  %v17406_v51 = vld [vmem:[#allocation2 + $0x14f] sm:$0xff] }
 0x454   : > { %13916 = vmatpush3.msra.mxu1 %v17098_v53  ;;  %13846 = vmatprep.mubr.msk.f32.mxu1 %vm279_vm0, %v5655_v15  ;;  %v17274_v53 = vld [vmem:[#allocation2 + $0x47] sm:$0xff]  ;;  %v17410_v15 = vld [vmem:[#allocation2 + $0x157] sm:$0xff] }
 0x455   : > { %13989 = vmatprep.subr.mxu1 %v17256_v23 }
 0x457   : > { %13847 = vmatmul.mubr.msk.f32.gmra.mrb[26].mxu1 %vm279_vm0, %v17262_v54 }
 0x458   : > { %13849 = vmatprep.mubr.msk.f32.mxu1 %vm279_vm0, %v17266_v56 }
 0x45b   : > { %13850 = vmatmul.mubr.msk.f32.gmra.mrb[28].mxu1 %vm279_vm0, %v17270_v18 }
 0x45c   : > { %13852 = vmatprep.mubr.msk.f32.mxu1 %vm279_vm0, %v17274_v53 }
 0x45f   : > { %13853 = vmatmul.mubr.msk.f32.gmra.mrb[30].mxu1 %vm279_vm0, %v17278_v1 }
 0x460   : > { %13855 = vmatprep.mubr.msk.f32.mxu1 %vm279_vm0, %v17282_v62 }
 0x463   : > { %13856 = vmatmul.mubr.msk.f32.gmra.mrb[32].mxu1 %vm279_vm0, %v17286_v47 }
 0x464   : > { %13858 = vmatprep.mubr.msk.f32.mxu1 %vm279_vm0, %v17290_v48 }
 0x467   : > { %13859 = vmatmul.mubr.msk.f32.gmra.mrb[34].mxu1 %vm279_vm0, %v17294_v13 }
 0x468   : > { %13861 = vmatprep.mubr.msk.f32.mxu1 %vm279_vm0, %v17298_v9 }
 0x46b   : > { %13862 = vmatmul.mubr.msk.f32.gmra.mrb[36].mxu1 %vm279_vm0, %v17302_v55 }
 0x46c   : > { %13864 = vmatprep.mubr.msk.f32.mxu1 %vm279_vm0, %v17306_v17 }
 0x46f   : > { %13865 = vmatmul.mubr.msk.f32.gmra.mrb[38].mxu1 %vm279_vm0, %v17310_v11 }
 0x470   : > { %13867 = vmatprep.mubr.msk.f32.mxu1 %vm279_vm0, %v17314_v2 }
 0x473   : > { %13868 = vmatmul.mubr.msk.f32.gmra.mrb[40].mxu1 %vm279_vm0, %v17318_v0 }
 0x474   : > { %13870 = vmatprep.mubr.msk.f32.mxu1 %vm279_vm0, %v17322_v50 }
 0x477   : > { %13871 = vmatmul.mubr.msk.f32.gmra.mrb[42].mxu1 %vm279_vm0, %v17326_v46 }
 0x478   : > { %13873 = vmatprep.mubr.msk.f32.mxu1 %vm279_vm0, %v17330_v28 }
 0x47b   : > { %13874 = vmatmul.mubr.msk.f32.gmra.mrb[44].mxu1 %vm279_vm0, %v17334_v41 }
 0x47c   : > { %13876 = vmatprep.mubr.msk.f32.mxu1 %vm279_vm0, %v17338_v26 }
 0x47f   : > { %13877 = vmatmul.mubr.msk.f32.gmra.mrb[46].mxu1 %vm279_vm0, %v17342_v24 }
 0x480   : > { %13879 = vmatprep.mubr.msk.f32.mxu1 %vm279_vm0, %v17346_v4 }
 0x483   : > { %13880 = vmatmul.mubr.msk.f32.gmra.mrb[0].mxu1 %vm279_vm0, %v17350_v33 }
 0x484   : > { %13882 = vmatprep.mubr.msk.f32.mxu1 %vm279_vm0, %v17354_v59 }
 0x487   : > { %13883 = vmatmul.mubr.msk.f32.gmra.mrb[2].mxu1 %vm279_vm0, %v17358_v49 }
 0x488   : > { %13885 = vmatprep.mubr.msk.f32.mxu1 %vm279_vm0, %v17362_v31 }
 0x48b   : > { %13886 = vmatmul.mubr.msk.f32.gmra.mrb[4].mxu1 %vm279_vm0, %v17366_v43 }
 0x48c   : > { %13888 = vmatprep.mubr.msk.f32.mxu1 %vm279_vm0, %v17370_v32 }
 0x48f   : > { %13889 = vmatmul.mubr.msk.f32.gmra.mrb[6].mxu1 %vm279_vm0, %v17374_v34 }
 0x490   : > { %13891 = vmatprep.mubr.msk.f32.mxu1 %vm279_vm0, %v17378_v35 }
 0x493   : > { %13892 = vmatmul.mubr.msk.f32.gmra.mrb[8].mxu1 %vm279_vm0, %v17382_v36 }
 0x494   : > { %13894 = vmatprep.mubr.msk.f32.mxu1 %vm279_vm0, %v17386_v58 }
 0x497   : > { %13895 = vmatmul.mubr.msk.f32.gmra.mrb[10].mxu1 %vm279_vm0, %v17390_v38 }
 0x498   : > { %13897 = vmatprep.mubr.msk.f32.mxu1 %vm279_vm0, %v17394_v42 }
 0x49b   : > { %13898 = vmatmul.mubr.msk.f32.gmra.mrb[12].mxu1 %vm279_vm0, %v17398_v39 }
 0x49c   : > { %13900 = vmatprep.mubr.msk.f32.mxu1 %vm279_vm0, %v17402_v63 }
 0x49f   : > { %13901 = vmatmul.mubr.msk.f32.gmra.mrb[14].mxu1 %vm279_vm0, %v17406_v51 }
 0x4a0   : > { %13903 = vmatprep.mubr.msk.f32.mxu1 %vm279_vm0, %v17410_v15 }
 0x4a3   : > { %13904 = vmatmul.mubr.msk.f32.gmra.mrb[16].mxu1 %vm279_vm0, %v17414_v20 }
 0x4a4   : > { %13906 = vmatprep.mubr.msk.f32.mxu1 %vm279_vm0, %v17418_v45 }
 0x4a7   : > { %13907 = vmatmul.mubr.msk.f32.gmra.mrb[18].mxu1 %vm279_vm0, %v17422_v60 }
 0x4a8   : > { %13909 = vmatprep.mubr.msk.f32.mxu1 %vm279_vm0, %v17426_v21 }
 0x4ab   : > { %13910 = vmatmul.mubr.msk.f32.gmra.mrb[20].mxu1 %vm279_vm0, %v17430_v37 }
 0x4ac   : > { %13912 = vmatprep.mubr.msk.f32.mxu1 %vm279_vm0, %v17434_v3 }
 0x4af   : > { %13913 = vmatmul.mubr.msk.f32.gmra.mrb[22].mxu1 %vm279_vm0, %v17438_v19 }
 0x4b0   : > { %13917 = vmatprep.mubr.msk.f32.mxu1 %vm279_vm0, %v6650_v61  ;;  %v17456_v61 = vld [vmem:[#allocation2 + $0x39] sm:$0xff] }
 0x4b1   : > { %18848 = vst [vmem:[#allocation21_spill] sm:$0xff] %v17456_v61 }
 0x4b3   : > { %13918 = vmatmul.mubr.msk.f32.vlgmr.msra.gmra.mrb[24].mxu1 %vm279_vm0, %v6651_v29  ;;  %v17464_v29 = vld [vmem:[#allocation2 + $0x49] sm:$0xff] }
 0x4b4   : > { %13990 = vmatpush3.msra.mxu1 %v17256_v23  ;;  %13920 = vmatprep.mubr.msk.f32.mxu1 %vm279_vm0, %v6652_v10  ;;  %18850 = vst [vmem:[#allocation23_spill] sm:$0xff] %v17464_v29  ;;  %v17468_v10 = vld [vmem:[#allocation2 + $0x51] sm:$0xff]  ;;  %v17472_v23 = vld [vmem:[#allocation2 + $0x59] sm:$0xff] }
 0x4b5   : > { %14063 = vmatprep.subr.mxu1 %v17446_v57  ;;  %18851 = vst [vmem:[#allocation24_spill] sm:$0xff] %v17468_v10  ;;  %18852 = vst [vmem:[#allocation25_spill] sm:$0xff] %v17472_v23 }
 0x4b7   : > { %13921 = vmatmul.mubr.msk.f32.gmra.mrb[26].mxu1 %vm279_vm0, %v17452_v7  ;;  %v17494_v7 = vld [vmem:[#allocation2 + $0x81] sm:$0xff] }
 0x4b8   : > { %13923 = vmatprep.mubr.msk.f32.mxu1 %vm279_vm0, %v17456_v61  ;;  %v17476_v61 = vld [vmem:[#allocation2 + $0x61] sm:$0xff]  ;;  %18858 = vst [vmem:[#allocation31_spill] sm:$0xff] %v17494_v7 }
 0x4b9   : > { %18853 = vst [vmem:[#allocation26_spill] sm:$0xff] %v17476_v61 }
 0x4bb   : > { %13924 = vmatmul.mubr.msk.f32.gmra.mrb[28].mxu1 %vm279_vm0, %v17460_v6  ;;  %v17480_v6 = vld [vmem:[#allocation2 + $0x69] sm:$0xff] }
 0x4bc   : > { %13926 = vmatprep.mubr.msk.f32.mxu1 %vm279_vm0, %v17464_v29  ;;  %18854 = vst [vmem:[#allocation27_spill] sm:$0xff] %v17480_v6  ;;  %v17484_v29 = vld [vmem:[#allocation2 + $0x71] sm:$0xff] }
 0x4bd   : > { %18855 = vst [vmem:[#allocation28_spill] sm:$0xff] %v17484_v29 }
 0x4bf   : > { %13927 = vmatmul.mubr.msk.f32.gmra.mrb[30].mxu1 %vm279_vm0, %v17468_v10  ;;  %v17488_v10 = vld [vmem:[#allocation2 + $0x79] sm:$0xff] }
 0x4c0   : > { %13929 = vmatprep.mubr.msk.f32.mxu1 %vm279_vm0, %v17472_v23  ;;  %18856 = vst [vmem:[#allocation29_spill] sm:$0xff] %v17488_v10 }
 0x4c3   : > { %13930 = vmatmul.mubr.msk.f32.gmra.mrb[32].mxu1 %vm279_vm0, %v17476_v61 }
 0x4c4   : > { %13932 = vmatprep.mubr.msk.f32.mxu1 %vm279_vm0, %v17480_v6  ;;  %v17500_v6 = vld [vmem:[#allocation2 + $0x89] sm:$0xff] }
 0x4c5   : > { %18860 = vst [vmem:[#allocation33_spill] sm:$0xff] %v17500_v6 }
 0x4c7   : > { %13933 = vmatmul.mubr.msk.f32.gmra.mrb[34].mxu1 %vm279_vm0, %v17484_v29 }
 0x4c8   : > { %13935 = vmatprep.mubr.msk.f32.mxu1 %vm279_vm0, %v17488_v10 }
 0x4ca   : > { %v17492_v23 = vpop.f32.mrb[50].mxu0 }
 0x4cb   : > { %18857 = vst [vmem:[#allocation30_spill] sm:$0xff] %v17492_v23  ;;  %v17496_v61 = vpop.f32.mrb[51].mxu0  ;;  %13936 = vmatmul.mubr.msk.f32.gmra.mrb[36].mxu1 %vm279_vm0, %v17494_v7  ;;  %v17512_v23 = vld [vmem:[#allocation2 + $0x99] sm:$0xff]  ;;  %v17518_v7 = vld [vmem:[#allocation2 + $0xa1] sm:$0xff] }
 0x4cc   : > { %18859 = vst [vmem:[#allocation32_spill] sm:$0xff] %v17496_v61  ;;  %13938 = vmatprep.mubr.msk.f32.mxu1 %vm279_vm0, %v17500_v6  ;;  %18864 = vst [vmem:[#allocation37_spill] sm:$0xff] %v17512_v23 }
 0x4cd   : > { %18866 = vst [vmem:[#allocation39_spill] sm:$0xff] %v17518_v7 }
 0x4ce   : > { %v17504_v29 = vpop.f32.mrb[52].mxu0 }
 0x4cf   : > { %18861 = vst [vmem:[#allocation34_spill] sm:$0xff] %v17504_v29  ;;  %v17508_v40 = vpop.f32.mrb[53].mxu0  ;;  %13939 = vmatmul.mubr.msk.f32.gmra.mrb[38].mxu1 %vm279_vm0, %v17506_v5  ;;  %v17524_v29 = vld [vmem:[#allocation2 + $0xa9] sm:$0xff]  ;;  %v17530_v5 = vld [vmem:[#allocation2 + $0xb1] sm:$0xff] }
 0x4d0   : > { %18863 = vst [vmem:[#allocation36_spill] sm:$0xff] %v17508_v40  ;;  %13941 = vmatprep.mubr.msk.f32.mxu1 %vm279_vm0, %v17512_v23  ;;  %18868 = vst [vmem:[#allocation41_spill] sm:$0xff] %v17524_v29 }
 0x4d1   : > { %18870 = vst [vmem:[#allocation43_spill] sm:$0xff] %v17530_v5 }
 0x4d2   : > { %v17516_v61 = vpop.f32.mrb[54].mxu0 }
 0x4d3   : > { %18865 = vst [vmem:[#allocation38_spill] sm:$0xff] %v17516_v61  ;;  %v17520_v10 = vpop.f32.mrb[55].mxu0  ;;  %13942 = vmatmul.mubr.msk.f32.gmra.mrb[40].mxu1 %vm279_vm0, %v17518_v7  ;;  %v17536_v61 = vld [vmem:[#allocation2 + $0xb9] sm:$0xff]  ;;  %v17542_v7 = vld [vmem:[#allocation2 + $0xc1] sm:$0xff] }
 0x4d4   : > { %18867 = vst [vmem:[#allocation40_spill] sm:$0xff] %v17520_v10  ;;  %13944 = vmatprep.mubr.msk.f32.mxu1 %vm279_vm0, %v17524_v29  ;;  %18872 = vst [vmem:[#allocation45_spill] sm:$0xff] %v17536_v61 }
 0x4d5   : > { %18874 = vst [vmem:[#allocation47_spill] sm:$0xff] %v17542_v7 }
 0x4d6   : > { %v17528_v40 = vpop.f32.mrb[56].mxu0 }
 0x4d7   : > { %18869 = vst [vmem:[#allocation42_spill] sm:$0xff] %v17528_v40  ;;  %v17532_v6 = vpop.f32.mrb[57].mxu0  ;;  %13945 = vmatmul.mubr.msk.f32.gmra.mrb[42].mxu1 %vm279_vm0, %v17530_v5  ;;  %v17548_v40 = vld [vmem:[#allocation2 + $0xc9] sm:$0xff]  ;;  %v17554_v5 = vld [vmem:[#allocation2 + $0xd1] sm:$0xff] }
 0x4d8   : > { %18871 = vst [vmem:[#allocation44_spill] sm:$0xff] %v17532_v6  ;;  %13947 = vmatprep.mubr.msk.f32.mxu1 %vm279_vm0, %v17536_v61  ;;  %18876 = vst [vmem:[#allocation49_spill] sm:$0xff] %v17548_v40 }
 0x4d9   : > { %18878 = vst [vmem:[#allocation51_spill] sm:$0xff] %v17554_v5 }
 0x4da   : > { %v17540_v10 = vpop.f32.mrb[58].mxu0 }
 0x4db   : > { %18873 = vst [vmem:[#allocation46_spill] sm:$0xff] %v17540_v10  ;;  %v17544_v23 = vpop.f32.mrb[59].mxu0  ;;  %13948 = vmatmul.mubr.msk.f32.gmra.mrb[44].mxu1 %vm279_vm0, %v17542_v7  ;;  %v17560_v10 = vld [vmem:[#allocation2 + $0xd9] sm:$0xff]  ;;  %v17566_v7 = vld [vmem:[#allocation2 + $0xe1] sm:$0xff] }
 0x4dc   : > { %18875 = vst [vmem:[#allocation48_spill] sm:$0xff] %v17544_v23  ;;  %13950 = vmatprep.mubr.msk.f32.mxu1 %vm279_vm0, %v17548_v40  ;;  %18880 = vst [vmem:[#allocation53_spill] sm:$0xff] %v17560_v10 }
 0x4dd   : > { %18882 = vst [vmem:[#allocation55_spill] sm:$0xff] %v17566_v7 }
 0x4de   : > { %v17552_v6 = vpop.f32.mrb[60].mxu0 }
 0x4df   : > { %18877 = vst [vmem:[#allocation50_spill] sm:$0xff] %v17552_v6  ;;  %v17556_v29 = vpop.f32.mrb[61].mxu0  ;;  %13951 = vmatmul.mubr.msk.f32.gmra.mrb[46].mxu1 %vm279_vm0, %v17554_v5  ;;  %v17572_v6 = vld [vmem:[#allocation2 + $0xe9] sm:$0xff]  ;;  %v17578_v5 = vld [vmem:[#allocation2 + $0xf1] sm:$0xff] }
 0x4e0   : > { %18879 = vst [vmem:[#allocation52_spill] sm:$0xff] %v17556_v29  ;;  %13953 = vmatprep.mubr.msk.f32.mxu1 %vm279_vm0, %v17560_v10  ;;  %18884 = vst [vmem:[#allocation57_spill] sm:$0xff] %v17572_v6 }
 0x4e1   : > { %18886 = vst [vmem:[#allocation59_spill] sm:$0xff] %v17578_v5 }
 0x4e2   : > { %v17564_v23 = vpop.f32.mrb[62].mxu0 }
 0x4e3   : > { %18881 = vst [vmem:[#allocation54_spill] sm:$0xff] %v17564_v23  ;;  %v17568_v61 = vpop.f32.mrb[63].mxu0  ;;  %13954 = vmatmul.mubr.msk.f32.gmra.mrb[0].mxu1 %vm279_vm0, %v17566_v7  ;;  %v17584_v23 = vld [vmem:[#allocation2 + $0xf9] sm:$0xff]  ;;  %v17590_v7 = vld [vmem:[#allocation2 + $0x101] sm:$0xff] }
 0x4e4   : > { %18883 = vst [vmem:[#allocation56_spill] sm:$0xff] %v17568_v61  ;;  %13956 = vmatprep.mubr.msk.f32.mxu1 %vm279_vm0, %v17572_v6  ;;  %18888 = vst [vmem:[#allocation61_spill] sm:$0xff] %v17584_v23 }
 0x4e5   : > { %18890 = vst [vmem:[#allocation63_spill] sm:$0xff] %v17590_v7 }
 0x4e6   : > { %v17576_v29 = vpop.f32.mrb[64].mxu0 }
 0x4e7   : > { %18885 = vst [vmem:[#allocation58_spill] sm:$0xff] %v17576_v29  ;;  %v17580_v40 = vpop.f32.mrb[65].mxu0  ;;  %13957 = vmatmul.mubr.msk.f32.gmra.mrb[2].mxu1 %vm279_vm0, %v17578_v5  ;;  %v17596_v29 = vld [vmem:[#allocation2 + $0x109] sm:$0xff]  ;;  %v17602_v5 = vld [vmem:[#allocation2 + $0x111] sm:$0xff] }
 0x4e8   : > { %18887 = vst [vmem:[#allocation60_spill] sm:$0xff] %v17580_v40  ;;  %13959 = vmatprep.mubr.msk.f32.mxu1 %vm279_vm0, %v17584_v23 }
 0x4ea   : > { %v17588_v61 = vpop.f32.mrb[66].mxu0 }
 0x4eb   : > { %18889 = vst [vmem:[#allocation62_spill] sm:$0xff] %v17588_v61  ;;  %v17592_v10 = vpop.f32.mrb[67].mxu0  ;;  %13960 = vmatmul.mubr.msk.f32.gmra.mrb[4].mxu1 %vm279_vm0, %v17590_v7  ;;  %v17608_v61 = vld [vmem:[#allocation2 + $0x119] sm:$0xff]  ;;  %v17614_v7 = vld [vmem:[#allocation2 + $0x121] sm:$0xff] }
 0x4ec   : > { %18891 = vst [vmem:[#allocation64_spill] sm:$0xff] %v17592_v10  ;;  %13962 = vmatprep.mubr.msk.f32.mxu1 %vm279_vm0, %v17596_v29  ;;  %18894 = vst [vmem:[#allocation67_spill] sm:$0xff] %v17608_v61 }
 0x4ee   : > { %v17600_v40 = vpop.f32.mrb[68].mxu0 }
 0x4ef   : > { %18892 = vst [vmem:[#allocation65_spill] sm:$0xff] %v17600_v40  ;;  %v17604_v6 = vpop.f32.mrb[69].mxu0  ;;  %13963 = vmatmul.mubr.msk.f32.gmra.mrb[6].mxu1 %vm279_vm0, %v17602_v5  ;;  %v17620_v40 = vld [vmem:[#allocation2 + $0x129] sm:$0xff] }
 0x4f0   : > { %18893 = vst [vmem:[#allocation66_spill] sm:$0xff] %v17604_v6  ;;  %13965 = vmatprep.mubr.msk.f32.mxu1 %vm279_vm0, %v17608_v61  ;;  %18897 = vst [vmem:[#allocation70_spill] sm:$0xff] %v17620_v40  ;;  %v17624_v6 = vld [vmem:[#allocation2 + $0x131] sm:$0xff]  ;;  %v17628_v61 = vld [vmem:[#allocation2 + $0x139] sm:$0xff] }
 0x4f1   : > { %18898 = vst [vmem:[#allocation71_spill] sm:$0xff] %v17624_v6  ;;  %18899 = vst [vmem:[#allocation72_spill] sm:$0xff] %v17628_v61 }
 0x4f2   : > { %v17612_v10 = vpop.f32.mrb[70].mxu0 }
 0x4f3   : > { %18895 = vst [vmem:[#allocation68_spill] sm:$0xff] %v17612_v10  ;;  %v17616_v23 = vpop.f32.mrb[71].mxu0  ;;  %13966 = vmatmul.mubr.msk.f32.gmra.mrb[8].mxu1 %vm279_vm0, %v17614_v7  ;;  %v17632_v10 = vld [vmem:[#allocation2 + $0x141] sm:$0xff] }
 0x4f4   : > { %18896 = vst [vmem:[#allocation69_spill] sm:$0xff] %v17616_v23  ;;  %13968 = vmatprep.mubr.msk.f32.mxu1 %vm279_vm0, %v17620_v40  ;;  %18900 = vst [vmem:[#allocation73_spill] sm:$0xff] %v17632_v10  ;;  %v17636_v23 = vld [vmem:[#allocation2 + $0x149] sm:$0xff]  ;;  %v17640_v40 = vld [vmem:[#allocation2 + $0x151] sm:$0xff] }
 0x4f5   : > { %18901 = vst [vmem:[#allocation74_spill] sm:$0xff] %v17636_v23  ;;  %18902 = vst [vmem:[#allocation75_spill] sm:$0xff] %v17640_v40 }
 0x4f7   : > { %13969 = vmatmul.mubr.msk.f32.gmra.mrb[10].mxu1 %vm279_vm0, %v17624_v6  ;;  %v17644_v6 = vld [vmem:[#allocation2 + $0x159] sm:$0xff] }
 0x4f8   : > { %13971 = vmatprep.mubr.msk.f32.mxu1 %vm279_vm0, %v17628_v61  ;;  %18903 = vst [vmem:[#allocation76_spill] sm:$0xff] %v17644_v6  ;;  %v17648_v61 = vld [vmem:[#allocation2 + $0x161] sm:$0xff] }
 0x4f9   : > { %18904 = vst [vmem:[#allocation77_spill] sm:$0xff] %v17648_v61 }
 0x4fb   : > { %13972 = vmatmul.mubr.msk.f32.gmra.mrb[12].mxu1 %vm279_vm0, %v17632_v10  ;;  %v17652_v10 = vld [vmem:[#allocation2 + $0x169] sm:$0xff] }
 0x4fc   : > { %13974 = vmatprep.mubr.msk.f32.mxu1 %vm279_vm0, %v17636_v23  ;;  %18905 = vst [vmem:[#allocation78_spill] sm:$0xff] %v17652_v10  ;;  %v17656_v23 = vld [vmem:[#allocation2 + $0x171] sm:$0xff] }
 0x4ff   : > { %13975 = vmatmul.mubr.msk.f32.gmra.mrb[14].mxu1 %vm279_vm0, %v17640_v40  ;;  %v17660_v40 = vld [vmem:[#allocation2 + $0x179] sm:$0xff] }
 0x500   : > { %13977 = vmatprep.mubr.msk.f32.mxu1 %vm279_vm0, %v17644_v6  ;;  %18906 = vst [vmem:[#allocation79_spill] sm:$0xff] %v17660_v40  ;;  %v17664_v6 = vld [vmem:[#allocation2 + $0x181] sm:$0xff] }
 0x503   : > { %13978 = vmatmul.mubr.msk.f32.gmra.mrb[16].mxu1 %vm279_vm0, %v17648_v61  ;;  %v17668_v61 = vld [vmem:[#allocation2 + $0x189] sm:$0xff] }
 0x504   : > { %13980 = vmatprep.mubr.msk.f32.mxu1 %vm279_vm0, %v17652_v10  ;;  %v17672_v10 = vld [vmem:[#allocation2 + $0x191] sm:$0xff] }
 0x507   : > { %13981 = vmatmul.mubr.msk.f32.gmra.mrb[18].mxu1 %vm279_vm0, %v17656_v23 }
 0x508   : > { %13983 = vmatprep.mubr.msk.f32.mxu1 %vm279_vm0, %v17660_v40  ;;  %v11923_v40 = vld [vmem:[%s18536_s3 + $0x28] sm:$0xff] }
 0x50b   : > { %13984 = vmatmul.mubr.msk.f32.gmra.mrb[20].mxu1 %vm279_vm0, %v17664_v6 }
 0x50c   : > { %13986 = vmatprep.mubr.msk.f32.mxu1 %vm279_vm0, %v17668_v61 }
 0x50f   : > { %13987 = vmatmul.mubr.msk.f32.gmra.mrb[22].mxu1 %vm279_vm0, %v17672_v10 }
 0x510   : > { %13991 = vmatprep.mubr.msk.f32.mxu1 %vm279_vm0, %v17262_v54  ;;  %v17774_v54 = vld [vmem:[#allocation2 + $0x19f] sm:$0xff] }
 0x511   : > { %18908 = vst [vmem:[#allocation81_spill] sm:$0xff] %v17774_v54 }
 0x513   : > { %13992 = vmatmul.mubr.msk.f32.vlgmr.msra.gmra.mrb[24].mxu1 %vm279_vm0, %v17266_v56  ;;  %v17778_v56 = vld [vmem:[#allocation2 + $0x1a7] sm:$0xff] }
 0x514   : > { %14064 = vmatpush3.msra.mxu1 %v17446_v57  ;;  %13994 = vmatprep.mubr.msk.f32.mxu1 %vm279_vm0, %v17270_v18  ;;  %v17770_v57 = vld [vmem:[#allocation2 + $0x197] sm:$0xff]  ;;  %18909 = vst [vmem:[#allocation82_spill] sm:$0xff] %v17778_v56 }
 0x515   : > { %14137 = vmatprep.subr.mxu1 %v11923_v40  ;;  %18907 = vst [vmem:[#allocation80_spill] sm:$0xff] %v17770_v57  ;;  %v7744_v18 = vld [vmem:[#allocation2 + $0x30] sm:$0xff] }
 0x517   : > { %13995 = vmatmul.mubr.msk.f32.gmra.mrb[26].mxu1 %vm279_vm0, %v17274_v53 }
 0x518   : > { %13997 = vmatprep.mubr.msk.f32.mxu1 %vm279_vm0, %v17278_v1 }
 0x51b   : > { %13998 = vmatmul.mubr.msk.f32.gmra.mrb[28].mxu1 %vm279_vm0, %v17282_v62 }
 0x51c   : > { %14000 = vmatprep.mubr.msk.f32.mxu1 %vm279_vm0, %v17286_v47 }
 0x51f   : > { %14001 = vmatmul.mubr.msk.f32.gmra.mrb[30].mxu1 %vm279_vm0, %v17290_v48 }
 0x520   : > { %14003 = vmatprep.mubr.msk.f32.mxu1 %vm279_vm0, %v17294_v13 }
 0x523   : > { %14004 = vmatmul.mubr.msk.f32.gmra.mrb[32].mxu1 %vm279_vm0, %v17298_v9 }
 0x524   : > { %14006 = vmatprep.mubr.msk.f32.mxu1 %vm279_vm0, %v17302_v55 }
 0x527   : > { %14007 = vmatmul.mubr.msk.f32.gmra.mrb[34].mxu1 %vm279_vm0, %v17306_v17 }
 0x528   : > { %14009 = vmatprep.mubr.msk.f32.mxu1 %vm279_vm0, %v17310_v11 }
 0x52b   : > { %14010 = vmatmul.mubr.msk.f32.gmra.mrb[36].mxu1 %vm279_vm0, %v17314_v2 }
 0x52c   : > { %14012 = vmatprep.mubr.msk.f32.mxu1 %vm279_vm0, %v17318_v0 }
 0x52f   : > { %14013 = vmatmul.mubr.msk.f32.gmra.mrb[38].mxu1 %vm279_vm0, %v17322_v50 }
 0x530   : > { %14015 = vmatprep.mubr.msk.f32.mxu1 %vm279_vm0, %v17326_v46 }
 0x533   : > { %14016 = vmatmul.mubr.msk.f32.gmra.mrb[40].mxu1 %vm279_vm0, %v17330_v28 }
 0x534   : > { %14018 = vmatprep.mubr.msk.f32.mxu1 %vm279_vm0, %v17334_v41 }
 0x537   : > { %14019 = vmatmul.mubr.msk.f32.gmra.mrb[42].mxu1 %vm279_vm0, %v17338_v26 }
 0x538   : > { %14021 = vmatprep.mubr.msk.f32.mxu1 %vm279_vm0, %v17342_v24 }
 0x53b   : > { %14022 = vmatmul.mubr.msk.f32.gmra.mrb[44].mxu1 %vm279_vm0, %v17346_v4 }
 0x53c   : > { %14024 = vmatprep.mubr.msk.f32.mxu1 %vm279_vm0, %v17350_v33 }
 0x53f   : > { %14025 = vmatmul.mubr.msk.f32.gmra.mrb[46].mxu1 %vm279_vm0, %v17354_v59 }
 0x540   : > { %14027 = vmatprep.mubr.msk.f32.mxu1 %vm279_vm0, %v17358_v49 }
 0x543   : > { %14028 = vmatmul.mubr.msk.f32.gmra.mrb[0].mxu1 %vm279_vm0, %v17362_v31 }
 0x544   : > { %14030 = vmatprep.mubr.msk.f32.mxu1 %vm279_vm0, %v17366_v43 }
 0x547   : > { %14031 = vmatmul.mubr.msk.f32.gmra.mrb[2].mxu1 %vm279_vm0, %v17370_v32 }
 0x548   : > { %14033 = vmatprep.mubr.msk.f32.mxu1 %vm279_vm0, %v17374_v34 }
 0x54b   : > { %14034 = vmatmul.mubr.msk.f32.gmra.mrb[4].mxu1 %vm279_vm0, %v17378_v35 }
 0x54c   : > { %14036 = vmatprep.mubr.msk.f32.mxu1 %vm279_vm0, %v17382_v36 }
 0x54f   : > { %14037 = vmatmul.mubr.msk.f32.gmra.mrb[6].mxu1 %vm279_vm0, %v17386_v58 }
 0x550   : > { %14039 = vmatprep.mubr.msk.f32.mxu1 %vm279_vm0, %v17390_v38 }
 0x553   : > { %14040 = vmatmul.mubr.msk.f32.gmra.mrb[8].mxu1 %vm279_vm0, %v17394_v42 }
 0x554   : > { %14042 = vmatprep.mubr.msk.f32.mxu1 %vm279_vm0, %v17398_v39 }
 0x557   : > { %14043 = vmatmul.mubr.msk.f32.gmra.mrb[10].mxu1 %vm279_vm0, %v17402_v63 }
 0x558   : > { %14045 = vmatprep.mubr.msk.f32.mxu1 %vm279_vm0, %v17406_v51 }
 0x55b   : > { %14046 = vmatmul.mubr.msk.f32.gmra.mrb[12].mxu1 %vm279_vm0, %v17410_v15 }
 0x55c   : > { %14048 = vmatprep.mubr.msk.f32.mxu1 %vm279_vm0, %v17414_v20 }
 0x55f   : > { %14049 = vmatmul.mubr.msk.f32.gmra.mrb[14].mxu1 %vm279_vm0, %v17418_v45 }
 0x560   : > { %14051 = vmatprep.mubr.msk.f32.mxu1 %vm279_vm0, %v17422_v60 }
 0x563   : > { %14052 = vmatmul.mubr.msk.f32.gmra.mrb[16].mxu1 %vm279_vm0, %v17426_v21 }
 0x564   : > { %14054 = vmatprep.mubr.msk.f32.mxu1 %vm279_vm0, %v17430_v37 }
 0x567   : > { %14055 = vmatmul.mubr.msk.f32.gmra.mrb[18].mxu1 %vm279_vm0, %v17434_v3  ;;  %v7745_v3 = vld [vmem:[#allocation2 + $0x38] sm:$0xff] }
 0x568   : > { %14057 = vmatprep.mubr.msk.f32.mxu1 %vm279_vm0, %v17438_v19  ;;  %v17786_v19 = vld [vmem:[%s18536_s3 + $0x30] sm:$0xff] }
 0x56b   : > { %14058 = vmatmul.mubr.msk.f32.gmra.mrb[20].mxu1 %vm279_vm0, %v17770_v57  ;;  %v7746_v57 = vld [vmem:[#allocation2 + $0x40] sm:$0xff] }
 0x56c   : > { %14060 = vmatprep.mubr.msk.f32.mxu1 %vm279_vm0, %v17774_v54  ;;  %v17791_v54 = vld [vmem:[#allocation2 + $0x48] sm:$0xff] }
 0x56f   : > { %14061 = vmatmul.mubr.msk.f32.gmra.mrb[22].mxu1 %vm279_vm0, %v17778_v56  ;;  %v17799_v56 = vld [vmem:[#allocation2 + $0x58] sm:$0xff] }
 0x570   : > { %14065 = vmatprep.mubr.msk.f32.mxu1 %vm279_vm0, %v7744_v18  ;;  %v17795_v18 = vld [vmem:[#allocation2 + $0x50] sm:$0xff]  ;;  %18911 = vst [vmem:[#allocation84_spill] sm:$0xff] %v17799_v56 }
 0x571   : > { %18910 = vst [vmem:[#allocation83_spill] sm:$0xff] %v17795_v18 }
 0x573   : > { %14066 = vmatmul.mubr.msk.f32.vlgmr.msra.gmra.mrb[24].mxu1 %vm279_vm0, %v7745_v3  ;;  %v17807_v3 = vld [vmem:[#allocation2 + $0x68] sm:$0xff] }
 0x574   : > { %14138 = vmatpush3.msra.mxu1 %v11923_v40  ;;  %14068 = vmatprep.mubr.msk.f32.mxu1 %vm279_vm0, %v7746_v57  ;;  %v17803_v40 = vld [vmem:[#allocation2 + $0x60] sm:$0xff]  ;;  %18913 = vst [vmem:[#allocation86_spill] sm:$0xff] %v17807_v3  ;;  %v17811_v57 = vld [vmem:[#allocation2 + $0x70] sm:$0xff] }
 0x575   : > { %14211 = vmatprep.subr.mxu1 %v17786_v19  ;;  %18912 = vst [vmem:[#allocation85_spill] sm:$0xff] %v17803_v40  ;;  %18914 = vst [vmem:[#allocation87_spill] sm:$0xff] %v17811_v57 }
 0x577   : > { %14069 = vmatmul.mubr.msk.f32.gmra.mrb[26].mxu1 %vm279_vm0, %v17791_v54 }
 0x578   : > { %14071 = vmatprep.mubr.msk.f32.mxu1 %vm279_vm0, %v17795_v18  ;;  %v17815_v18 = vld [vmem:[#allocation2 + $0x78] sm:$0xff] }
 0x579   : > { %18915 = vst [vmem:[#allocation88_spill] sm:$0xff] %v17815_v18 }
 0x57b   : > { %14072 = vmatmul.mubr.msk.f32.gmra.mrb[28].mxu1 %vm279_vm0, %v17799_v56  ;;  %v17819_v56 = vld [vmem:[#allocation2 + $0x80] sm:$0xff] }
 0x57c   : > { %14074 = vmatprep.mubr.msk.f32.mxu1 %vm279_vm0, %v17803_v40  ;;  %18916 = vst [vmem:[#allocation89_spill] sm:$0xff] %v17819_v56  ;;  %v17823_v40 = vld [vmem:[#allocation2 + $0x88] sm:$0xff] }
 0x57d   : > { %18917 = vst [vmem:[#allocation90_spill] sm:$0xff] %v17823_v40 }
 0x57f   : > { %14075 = vmatmul.mubr.msk.f32.gmra.mrb[30].mxu1 %vm279_vm0, %v17807_v3  ;;  %v17827_v3 = vld [vmem:[#allocation2 + $0x90] sm:$0xff] }
 0x580   : > { %14077 = vmatprep.mubr.msk.f32.mxu1 %vm279_vm0, %v17811_v57  ;;  %18918 = vst [vmem:[#allocation91_spill] sm:$0xff] %v17827_v3  ;;  %v17831_v57 = vld [vmem:[#allocation2 + $0x98] sm:$0xff] }
 0x581   : > { %18919 = vst [vmem:[#allocation92_spill] sm:$0xff] %v17831_v57 }
 0x583   : > { %14078 = vmatmul.mubr.msk.f32.gmra.mrb[32].mxu1 %vm279_vm0, %v17815_v18  ;;  %v17835_v18 = vld [vmem:[#allocation2 + $0xa0] sm:$0xff] }
 0x584   : > { %14080 = vmatprep.mubr.msk.f32.mxu1 %vm279_vm0, %v17819_v56  ;;  %18920 = vst [vmem:[#allocation93_spill] sm:$0xff] %v17835_v18  ;;  %v17839_v56 = vld [vmem:[#allocation2 + $0xa8] sm:$0xff] }
 0x585   : > { %18921 = vst [vmem:[#allocation94_spill] sm:$0xff] %v17839_v56 }
 0x587   : > { %14081 = vmatmul.mubr.msk.f32.gmra.mrb[34].mxu1 %vm279_vm0, %v17823_v40  ;;  %v17843_v40 = vld [vmem:[#allocation2 + $0xb0] sm:$0xff] }
 0x588   : > { %14083 = vmatprep.mubr.msk.f32.mxu1 %vm279_vm0, %v17827_v3  ;;  %18922 = vst [vmem:[#allocation95_spill] sm:$0xff] %v17843_v40  ;;  %v17847_v3 = vld [vmem:[#allocation2 + $0xb8] sm:$0xff] }
 0x58b   : > { %14084 = vmatmul.mubr.msk.f32.gmra.mrb[36].mxu1 %vm279_vm0, %v17831_v57  ;;  %v17851_v57 = vld [vmem:[#allocation2 + $0xc0] sm:$0xff] }
 0x58c   : > { %14086 = vmatprep.mubr.msk.f32.mxu1 %vm279_vm0, %v17835_v18  ;;  %v17855_v18 = vld [vmem:[#allocation2 + $0xc8] sm:$0xff] }
 0x58f   : > { %14087 = vmatmul.mubr.msk.f32.gmra.mrb[38].mxu1 %vm279_vm0, %v17839_v56  ;;  %v17859_v56 = vld [vmem:[#allocation2 + $0xd0] sm:$0xff] }
 0x590   : > { %14089 = vmatprep.mubr.msk.f32.mxu1 %vm279_vm0, %v17843_v40  ;;  %v17863_v40 = vld [vmem:[#allocation2 + $0xd8] sm:$0xff] }
 0x593   : > { %14090 = vmatmul.mubr.msk.f32.gmra.mrb[40].mxu1 %vm279_vm0, %v17847_v3 }
 0x594   : > { %14092 = vmatprep.mubr.msk.f32.mxu1 %vm279_vm0, %v17851_v57 }
 0x597   : > { %14093 = vmatmul.mubr.msk.f32.gmra.mrb[42].mxu1 %vm279_vm0, %v17855_v18 }
 0x598   : > { %14095 = vmatprep.mubr.msk.f32.mxu1 %vm279_vm0, %v17859_v56 }
 0x59b   : > { %14096 = vmatmul.mubr.msk.f32.gmra.mrb[44].mxu1 %vm279_vm0, %v17863_v40 }
 0x59c   : > { %14098 = vmatprep.mubr.msk.f32.mxu1 %vm279_vm0, %v17093_v52  ;;  %v18923_v52 = vld [vmem:[#allocation3_spill] sm:$0xff] }
 0x59f   : > { %14099 = vmatmul.mubr.msk.f32.gmra.mrb[46].mxu1 %vm279_vm0, %v17103_v44  ;;  %v18924_v44 = vld [vmem:[#allocation4_spill] sm:$0xff] }
 0x5a0   : > { %14101 = vmatprep.mubr.msk.f32.mxu1 %vm279_vm0, %v17114_v8  ;;  %v18925_v8 = vld [vmem:[#allocation5_spill] sm:$0xff] }
 0x5a3   : > { %14102 = vmatmul.mubr.msk.f32.gmra.mrb[0].mxu1 %vm279_vm0, %v17119_v14  ;;  %v18926_v14 = vld [vmem:[#allocation6_spill] sm:$0xff] }
 0x5a4   : > { %14104 = vmatprep.mubr.msk.f32.mxu1 %vm279_vm0, %v17128_v12  ;;  %v18927_v12 = vld [vmem:[#allocation7_spill] sm:$0xff] }
 0x5a7   : > { %14105 = vmatmul.mubr.msk.f32.gmra.mrb[2].mxu1 %vm279_vm0, %v17133_v27  ;;  %v18928_v27 = vld [vmem:[#allocation8_spill] sm:$0xff] }
 0x5a8   : > { %14107 = vmatprep.mubr.msk.f32.mxu1 %vm279_vm0, %v17142_v30  ;;  %v18929_v30 = vld [vmem:[#allocation9_spill] sm:$0xff] }
 0x5ab   : > { %14108 = vmatmul.mubr.msk.f32.gmra.mrb[4].mxu1 %vm279_vm0, %v17147_v25  ;;  %v18930_v25 = vld [vmem:[#allocation10_spill] sm:$0xff] }
 0x5ac   : > { %14110 = vmatprep.mubr.msk.f32.mxu1 %vm279_vm0, %v17156_v16  ;;  %v18931_v16 = vld [vmem:[#allocation11_spill] sm:$0xff] }
 0x5af   : > { %14111 = vmatmul.mubr.msk.f32.gmra.mrb[6].mxu1 %vm279_vm0, %v17161_v22  ;;  %v18932_v22 = vld [vmem:[#allocation12_spill] sm:$0xff] }
 0x5b0   : > { %14113 = vmatprep.mubr.msk.f32.mxu1 %vm279_vm0, %v18923_v52  ;;  %v18933_v52 = vld [vmem:[#allocation15_spill] sm:$0xff] }
 0x5b3   : > { %14114 = vmatmul.mubr.msk.f32.gmra.mrb[8].mxu1 %vm279_vm0, %v18924_v44  ;;  %v18934_v44 = vld [vmem:[#allocation16_spill] sm:$0xff] }
 0x5b4   : > { %14116 = vmatprep.mubr.msk.f32.mxu1 %vm279_vm0, %v18925_v8  ;;  %v18935_v8 = vld [vmem:[#allocation17_spill] sm:$0xff] }
 0x5b7   : > { %14117 = vmatmul.mubr.msk.f32.gmra.mrb[10].mxu1 %vm279_vm0, %v18926_v14  ;;  %v17913_v14 = vld [vmem:[#allocation2 + $0x198] sm:$0xff] }
 0x5b8   : > { %14119 = vmatprep.mubr.msk.f32.mxu1 %vm279_vm0, %v18927_v12  ;;  %v17917_v12 = vld [vmem:[#allocation2 + $0x1a0] sm:$0xff] }
 0x5bb   : > { %14120 = vmatmul.mubr.msk.f32.gmra.mrb[12].mxu1 %vm279_vm0, %v18928_v27  ;;  %v17921_v27 = vld [vmem:[#allocation2 + $0x1a8] sm:$0xff] }
 0x5bc   : > { %14122 = vmatprep.mubr.msk.f32.mxu1 %vm279_vm0, %v18929_v30  ;;  %18936 = vst [vmem:[#allocation3_spill] sm:$0xff] %v17921_v27  ;;  %v18937_v30 = vld [vmem:[#allocation20_spill] sm:$0xff] }
 0x5bf   : > { %14123 = vmatmul.mubr.msk.f32.gmra.mrb[14].mxu1 %vm279_vm0, %v18930_v25  ;;  %v12021_v25 = vld [vmem:[%s18536_s3 + $0x38] sm:$0xff] }
 0x5c0   : > { %14125 = vmatprep.mubr.msk.f32.mxu1 %vm279_vm0, %v18931_v16  ;;  %v18938_v16 = vld [vmem:[#allocation21_spill] sm:$0xff] }
 0x5c3   : > { %14126 = vmatmul.mubr.msk.f32.gmra.mrb[16].mxu1 %vm279_vm0, %v18932_v22  ;;  %v18939_v22 = vld [vmem:[#allocation22_spill] sm:$0xff] }
 0x5c4   : > { %14128 = vmatprep.mubr.msk.f32.mxu1 %vm279_vm0, %v18933_v52  ;;  %v18940_v52 = vld [vmem:[#allocation23_spill] sm:$0xff] }
 0x5c7   : > { %14129 = vmatmul.mubr.msk.f32.gmra.mrb[18].mxu1 %vm279_vm0, %v18934_v44  ;;  %v18941_v44 = vld [vmem:[#allocation24_spill] sm:$0xff] }
 0x5c8   : > { %14131 = vmatprep.mubr.msk.f32.mxu1 %vm279_vm0, %v18935_v8  ;;  %v18942_v8 = vld [vmem:[#allocation25_spill] sm:$0xff] }
 0x5cb   : > { %14132 = vmatmul.mubr.msk.f32.gmra.mrb[20].mxu1 %vm279_vm0, %v17913_v14 }
 0x5cc   : > { %14134 = vmatprep.mubr.msk.f32.mxu1 %vm279_vm0, %v17917_v12 }
 0x5cf   : > { %14135 = vmatmul.mubr.msk.f32.gmra.mrb[22].mxu1 %vm279_vm0, %v17921_v27  ;;  %v18944_v27 = vld [vmem:[#allocation27_spill] sm:$0xff] }
 0x5d0   : > { %14139 = vmatprep.mubr.msk.f32.mxu1 %vm279_vm0, %v18937_v30  ;;  %v18943_v30 = vld [vmem:[#allocation26_spill] sm:$0xff] }
 0x5d3   : > { %14140 = vmatmul.mubr.msk.f32.vlgmr.msra.gmra.mrb[24].mxu1 %vm279_vm0, %v18938_v16  ;;  %v18946_v16 = vld [vmem:[#allocation29_spill] sm:$0xff] }
 0x5d4   : > { %14212 = vmatpush3.msra.mxu1 %v17786_v19  ;;  %14142 = vmatprep.mubr.msk.f32.mxu1 %vm279_vm0, %v18939_v22  ;;  %v18945_v19 = vld [vmem:[#allocation28_spill] sm:$0xff]  ;;  %v18947_v22 = vld [vmem:[#allocation31_spill] sm:$0xff] }
 0x5d5   : > { %14285 = vmatprep.subr.mxu1 %v12021_v25 }
 0x5d7   : > { %14143 = vmatmul.mubr.msk.f32.gmra.mrb[26].mxu1 %vm279_vm0, %v18940_v52  ;;  %v18948_v52 = vld [vmem:[#allocation33_spill] sm:$0xff] }
 0x5d8   : > { %14145 = vmatprep.mubr.msk.f32.mxu1 %vm279_vm0, %v18941_v44  ;;  %v18949_v44 = vld [vmem:[#allocation35_spill] sm:$0xff] }
 0x5db   : > { %14146 = vmatmul.mubr.msk.f32.gmra.mrb[28].mxu1 %vm279_vm0, %v18942_v8  ;;  %v18950_v8 = vld [vmem:[#allocation37_spill] sm:$0xff] }
 0x5dc   : > { %14148 = vmatprep.mubr.msk.f32.mxu1 %vm279_vm0, %v18943_v30  ;;  %v18951_v30 = vld [vmem:[#allocation39_spill] sm:$0xff] }
 0x5df   : > { %14149 = vmatmul.mubr.msk.f32.gmra.mrb[30].mxu1 %vm279_vm0, %v18944_v27  ;;  %v18952_v27 = vld [vmem:[#allocation41_spill] sm:$0xff] }
 0x5e0   : > { %14151 = vmatprep.mubr.msk.f32.mxu1 %vm279_vm0, %v18945_v19  ;;  %v18953_v19 = vld [vmem:[#allocation43_spill] sm:$0xff] }
 0x5e3   : > { %14152 = vmatmul.mubr.msk.f32.gmra.mrb[32].mxu1 %vm279_vm0, %v18946_v16  ;;  %v18954_v16 = vld [vmem:[#allocation45_spill] sm:$0xff] }
 0x5e4   : > { %14154 = vmatprep.mubr.msk.f32.mxu1 %vm279_vm0, %v18947_v22  ;;  %v18955_v22 = vld [vmem:[#allocation47_spill] sm:$0xff] }
 0x5e7   : > { %14155 = vmatmul.mubr.msk.f32.gmra.mrb[34].mxu1 %vm279_vm0, %v18948_v52  ;;  %v18956_v52 = vld [vmem:[#allocation49_spill] sm:$0xff] }
 0x5e8   : > { %14157 = vmatprep.mubr.msk.f32.mxu1 %vm279_vm0, %v18949_v44  ;;  %v18957_v44 = vld [vmem:[#allocation51_spill] sm:$0xff] }
 0x5eb   : > { %14158 = vmatmul.mubr.msk.f32.gmra.mrb[36].mxu1 %vm279_vm0, %v18950_v8  ;;  %v18958_v8 = vld [vmem:[#allocation53_spill] sm:$0xff] }
 0x5ec   : > { %14160 = vmatprep.mubr.msk.f32.mxu1 %vm279_vm0, %v18951_v30  ;;  %v18959_v30 = vld [vmem:[#allocation55_spill] sm:$0xff] }
 0x5ef   : > { %14161 = vmatmul.mubr.msk.f32.gmra.mrb[38].mxu1 %vm279_vm0, %v18952_v27  ;;  %v18960_v27 = vld [vmem:[#allocation57_spill] sm:$0xff] }
 0x5f0   : > { %14163 = vmatprep.mubr.msk.f32.mxu1 %vm279_vm0, %v18953_v19  ;;  %v18961_v19 = vld [vmem:[#allocation59_spill] sm:$0xff] }
 0x5f3   : > { %14164 = vmatmul.mubr.msk.f32.gmra.mrb[40].mxu1 %vm279_vm0, %v18954_v16  ;;  %v18962_v16 = vld [vmem:[#allocation61_spill] sm:$0xff] }
 0x5f4   : > { %14166 = vmatprep.mubr.msk.f32.mxu1 %vm279_vm0, %v18955_v22  ;;  %v18963_v22 = vld [vmem:[#allocation63_spill] sm:$0xff] }
 0x5f7   : > { %14167 = vmatmul.mubr.msk.f32.gmra.mrb[42].mxu1 %vm279_vm0, %v18956_v52  ;;  %v18964_v52 = vld [vmem:[#allocation67_spill] sm:$0xff] }
 0x5f8   : > { %14169 = vmatprep.mubr.msk.f32.mxu1 %vm279_vm0, %v18957_v44  ;;  %v18965_v44 = vld [vmem:[#allocation70_spill] sm:$0xff] }
 0x5fb   : > { %14170 = vmatmul.mubr.msk.f32.gmra.mrb[44].mxu1 %vm279_vm0, %v18958_v8  ;;  %v18966_v8 = vld [vmem:[#allocation71_spill] sm:$0xff] }
 0x5fc   : > { %14172 = vmatprep.mubr.msk.f32.mxu1 %vm279_vm0, %v18959_v30  ;;  %v18967_v30 = vld [vmem:[#allocation72_spill] sm:$0xff] }
 0x5ff   : > { %14173 = vmatmul.mubr.msk.f32.gmra.mrb[46].mxu1 %vm279_vm0, %v18960_v27  ;;  %v18968_v27 = vld [vmem:[#allocation73_spill] sm:$0xff] }
 0x600   : > { %14175 = vmatprep.mubr.msk.f32.mxu1 %vm279_vm0, %v18961_v19  ;;  %v18971_v19 = vld [vmem:[#allocation76_spill] sm:$0xff] }
 0x603   : > { %14176 = vmatmul.mubr.msk.f32.gmra.mrb[0].mxu1 %vm279_vm0, %v18962_v16  ;;  %v18973_v16 = vld [vmem:[#allocation78_spill] sm:$0xff] }
 0x604   : > { %14178 = vmatprep.mubr.msk.f32.mxu1 %vm279_vm0, %v18963_v22  ;;  %v18974_v22 = vld [vmem:[#allocation79_spill] sm:$0xff] }
 0x607   : > { %14179 = vmatmul.mubr.msk.f32.gmra.mrb[2].mxu1 %vm279_vm0, %v17596_v29  ;;  %v18969_v29 = vld [vmem:[#allocation74_spill] sm:$0xff] }
 0x608   : > { %14181 = vmatprep.mubr.msk.f32.mxu1 %vm279_vm0, %v17602_v5  ;;  %v18970_v5 = vld [vmem:[#allocation75_spill] sm:$0xff] }
 0x60b   : > { %14182 = vmatmul.mubr.msk.f32.gmra.mrb[4].mxu1 %vm279_vm0, %v18964_v52  ;;  %v18019_v52 = vld [vmem:[#allocation2 + $0x199] sm:$0xff] }
 0x60c   : > { %14184 = vmatprep.mubr.msk.f32.mxu1 %vm279_vm0, %v17614_v7  ;;  %v18972_v7 = vld [vmem:[#allocation77_spill] sm:$0xff] }
 0x60f   : > { %14185 = vmatmul.mubr.msk.f32.gmra.mrb[6].mxu1 %vm279_vm0, %v18965_v44  ;;  %v18023_v44 = vld [vmem:[#allocation2 + $0x1a1] sm:$0xff] }
 0x610   : > { %14187 = vmatprep.mubr.msk.f32.mxu1 %vm279_vm0, %v18966_v8  ;;  %v9932_v8 = vld [vmem:[#allocation2 + $0x49] sm:$0xff] }
 0x613   : > { %14188 = vmatmul.mubr.msk.f32.gmra.mrb[8].mxu1 %vm279_vm0, %v18967_v30  ;;  %v9933_v30 = vld [vmem:[#allocation2 + $0x51] sm:$0xff] }
 0x614   : > { %14190 = vmatprep.mubr.msk.f32.mxu1 %vm279_vm0, %v18968_v27  ;;  %v9936_v27 = vld [vmem:[#allocation2 + $0x69] sm:$0xff] }
 0x617   : > { %14191 = vmatmul.mubr.msk.f32.gmra.mrb[10].mxu1 %vm279_vm0, %v18969_v29  ;;  %v9937_v29 = vld [vmem:[#allocation2 + $0x71] sm:$0xff] }
 0x618   : > { %14193 = vmatprep.mubr.msk.f32.mxu1 %vm279_vm0, %v18970_v5  ;;  %v9938_v5 = vld [vmem:[#allocation2 + $0x79] sm:$0xff] }
 0x61b   : > { %14194 = vmatmul.mubr.msk.f32.gmra.mrb[12].mxu1 %vm279_vm0, %v18971_v19  ;;  %v9939_v19 = vld [vmem:[#allocation2 + $0x81] sm:$0xff] }
 0x61c   : > { %14196 = vmatprep.mubr.msk.f32.mxu1 %vm279_vm0, %v18972_v7  ;;  %v9940_v7 = vld [vmem:[#allocation2 + $0x89] sm:$0xff] }
 0x61f   : > { %14197 = vmatmul.mubr.msk.f32.gmra.mrb[14].mxu1 %vm279_vm0, %v18973_v16  ;;  %v9941_v16 = vld [vmem:[#allocation2 + $0x91] sm:$0xff] }
 0x620   : > { %14199 = vmatprep.mubr.msk.f32.mxu1 %vm279_vm0, %v17656_v23  ;;  %v18027_v23 = vld [vmem:[#allocation2 + $0x1a9] sm:$0xff] }
 0x623   : > { %14200 = vmatmul.mubr.msk.f32.gmra.mrb[16].mxu1 %vm279_vm0, %v18974_v22  ;;  %v9942_v22 = vld [vmem:[#allocation2 + $0x99] sm:$0xff] }
 0x624   : > { %14202 = vmatprep.mubr.msk.f32.mxu1 %vm279_vm0, %v17664_v6  ;;  %v12070_v6 = vld [vmem:[%s18536_s3 + $0x40] sm:$0xff] }
 0x627   : > { %14203 = vmatmul.mubr.msk.f32.gmra.mrb[18].mxu1 %vm279_vm0, %v17668_v61  ;;  %v9422_v61 = vld [vmem:[#allocation2 + $0x170] sm:$0xff] }
 0x628   : > { %14205 = vmatprep.mubr.msk.f32.mxu1 %vm279_vm0, %v17672_v10  ;;  %v9423_v10 = vld [vmem:[#allocation2 + $0x178] sm:$0xff] }
 0x62b   : > { %14206 = vmatmul.mubr.msk.f32.gmra.mrb[20].mxu1 %vm279_vm0, %v18019_v52 }
 0x62c   : > { %14208 = vmatprep.mubr.msk.f32.mxu1 %vm279_vm0, %v18023_v44 }
 0x62f   : > { %14209 = vmatmul.mubr.msk.f32.gmra.mrb[22].mxu1 %vm279_vm0, %v18027_v23 }
 0x630   : > { %14213 = vmatprep.mubr.msk.f32.mxu1 %vm279_vm0, %v17274_v53  ;;  %v18975_v53 = vld [vmem:[#allocation18_spill] sm:$0xff] }
 0x633   : > { %14214 = vmatmul.mubr.msk.f32.vlgmr.msra.gmra.mrb[24].mxu1 %vm279_vm0, %v17278_v1  ;;  %v18976_v1 = vld [vmem:[#allocation19_spill] sm:$0xff] }
 0x634   : > { %14286 = vmatpush3.msra.mxu1 %v12021_v25  ;;  %14216 = vmatprep.mubr.msk.f32.mxu1 %vm279_vm0, %v17282_v62  ;;  %v18977_v62 = vld [vmem:[#allocation80_spill] sm:$0xff]  ;;  %v9432_v25 = vld [vmem:[#allocation2 + $0x1c0] sm:$0xff] }
 0x635   : > { %14359 = vmatprep.subr.mxu1 %v12070_v6 }
 0x637   : > { %14217 = vmatmul.mubr.msk.f32.gmra.mrb[26].mxu1 %vm279_vm0, %v17286_v47  ;;  %v18132_v47 = vld [vmem:[%s18537_s4] sm:$0xff] }
 0x638   : > { %14219 = vmatprep.mubr.msk.f32.mxu1 %vm279_vm0, %v17290_v48  ;;  %v18980_v48 = vld [vmem:[#allocation83_spill] sm:$0xff] }
 0x63b   : > { %14220 = vmatmul.mubr.msk.f32.gmra.mrb[28].mxu1 %vm279_vm0, %v17294_v13  ;;  %v18981_v13 = vld [vmem:[#allocation84_spill] sm:$0xff] }
 0x63c   : > { %14222 = vmatprep.mubr.msk.f32.mxu1 %vm279_vm0, %v17298_v9  ;;  %v18982_v9 = vld [vmem:[#allocation85_spill] sm:$0xff] }
 0x63f   : > { %14223 = vmatmul.mubr.msk.f32.gmra.mrb[30].mxu1 %vm279_vm0, %v17302_v55  ;;  %v18983_v55 = vld [vmem:[#allocation86_spill] sm:$0xff] }
 0x640   : > { %14225 = vmatprep.mubr.msk.f32.mxu1 %vm279_vm0, %v17306_v17  ;;  %v18984_v17 = vld [vmem:[#allocation87_spill] sm:$0xff] }
 0x643   : > { %14226 = vmatmul.mubr.msk.f32.gmra.mrb[32].mxu1 %vm279_vm0, %v17310_v11  ;;  %v18985_v11 = vld [vmem:[#allocation88_spill] sm:$0xff] }
 0x644   : > { %14228 = vmatprep.mubr.msk.f32.mxu1 %vm279_vm0, %v17314_v2  ;;  %v18986_v2 = vld [vmem:[#allocation89_spill] sm:$0xff] }
 0x647   : > { %14229 = vmatmul.mubr.msk.f32.gmra.mrb[34].mxu1 %vm279_vm0, %v17318_v0  ;;  %v18987_v0 = vld [vmem:[#allocation90_spill] sm:$0xff] }
 0x648   : > { %14231 = vmatprep.mubr.msk.f32.mxu1 %vm279_vm0, %v17322_v50  ;;  %v18988_v50 = vld [vmem:[#allocation91_spill] sm:$0xff] }
 0x64b   : > { %14232 = vmatmul.mubr.msk.f32.gmra.mrb[36].mxu1 %vm279_vm0, %v17326_v46  ;;  %v18989_v46 = vld [vmem:[#allocation92_spill] sm:$0xff] }
 0x64c   : > { %14234 = vmatprep.mubr.msk.f32.mxu1 %vm279_vm0, %v17330_v28  ;;  %v18990_v28 = vld [vmem:[#allocation93_spill] sm:$0xff] }
 0x64f   : > { %14235 = vmatmul.mubr.msk.f32.gmra.mrb[38].mxu1 %vm279_vm0, %v17334_v41  ;;  %v18991_v41 = vld [vmem:[#allocation94_spill] sm:$0xff] }
 0x650   : > { %14237 = vmatprep.mubr.msk.f32.mxu1 %vm279_vm0, %v17338_v26  ;;  %v18992_v26 = vld [vmem:[#allocation95_spill] sm:$0xff] }
 0x653   : > { %14238 = vmatmul.mubr.msk.f32.gmra.mrb[40].mxu1 %vm279_vm0, %v17342_v24  ;;  %v9404_v24 = vld [vmem:[#allocation2 + $0xe0] sm:$0xff] }
 0x654   : > { %14240 = vmatprep.mubr.msk.f32.mxu1 %vm279_vm0, %v17346_v4  ;;  %v9405_v4 = vld [vmem:[#allocation2 + $0xe8] sm:$0xff] }
 0x657   : > { %14241 = vmatmul.mubr.msk.f32.gmra.mrb[42].mxu1 %vm279_vm0, %v17350_v33  ;;  %v9406_v33 = vld [vmem:[#allocation2 + $0xf0] sm:$0xff] }
 0x658   : > { %14243 = vmatprep.mubr.msk.f32.mxu1 %vm279_vm0, %v17354_v59  ;;  %v9407_v59 = vld [vmem:[#allocation2 + $0xf8] sm:$0xff] }
 0x65b   : > { %14244 = vmatmul.mubr.msk.f32.gmra.mrb[44].mxu1 %vm279_vm0, %v17358_v49  ;;  %v9408_v49 = vld [vmem:[#allocation2 + $0x100] sm:$0xff] }
 0x65c   : > { %14246 = vmatprep.mubr.msk.f32.mxu1 %vm279_vm0, %v17362_v31  ;;  %v9409_v31 = vld [vmem:[#allocation2 + $0x108] sm:$0xff] }
 0x65f   : > { %14247 = vmatmul.mubr.msk.f32.gmra.mrb[46].mxu1 %vm279_vm0, %v17366_v43  ;;  %v9410_v43 = vld [vmem:[#allocation2 + $0x110] sm:$0xff] }
 0x660   : > { %14249 = vmatprep.mubr.msk.f32.mxu1 %vm279_vm0, %v17370_v32  ;;  %v9411_v32 = vld [vmem:[#allocation2 + $0x118] sm:$0xff] }
 0x663   : > { %14250 = vmatmul.mubr.msk.f32.gmra.mrb[0].mxu1 %vm279_vm0, %v17374_v34  ;;  %v9412_v34 = vld [vmem:[#allocation2 + $0x120] sm:$0xff] }
 0x664   : > { %14252 = vmatprep.mubr.msk.f32.mxu1 %vm279_vm0, %v17378_v35  ;;  %v9413_v35 = vld [vmem:[#allocation2 + $0x128] sm:$0xff] }
 0x667   : > { %14253 = vmatmul.mubr.msk.f32.gmra.mrb[2].mxu1 %vm279_vm0, %v17382_v36  ;;  %v9414_v36 = vld [vmem:[#allocation2 + $0x130] sm:$0xff] }
 0x668   : > { %14255 = vmatprep.mubr.msk.f32.mxu1 %vm279_vm0, %v17386_v58  ;;  %v9415_v58 = vld [vmem:[#allocation2 + $0x138] sm:$0xff] }
 0x66b   : > { %14256 = vmatmul.mubr.msk.f32.gmra.mrb[4].mxu1 %vm279_vm0, %v17390_v38  ;;  %v9416_v38 = vld [vmem:[#allocation2 + $0x140] sm:$0xff] }
 0x66c   : > { %14258 = vmatprep.mubr.msk.f32.mxu1 %vm279_vm0, %v17394_v42  ;;  %v9417_v42 = vld [vmem:[#allocation2 + $0x148] sm:$0xff] }
 0x66f   : > { %14259 = vmatmul.mubr.msk.f32.gmra.mrb[6].mxu1 %vm279_vm0, %v17398_v39  ;;  %v9418_v39 = vld [vmem:[#allocation2 + $0x150] sm:$0xff] }
 0x670   : > { %14261 = vmatprep.mubr.msk.f32.mxu1 %vm279_vm0, %v17402_v63  ;;  %v9419_v63 = vld [vmem:[#allocation2 + $0x158] sm:$0xff] }
 0x673   : > { %14262 = vmatmul.mubr.msk.f32.gmra.mrb[8].mxu1 %vm279_vm0, %v17406_v51  ;;  %v9420_v51 = vld [vmem:[#allocation2 + $0x160] sm:$0xff] }
 0x674   : > { %14264 = vmatprep.mubr.msk.f32.mxu1 %vm279_vm0, %v17410_v15  ;;  %v9421_v15 = vld [vmem:[#allocation2 + $0x168] sm:$0xff] }
 0x677   : > { %14265 = vmatmul.mubr.msk.f32.gmra.mrb[10].mxu1 %vm279_vm0, %v17414_v20  ;;  %v18978_v20 = vld [vmem:[#allocation81_spill] sm:$0xff] }
 0x678   : > { %14267 = vmatprep.mubr.msk.f32.mxu1 %vm279_vm0, %v17418_v45  ;;  %v18979_v45 = vld [vmem:[#allocation82_spill] sm:$0xff] }
 0x67b   : > { %14268 = vmatmul.mubr.msk.f32.gmra.mrb[12].mxu1 %vm279_vm0, %v17422_v60  ;;  %v8884_v60 = vld [vmem:[#allocation2 + $0x1b7] sm:$0xff] }
 0x67c   : > { %14270 = vmatprep.mubr.msk.f32.mxu1 %vm279_vm0, %v17426_v21  ;;  %v8883_v21 = vld [vmem:[#allocation2 + $0x1af] sm:$0xff] }
 0x67f   : > { %14271 = vmatmul.mubr.msk.f32.gmra.mrb[14].mxu1 %vm279_vm0, %v17430_v37  ;;  %v8885_v37 = vld [vmem:[#allocation2 + $0x1bf] sm:$0xff] }
 0x680   : > { %14273 = vmatprep.mubr.msk.f32.mxu1 %vm279_vm0, %v18975_v53  ;;  %v9944_v53 = vld [vmem:[#allocation2 + $0xa9] sm:$0xff] }
 0x683   : > { %14274 = vmatmul.mubr.msk.f32.gmra.mrb[16].mxu1 %vm279_vm0, %v18976_v1  ;;  %v9945_v1 = vld [vmem:[#allocation2 + $0xb1] sm:$0xff] }
 0x684   : > { %14276 = vmatprep.mubr.msk.f32.mxu1 %vm279_vm0, %v18977_v62  ;;  %v9946_v62 = vld [vmem:[#allocation2 + $0xb9] sm:$0xff] }
 0x687   : > { %14277 = vmatmul.mubr.msk.f32.gmra.mrb[18].mxu1 %vm279_vm0, %v18978_v20  ;;  %v9947_v20 = vld [vmem:[#allocation2 + $0xc1] sm:$0xff] }
 0x688   : > { %14279 = vmatprep.mubr.msk.f32.mxu1 %vm279_vm0, %v18979_v45  ;;  %v9948_v45 = vld [vmem:[#allocation2 + $0xc9] sm:$0xff] }
 0x68b   : > { %14280 = vmatmul.mubr.msk.f32.gmra.mrb[20].mxu1 %vm279_vm0, %v8883_v21  ;;  %v9950_v21 = vld [vmem:[#allocation2 + $0xd9] sm:$0xff] }
 0x68c   : > { %14282 = vmatprep.mubr.msk.f32.mxu1 %vm279_vm0, %v8884_v60  ;;  %v9949_v60 = vld [vmem:[#allocation2 + $0xd1] sm:$0xff] }
 0x68f   : > { %14283 = vmatmul.mubr.msk.f32.gmra.mrb[22].mxu1 %vm279_vm0, %v8885_v37  ;;  %v9951_v37 = vld [vmem:[#allocation2 + $0xe1] sm:$0xff] }
 0x690   : > { %14287 = vmatprep.mubr.msk.f32.mxu1 %vm279_vm0, %v17791_v54  ;;  %v9424_v54 = vld [vmem:[#allocation2 + $0x180] sm:$0xff] }
 0x693   : > { %14288 = vmatmul.mubr.msk.f32.vlgmr.msra.gmra.mrb[24].mxu1 %vm279_vm0, %v18980_v48  ;;  %v9953_v48 = vld [vmem:[#allocation2 + $0xf1] sm:$0xff] }
 0x694   : > { %14360 = vmatpush3.msra.mxu1 %v12070_v6  ;;  %14290 = vmatprep.mubr.msk.f32.mxu1 %vm279_vm0, %v18981_v13  ;;  %v9943_v6 = vld [vmem:[#allocation2 + $0xa1] sm:$0xff]  ;;  %v9954_v13 = vld [vmem:[#allocation2 + $0xf9] sm:$0xff] }
 0x695   : > { %14433 = vmatprep.subr.mxu1 %v18132_v47 }
 0x697   : > { %14291 = vmatmul.mubr.msk.f32.gmra.mrb[26].mxu1 %vm279_vm0, %v18982_v9  ;;  %v9955_v9 = vld [vmem:[#allocation2 + $0x101] sm:$0xff] }
 0x698   : > { %14293 = vmatprep.mubr.msk.f32.mxu1 %vm279_vm0, %v18983_v55  ;;  %v9956_v55 = vld [vmem:[#allocation2 + $0x109] sm:$0xff] }
 0x69b   : > { %14294 = vmatmul.mubr.msk.f32.gmra.mrb[28].mxu1 %vm279_vm0, %v18984_v17  ;;  %v9957_v17 = vld [vmem:[#allocation2 + $0x111] sm:$0xff] }
 0x69c   : > { %14296 = vmatprep.mubr.msk.f32.mxu1 %vm279_vm0, %v18985_v11  ;;  %v9958_v11 = vld [vmem:[#allocation2 + $0x119] sm:$0xff] }
 0x69f   : > { %14297 = vmatmul.mubr.msk.f32.gmra.mrb[30].mxu1 %vm279_vm0, %v18986_v2  ;;  %v9959_v2 = vld [vmem:[#allocation2 + $0x121] sm:$0xff] }
 0x6a0   : > { %14299 = vmatprep.mubr.msk.f32.mxu1 %vm279_vm0, %v18987_v0  ;;  %v9960_v0 = vld [vmem:[#allocation2 + $0x129] sm:$0xff] }
 0x6a3   : > { %14300 = vmatmul.mubr.msk.f32.gmra.mrb[32].mxu1 %vm279_vm0, %v18988_v50  ;;  %v9961_v50 = vld [vmem:[#allocation2 + $0x131] sm:$0xff] }
 0x6a4   : > { %14302 = vmatprep.mubr.msk.f32.mxu1 %vm279_vm0, %v18989_v46  ;;  %v9962_v46 = vld [vmem:[#allocation2 + $0x139] sm:$0xff] }
 0x6a7   : > { %14303 = vmatmul.mubr.msk.f32.gmra.mrb[34].mxu1 %vm279_vm0, %v18990_v28  ;;  %v9963_v28 = vld [vmem:[#allocation2 + $0x141] sm:$0xff] }
 0x6a8   : > { %14305 = vmatprep.mubr.msk.f32.mxu1 %vm279_vm0, %v18991_v41  ;;  %v9964_v41 = vld [vmem:[#allocation2 + $0x149] sm:$0xff] }
 0x6ab   : > { %14306 = vmatmul.mubr.msk.f32.gmra.mrb[36].mxu1 %vm279_vm0, %v18992_v26  ;;  %v9965_v26 = vld [vmem:[#allocation2 + $0x151] sm:$0xff] }
 0x6ac   : > { %14308 = vmatprep.mubr.msk.f32.mxu1 %vm279_vm0, %v17847_v3  ;;  %v9430_v3 = vld [vmem:[#allocation2 + $0x1b0] sm:$0xff] }
 0x6af   : > { %14309 = vmatmul.mubr.msk.f32.gmra.mrb[38].mxu1 %vm279_vm0, %v17851_v57  ;;  %v9431_v57 = vld [vmem:[#allocation2 + $0x1b8] sm:$0xff] }
 0x6b0   : > { %14311 = vmatprep.mubr.msk.f32.mxu1 %vm279_vm0, %v17855_v18  ;;  %v9426_v18 = vld [vmem:[#allocation2 + $0x190] sm:$0xff] }
 0x6b3   : > { %14312 = vmatmul.mubr.msk.f32.gmra.mrb[40].mxu1 %vm279_vm0, %v17859_v56  ;;  %v9425_v56 = vld [vmem:[#allocation2 + $0x188] sm:$0xff] }
 0x6b4   : > { %14314 = vmatprep.mubr.msk.f32.mxu1 %vm279_vm0, %v17863_v40  ;;  %v18993_v40 = vld [vmem:[#allocation3_spill] sm:$0xff] }
 0x6b7   : > { %14315 = vmatmul.mubr.msk.f32.gmra.mrb[42].mxu1 %vm279_vm0, %v9404_v24  ;;  %v9966_v24 = vld [vmem:[#allocation2 + $0x159] sm:$0xff] }
 0x6b8   : > { %14317 = vmatprep.mubr.msk.f32.mxu1 %vm279_vm0, %v9405_v4  ;;  %v9967_v4 = vld [vmem:[#allocation2 + $0x161] sm:$0xff] }
 0x6bb   : > { %14318 = vmatmul.mubr.msk.f32.gmra.mrb[44].mxu1 %vm279_vm0, %v9406_v33  ;;  %v9968_v33 = vld [vmem:[#allocation2 + $0x169] sm:$0xff] }
 0x6bc   : > { %14320 = vmatprep.mubr.msk.f32.mxu1 %vm279_vm0, %v9407_v59  ;;  %v9969_v59 = vld [vmem:[#allocation2 + $0x171] sm:$0xff] }
 0x6bf   : > { %14321 = vmatmul.mubr.msk.f32.gmra.mrb[46].mxu1 %vm279_vm0, %v9408_v49  ;;  %v9970_v49 = vld [vmem:[#allocation2 + $0x179] sm:$0xff] }
 0x6c0   : > { %14323 = vmatprep.mubr.msk.f32.mxu1 %vm279_vm0, %v9409_v31  ;;  %v9971_v31 = vld [vmem:[#allocation2 + $0x181] sm:$0xff] }
 0x6c3   : > { %14324 = vmatmul.mubr.msk.f32.gmra.mrb[0].mxu1 %vm279_vm0, %v9410_v43  ;;  %v9972_v43 = vld [vmem:[#allocation2 + $0x189] sm:$0xff] }
 0x6c4   : > { %14326 = vmatprep.mubr.msk.f32.mxu1 %vm279_vm0, %v9411_v32  ;;  %v9973_v32 = vld [vmem:[#allocation2 + $0x191] sm:$0xff] }
 0x6c7   : > { %14327 = vmatmul.mubr.msk.f32.gmra.mrb[2].mxu1 %vm279_vm0, %v9412_v34  ;;  %v9977_v34 = vld [vmem:[#allocation2 + $0x1b1] sm:$0xff] }
 0x6c8   : > { %14329 = vmatprep.mubr.msk.f32.mxu1 %vm279_vm0, %v9413_v35  ;;  %v9978_v35 = vld [vmem:[#allocation2 + $0x1b9] sm:$0xff] }
 0x6cb   : > { %14330 = vmatmul.mubr.msk.f32.gmra.mrb[4].mxu1 %vm279_vm0, %v9414_v36  ;;  %v9979_v36 = vld [vmem:[#allocation2 + $0x1c1] sm:$0xff] }
 0x6cc   : > { %14332 = vmatprep.mubr.msk.f32.mxu1 %vm279_vm0, %v9415_v58  ;;  %v10479_v58 = vld [vmem:[%s15409_s10 + $0x30] sm:$0xff] }
 0x6cf   : > { %14333 = vmatmul.mubr.msk.f32.gmra.mrb[6].mxu1 %vm279_vm0, %v9416_v38  ;;  %v10483_v38 = vld [vmem:[%s15409_s10 + $0x50] sm:$0xff] }
 0x6d0   : > { %14335 = vmatprep.mubr.msk.f32.mxu1 %vm279_vm0, %v9417_v42  ;;  %v10484_v42 = vld [vmem:[%s15409_s10 + $0x58] sm:$0xff] }
 0x6d3   : > { %14336 = vmatmul.mubr.msk.f32.gmra.mrb[8].mxu1 %vm279_vm0, %v9418_v39  ;;  %v10485_v39 = vld [vmem:[%s15409_s10 + $0x60] sm:$0xff] }
 0x6d4   : > { %14338 = vmatprep.mubr.msk.f32.mxu1 %vm279_vm0, %v9419_v63  ;;  %v10486_v63 = vld [vmem:[%s15409_s10 + $0x68] sm:$0xff] }
 0x6d7   : > { %14339 = vmatmul.mubr.msk.f32.gmra.mrb[10].mxu1 %vm279_vm0, %v9420_v51  ;;  %v10487_v51 = vld [vmem:[%s15409_s10 + $0x70] sm:$0xff] }
 0x6d8   : > { %14341 = vmatprep.mubr.msk.f32.mxu1 %vm279_vm0, %v9421_v15  ;;  %v10488_v15 = vld [vmem:[%s15409_s10 + $0x78] sm:$0xff] }
 0x6db   : > { %14342 = vmatmul.mubr.msk.f32.gmra.mrb[12].mxu1 %vm279_vm0, %v9422_v61  ;;  %v10489_v61 = vld [vmem:[%s15409_s10 + $0x80] sm:$0xff] }
 0x6dc   : > { %14344 = vmatprep.mubr.msk.f32.mxu1 %vm279_vm0, %v9423_v10  ;;  %v10490_v10 = vld [vmem:[%s15409_s10 + $0x88] sm:$0xff] }
 0x6df   : > { %14345 = vmatmul.mubr.msk.f32.gmra.mrb[14].mxu1 %vm279_vm0, %v9424_v54  ;;  %v10491_v54 = vld [vmem:[%s15409_s10 + $0x90] sm:$0xff] }
 0x6e0   : > { %14347 = vmatprep.mubr.msk.f32.mxu1 %vm279_vm0, %v9425_v56  ;;  %v10492_v56 = vld [vmem:[%s15409_s10 + $0x98] sm:$0xff] }
 0x6e3   : > { %14348 = vmatmul.mubr.msk.f32.gmra.mrb[16].mxu1 %vm279_vm0, %v9426_v18  ;;  %v10493_v18 = vld [vmem:[%s15409_s10 + $0xa0] sm:$0xff] }
 0x6e4   : > { %14350 = vmatprep.mubr.msk.f32.mxu1 %vm279_vm0, %v17913_v14  ;;  %v9934_v14 = vld [vmem:[#allocation2 + $0x59] sm:$0xff] }
 0x6e7   : > { %14351 = vmatmul.mubr.msk.f32.gmra.mrb[18].mxu1 %vm279_vm0, %v17917_v12  ;;  %v9935_v12 = vld [vmem:[#allocation2 + $0x61] sm:$0xff] }
 0x6e8   : > { %14353 = vmatprep.mubr.msk.f32.mxu1 %vm279_vm0, %v18993_v40  ;;  %v10494_v40 = vld [vmem:[%s15409_s10 + $0xa8] sm:$0xff] }
 0x6eb   : > { %14354 = vmatmul.mubr.msk.f32.gmra.mrb[20].mxu1 %vm279_vm0, %v9430_v3  ;;  %v10495_v3 = vld [vmem:[%s15409_s10 + $0xb0] sm:$0xff] }
 0x6ec   : > { %14356 = vmatprep.mubr.msk.f32.mxu1 %vm279_vm0, %v9431_v57  ;;  %v10496_v57 = vld [vmem:[%s15409_s10 + $0xb8] sm:$0xff] }
 0x6ef   : > { %14357 = vmatmul.mubr.msk.f32.gmra.mrb[22].mxu1 %vm279_vm0, %v9432_v25  ;;  %v10497_v25 = vld [vmem:[%s15409_s10 + $0xc0] sm:$0xff] }
 0x6f0   : > { %14361 = vmatprep.mubr.msk.f32.mxu1 %vm279_vm0, %v9932_v8  ;;  %v10498_v8 = vld [vmem:[%s15409_s10 + $0xc8] sm:$0xff] }
 0x6f3   : > { %14362 = vmatmul.mubr.msk.f32.vlgmr.msra.gmra.mrb[24].mxu1 %vm279_vm0, %v9933_v30  ;;  %v10499_v30 = vld [vmem:[%s15409_s10 + $0xd0] sm:$0xff] }
 0x6f4   : > { %14434 = vmatpush3.msra.mxu1 %v18132_v47  ;;  %14364 = vmatprep.mubr.msk.f32.mxu1 %vm279_vm0, %v9934_v14  ;;  %v9952_v47 = vld [vmem:[#allocation2 + $0xe9] sm:$0xff]  ;;  %v10500_v14 = vld [vmem:[%s15409_s10 + $0xd8] sm:$0xff] }
 0x6f7   : > { %14365 = vmatmul.mubr.msk.f32.gmra.mrb[26].mxu1 %vm279_vm0, %v9935_v12  ;;  %v10501_v12 = vld [vmem:[%s15409_s10 + $0xe0] sm:$0xff] }
 0x6f8   : > { %14367 = vmatprep.mubr.msk.f32.mxu1 %vm279_vm0, %v9936_v27  ;;  %v10502_v27 = vld [vmem:[%s15409_s10 + $0xe8] sm:$0xff] }
 0x6fb   : > { %14368 = vmatmul.mubr.msk.f32.gmra.mrb[28].mxu1 %vm279_vm0, %v9937_v29  ;;  %v10503_v29 = vld [vmem:[%s15409_s10 + $0xf0] sm:$0xff] }
 0x6fc   : > { %14370 = vmatprep.mubr.msk.f32.mxu1 %vm279_vm0, %v9938_v5  ;;  %v10504_v5 = vld [vmem:[%s15409_s10 + $0xf8] sm:$0xff] }
 0x6ff   : > { %14371 = vmatmul.mubr.msk.f32.gmra.mrb[30].mxu1 %vm279_vm0, %v9939_v19  ;;  %v10505_v19 = vld [vmem:[%s15409_s10 + $0x100] sm:$0xff] }
 0x700   : > { %14373 = vmatprep.mubr.msk.f32.mxu1 %vm279_vm0, %v9940_v7  ;;  %v10506_v7 = vld [vmem:[%s15409_s10 + $0x108] sm:$0xff] }
 0x703   : > { %14374 = vmatmul.mubr.msk.f32.gmra.mrb[32].mxu1 %vm279_vm0, %v9941_v16  ;;  %v10507_v16 = vld [vmem:[%s15409_s10 + $0x110] sm:$0xff] }
 0x704   : > { %14376 = vmatprep.mubr.msk.f32.mxu1 %vm279_vm0, %v9942_v22  ;;  %v10508_v22 = vld [vmem:[%s15409_s10 + $0x118] sm:$0xff] }
 0x707   : > { %14377 = vmatmul.mubr.msk.f32.gmra.mrb[34].mxu1 %vm279_vm0, %v9943_v6  ;;  %v10509_v6 = vld [vmem:[%s15409_s10 + $0x120] sm:$0xff] }
 0x708   : > { %14379 = vmatprep.mubr.msk.f32.mxu1 %vm279_vm0, %v9944_v53  ;;  %v10510_v53 = vld [vmem:[%s15409_s10 + $0x128] sm:$0xff] }
 0x70b   : > { %14380 = vmatmul.mubr.msk.f32.gmra.mrb[36].mxu1 %vm279_vm0, %v9945_v1  ;;  %v10511_v1 = vld [vmem:[%s15409_s10 + $0x130] sm:$0xff] }
 0x70c   : > { %14382 = vmatprep.mubr.msk.f32.mxu1 %vm279_vm0, %v9946_v62  ;;  %v10512_v62 = vld [vmem:[%s15409_s10 + $0x138] sm:$0xff] }
 0x70f   : > { %14383 = vmatmul.mubr.msk.f32.gmra.mrb[38].mxu1 %vm279_vm0, %v9947_v20  ;;  %v10513_v20 = vld [vmem:[%s15409_s10 + $0x140] sm:$0xff] }
 0x710   : > { %14385 = vmatprep.mubr.msk.f32.mxu1 %vm279_vm0, %v9948_v45  ;;  %v10514_v45 = vld [vmem:[%s15409_s10 + $0x148] sm:$0xff] }
 0x713   : > { %14386 = vmatmul.mubr.msk.f32.gmra.mrb[40].mxu1 %vm279_vm0, %v9949_v60  ;;  %v10515_v60 = vld [vmem:[%s15409_s10 + $0x150] sm:$0xff] }
 0x714   : > { %14388 = vmatprep.mubr.msk.f32.mxu1 %vm279_vm0, %v9950_v21  ;;  %v10516_v21 = vld [vmem:[%s15409_s10 + $0x158] sm:$0xff] }
 0x717   : > { %14389 = vmatmul.mubr.msk.f32.gmra.mrb[42].mxu1 %vm279_vm0, %v9951_v37  ;;  %v10517_v37 = vld [vmem:[%s15409_s10 + $0x160] sm:$0xff] }
 0x718   : > { %14391 = vmatprep.mubr.msk.f32.mxu1 %vm279_vm0, %v9952_v47  ;;  %v10518_v47 = vld [vmem:[%s15409_s10 + $0x168] sm:$0xff] }
 0x71b   : > { %14392 = vmatmul.mubr.msk.f32.gmra.mrb[44].mxu1 %vm279_vm0, %v9953_v48  ;;  %v10519_v48 = vld [vmem:[%s15409_s10 + $0x170] sm:$0xff] }
 0x71c   : > { %14394 = vmatprep.mubr.msk.f32.mxu1 %vm279_vm0, %v9954_v13  ;;  %v10520_v13 = vld [vmem:[%s15409_s10 + $0x178] sm:$0xff] }
 0x71f   : > { %14395 = vmatmul.mubr.msk.f32.gmra.mrb[46].mxu1 %vm279_vm0, %v9955_v9  ;;  %v10521_v9 = vld [vmem:[%s15409_s10 + $0x180] sm:$0xff] }
 0x720   : > { %14397 = vmatprep.mubr.msk.f32.mxu1 %vm279_vm0, %v9956_v55  ;;  %v10522_v55 = vld [vmem:[%s15409_s10 + $0x188] sm:$0xff] }
 0x723   : > { %14398 = vmatmul.mubr.msk.f32.gmra.mrb[0].mxu1 %vm279_vm0, %v9957_v17  ;;  %v10523_v17 = vld [vmem:[%s15409_s10 + $0x190] sm:$0xff] }
 0x724   : > { %14400 = vmatprep.mubr.msk.f32.mxu1 %vm279_vm0, %v9958_v11  ;;  %v10524_v11 = vld [vmem:[%s15409_s10 + $0x198] sm:$0xff] }
 0x727   : > { %14401 = vmatmul.mubr.msk.f32.gmra.mrb[2].mxu1 %vm279_vm0, %v9959_v2  ;;  %v10525_v2 = vld [vmem:[%s15409_s10 + $0x1a0] sm:$0xff] }
 0x728   : > { %14403 = vmatprep.mubr.msk.f32.mxu1 %vm279_vm0, %v9960_v0  ;;  %v10526_v0 = vld [vmem:[%s15409_s10 + $0x1a8] sm:$0xff] }
 0x72b   : > { %14404 = vmatmul.mubr.msk.f32.gmra.mrb[4].mxu1 %vm279_vm0, %v9961_v50 }
 0x72c   : > { %14406 = vmatprep.mubr.msk.f32.mxu1 %vm279_vm0, %v9962_v46  ;;  %v18355_v46 = vld [vmem:[%s18538_s5] ss:$0 sm:$0xff] }
 0x72f   : > { %14407 = vmatmul.mubr.msk.f32.gmra.mrb[6].mxu1 %vm279_vm0, %v9963_v28  ;;  %v18994_v28 = vld [vmem:[#allocation13_spill] sm:$0xff] }
 0x730   : > { %14409 = vmatprep.mubr.msk.f32.mxu1 %vm279_vm0, %v9964_v41 }
 0x733   : > { %14410 = vmatmul.mubr.msk.f32.gmra.mrb[8].mxu1 %vm279_vm0, %v9965_v26 }
 0x734   : > { %14412 = vmatprep.mubr.msk.f32.mxu1 %vm279_vm0, %v9966_v24  ;;  %v18995_v24 = vld [vmem:[#allocation14_spill] sm:$0xff] }
 0x737   : > { %14413 = vmatmul.mubr.msk.f32.gmra.mrb[10].mxu1 %vm279_vm0, %v9967_v4 }
 0x738   : > { %14415 = vmatprep.mubr.msk.f32.mxu1 %vm279_vm0, %v9968_v33 }
 0x73b   : > { %14416 = vmatmul.mubr.msk.f32.gmra.mrb[12].mxu1 %vm279_vm0, %v9969_v59 }
 0x73c   : > { %14418 = vmatprep.mubr.msk.f32.mxu1 %vm279_vm0, %v9970_v49 }
 0x73f   : > { %14419 = vmatmul.mubr.msk.f32.gmra.mrb[14].mxu1 %vm279_vm0, %v9971_v31 }
 0x740   : > { %14421 = vmatprep.mubr.msk.f32.mxu1 %vm279_vm0, %v9972_v43  ;;  %v18996_v43 = vld [vmem:[#allocation30_spill] sm:$0xff] }
 0x743   : > { %14422 = vmatmul.mubr.msk.f32.gmra.mrb[16].mxu1 %vm279_vm0, %v9973_v32 }
 0x744   : > { %14424 = vmatprep.mubr.msk.f32.mxu1 %vm279_vm0, %v18019_v52  ;;  %v10480_v52 = vld [vmem:[%s15409_s10 + $0x38] sm:$0xff] }
 0x747   : > { %14425 = vmatmul.mubr.msk.f32.gmra.mrb[18].mxu1 %vm279_vm0, %v18023_v44  ;;  %v10481_v44 = vld [vmem:[%s15409_s10 + $0x40] sm:$0xff] }
 0x748   : > { %14427 = vmatprep.mubr.msk.f32.mxu1 %vm279_vm0, %v18027_v23  ;;  %v10482_v23 = vld [vmem:[%s15409_s10 + $0x48] sm:$0xff]  ;;  %s18363_s10 = scalar_lea.vmem %s18540_s7, %s15326_s23 }
 0x74b   : > { %14428 = vmatmul.mubr.msk.f32.gmra.mrb[20].mxu1 %vm279_vm0, %v9977_v34 }
 0x74c   : > { %14430 = vmatprep.mubr.msk.f32.mxu1 %vm279_vm0, %v9978_v35 }
 0x74f   : > { %14431 = vmatmul.mubr.msk.f32.gmra.mrb[22].mxu1 %vm279_vm0, %v9979_v36  ;;  %v18997_v36 = vld [vmem:[#allocation32_spill] sm:$0xff] }
 0x750   : > { %14435 = vmatprep.mubr.msk.f32.mxu1 %vm279_vm0, %v10479_v58 }
 0x753   : > { %14436 = vmatmul.mubr.msk.f32.vlgmr.msra.gmra.mrb[24].mxu1 %vm279_vm0, %v10480_v52 }
 0x754   : > { %14438 = vmatprep.mubr.msk.f32.mxu1 %vm279_vm0, %v10481_v44 }
 0x757   : > { %14439 = vmatmul.mubr.msk.f32.gmra.mrb[26].mxu1 %vm279_vm0, %v10482_v23 }
 0x758   : > { %14441 = vmatprep.mubr.msk.f32.mxu1 %vm279_vm0, %v10483_v38 }
 0x75b   : > { %14442 = vmatmul.mubr.msk.f32.gmra.mrb[28].mxu1 %vm279_vm0, %v10484_v42  ;;  %v18998_v42 = vld [vmem:[#allocation34_spill] sm:$0xff] }
 0x75c   : > { %14444 = vmatprep.mubr.msk.f32.mxu1 %vm279_vm0, %v10485_v39 }
 0x75f   : > { %14445 = vmatmul.mubr.msk.f32.gmra.mrb[30].mxu1 %vm279_vm0, %v10486_v63 }
 0x760   : > { %14447 = vmatprep.mubr.msk.f32.mxu1 %vm279_vm0, %v10487_v51 }
 0x763   : > { %14448 = vmatmul.mubr.msk.f32.gmra.mrb[32].mxu1 %vm279_vm0, %v10488_v15  ;;  %v18999_v15 = vld [vmem:[#allocation36_spill] sm:$0xff] }
 0x764   : > { %14450 = vmatprep.mubr.msk.f32.mxu1 %vm279_vm0, %v10489_v61 }
 0x767   : > { %14451 = vmatmul.mubr.msk.f32.gmra.mrb[34].mxu1 %vm279_vm0, %v10490_v10 }
 0x768   : > { %14453 = vmatprep.mubr.msk.f32.mxu1 %vm279_vm0, %v10491_v54 }
 0x76b   : > { %14454 = vmatmul.mubr.msk.f32.gmra.mrb[36].mxu1 %vm279_vm0, %v10492_v56 }
 0x76c   : > { %14456 = vmatprep.mubr.msk.f32.mxu1 %vm279_vm0, %v10493_v18 }
 0x76f   : > { %14457 = vmatmul.mubr.msk.f32.gmra.mrb[38].mxu1 %vm279_vm0, %v10494_v40  ;;  %v19000_v40 = vld [vmem:[#allocation38_spill] sm:$0xff] }
 0x770   : > { %14459 = vmatprep.mubr.msk.f32.mxu1 %vm279_vm0, %v10495_v3 }
 0x773   : > { %14460 = vmatmul.mubr.msk.f32.gmra.mrb[40].mxu1 %vm279_vm0, %v10496_v57 }
 0x774   : > { %14462 = vmatprep.mubr.msk.f32.mxu1 %vm279_vm0, %v10497_v25 }
 0x777   : > { %14463 = vmatmul.mubr.msk.f32.gmra.mrb[42].mxu1 %vm279_vm0, %v10498_v8  ;;  %v19001_v8 = vld [vmem:[#allocation40_spill] sm:$0xff] }
 0x778   : > { %14465 = vmatprep.mubr.msk.f32.mxu1 %vm279_vm0, %v10499_v30 }
 0x77b   : > { %14466 = vmatmul.mubr.msk.f32.gmra.mrb[44].mxu1 %vm279_vm0, %v10500_v14 }
 0x77c   : > { %14468 = vmatprep.mubr.msk.f32.mxu1 %vm279_vm0, %v10501_v12 }
 0x77f   : > { %14469 = vmatmul.mubr.msk.f32.gmra.mrb[46].mxu1 %vm279_vm0, %v10502_v27 }
 0x780   : > { %14471 = vmatprep.mubr.msk.f32.mxu1 %vm279_vm0, %v10503_v29 }
 0x783   : > { %14472 = vmatmul.mubr.msk.f32.gmra.mrb[0].mxu1 %vm279_vm0, %v10504_v5  ;;  %v19002_v5 = vld [vmem:[#allocation42_spill] sm:$0xff] }
 0x784   : > { %14474 = vmatprep.mubr.msk.f32.mxu1 %vm279_vm0, %v10505_v19 }
 0x787   : > { %14475 = vmatmul.mubr.msk.f32.gmra.mrb[2].mxu1 %vm279_vm0, %v10506_v7 }
 0x788   : > { %14477 = vmatprep.mubr.msk.f32.mxu1 %vm279_vm0, %v10507_v16 }
 0x78b   : > { %14478 = vmatmul.mubr.msk.f32.gmra.mrb[4].mxu1 %vm279_vm0, %v10508_v22  ;;  %v19003_v22 = vld [vmem:[#allocation44_spill] sm:$0xff] }
 0x78c   : > { %14480 = vmatprep.mubr.msk.f32.mxu1 %vm279_vm0, %v10509_v6 }
 0x78f   : > { %14481 = vmatmul.mubr.msk.f32.gmra.mrb[6].mxu1 %vm279_vm0, %v10510_v53 }
 0x790   : > { %14483 = vmatprep.mubr.msk.f32.mxu1 %vm279_vm0, %v10511_v1 }
 0x793   : > { %14484 = vmatmul.mubr.msk.f32.gmra.mrb[8].mxu1 %vm279_vm0, %v10512_v62 }
 0x794   : > { %14486 = vmatprep.mubr.msk.f32.mxu1 %vm279_vm0, %v10513_v20 }
 0x797   : > { %14487 = vmatmul.mubr.msk.f32.gmra.mrb[10].mxu1 %vm279_vm0, %v10514_v45  ;;  %v19004_v45 = vld [vmem:[#allocation46_spill] sm:$0xff] }
 0x798   : > { %14489 = vmatprep.mubr.msk.f32.mxu1 %vm279_vm0, %v10515_v60 }
 0x79b   : > { %14490 = vmatmul.mubr.msk.f32.gmra.mrb[12].mxu1 %vm279_vm0, %v10516_v21 }
 0x79c   : > { %14492 = vmatprep.mubr.msk.f32.mxu1 %vm279_vm0, %v10517_v37 }
 0x79f   : > { %14493 = vmatmul.mubr.msk.f32.gmra.mrb[14].mxu1 %vm279_vm0, %v10518_v47  ;;  %v19005_v47 = vld [vmem:[#allocation48_spill] sm:$0xff] }
 0x7a0   : > { %14495 = vmatprep.mubr.msk.f32.mxu1 %vm279_vm0, %v10519_v48 }
 0x7a3   : > { %14496 = vmatmul.mubr.msk.f32.gmra.mrb[16].mxu1 %vm279_vm0, %v10520_v13 }
 0x7a4   : > { %14498 = vmatprep.mubr.msk.f32.mxu1 %vm279_vm0, %v10521_v9 }
 0x7a7   : > { %14499 = vmatmul.mubr.msk.f32.gmra.mrb[18].mxu1 %vm279_vm0, %v10522_v55 }
 0x7a8   : > { %14501 = vmatprep.mubr.msk.f32.mxu1 %vm279_vm0, %v10523_v17 }
 0x7ab   : > { %14502 = vmatmul.mubr.msk.f32.gmra.mrb[20].mxu1 %vm279_vm0, %v10524_v11  ;;  %v19006_v11 = vld [vmem:[#allocation50_spill] sm:$0xff] }
 0x7ac   : > { %14504 = vmatprep.mubr.msk.f32.mxu1 %vm279_vm0, %v10525_v2 }
 0x7af   : > { %14505 = vmatmul.mubr.msk.f32.gmra.mrb[22].mxu1 %vm279_vm0, %v10526_v0 }
 0x826   : > { %v14437_v50 = vpop.f32.mrb[24].mxu1 }
 0x827   : > { %v14509_v41 = vadd.f32 %v14437_v50, %v18994_v28  ;;  %v10738_v26 = vpop.f32.mrb[25].mxu1  ;;  %v19007_v28 = vld [vmem:[#allocation52_spill] sm:$0xff] }
 0x828   : > { %v14510_v4 = vadd.f32 %v10738_v26, %v18995_v24 }
 0x829   : > { %v11033_v33 = vadd.f32 %v14509_v41, %v18355_v46 }
 0x82a   : > { %v11032_v59 = vadd.f32 %v14510_v4, %v18355_v46  ;;  %v14440_v49 = vpop.f32.mrb[26].mxu1 }
 0x82b   : > { %v11081_v31 = vmax.f32 %v11033_v33, 0.0  ;;  %v14511_v32 = vadd.f32 %v14440_v49, %v18996_v43  ;;  %v10748_v34 = vpop.f32.mrb[27].mxu1 }
 0x82c   : > { %v11080_v35 = vmax.f32 %v11032_v59, 0.0  ;;  %v14512_v58 = vadd.f32 %v10748_v34, %v18997_v36  ;;  %v19008_v59 = vld [vmem:[#allocation54_spill] sm:$0xff] }
 0x82d   : > { %11129 = vst.msk [vmem:[%s18363_s10 + $0x8] sm:$0xff] %vm279_vm0, %v11081_v31  ;;  %v11035_v52 = vadd.f32 %v14511_v32, %v18355_v46  ;;  %v19009_v32 = vld [vmem:[#allocation56_spill] sm:$0xff] }
 0x82e   : > { %11128 = vst.msk [vmem:[%s18363_s10] sm:$0xff] %vm279_vm0, %v11080_v35  ;;  %v11034_v44 = vadd.f32 %v14512_v58, %v18355_v46  ;;  %v14443_v23 = vpop.f32.mrb[28].mxu1 }
 0x82f   : > { %v11083_v38 = vmax.f32 %v11035_v52, 0.0  ;;  %v14513_v39 = vadd.f32 %v14443_v23, %v18998_v42  ;;  %v10758_v63 = vpop.f32.mrb[29].mxu1 }
 0x830   : > { %v11082_v51 = vmax.f32 %v11034_v44, 0.0  ;;  %v14514_v61 = vadd.f32 %v10758_v63, %v18999_v15  ;;  %v19010_v44 = vld [vmem:[#allocation58_spill] sm:$0xff] }
 0x831   : > { %11131 = vst.msk [vmem:[%s18363_s10 + $0x18] sm:$0xff] %vm279_vm0, %v11083_v38  ;;  %v11037_v10 = vadd.f32 %v14513_v39, %v18355_v46  ;;  %v19011_v39 = vld [vmem:[#allocation60_spill] sm:$0xff] }
 0x832   : > { %11130 = vst.msk [vmem:[%s18363_s10 + $0x10] sm:$0xff] %vm279_vm0, %v11082_v51  ;;  %v11036_v54 = vadd.f32 %v14514_v61, %v18355_v46  ;;  %v14446_v56 = vpop.f32.mrb[30].mxu1 }
 0x833   : > { %v11085_v18 = vmax.f32 %v11037_v10, 0.0  ;;  %v14515_v3 = vadd.f32 %v14446_v56, %v19000_v40  ;;  %v10768_v57 = vpop.f32.mrb[31].mxu1 }
 0x834   : > { %v11084_v25 = vmax.f32 %v11036_v54, 0.0  ;;  %v14516_v30 = vadd.f32 %v10768_v57, %v19001_v8  ;;  %v19012_v54 = vld [vmem:[#allocation62_spill] sm:$0xff] }
 0x835   : > { %11133 = vst.msk [vmem:[%s18363_s10 + $0x28] sm:$0xff] %vm279_vm0, %v11085_v18  ;;  %v11039_v14 = vadd.f32 %v14515_v3, %v18355_v46  ;;  %v19013_v3 = vld [vmem:[#allocation64_spill] sm:$0xff] }
 0x836   : > { %11132 = vst.msk [vmem:[%s18363_s10 + $0x20] sm:$0xff] %vm279_vm0, %v11084_v25  ;;  %v11038_v12 = vadd.f32 %v14516_v30, %v18355_v46  ;;  %v14449_v27 = vpop.f32.mrb[32].mxu1 }
 0x837   : > { %v11087_v29 = vmax.f32 %v11039_v14, 0.0  ;;  %v14517_v19 = vadd.f32 %v14449_v27, %v19002_v5  ;;  %v10778_v7 = vpop.f32.mrb[33].mxu1 }
 0x838   : > { %v11086_v16 = vmax.f32 %v11038_v12, 0.0  ;;  %v14518_v6 = vadd.f32 %v10778_v7, %v19003_v22  ;;  %v19014_v12 = vld [vmem:[#allocation65_spill] sm:$0xff] }
 0x839   : > { %11135 = vst.msk [vmem:[%s18363_s10 + $0x38] sm:$0xff] %vm279_vm0, %v11087_v29  ;;  %v11041_v53 = vadd.f32 %v14517_v19, %v18355_v46  ;;  %v19015_v19 = vld [vmem:[#allocation66_spill] sm:$0xff] }
 0x83a   : > { %11134 = vst.msk [vmem:[%s18363_s10 + $0x30] sm:$0xff] %vm279_vm0, %v11086_v16  ;;  %v11040_v1 = vadd.f32 %v14518_v6, %v18355_v46  ;;  %v14452_v62 = vpop.f32.mrb[34].mxu1 }
 0x83b   : > { %v11089_v20 = vmax.f32 %v11041_v53, 0.0  ;;  %v14519_v60 = vadd.f32 %v14452_v62, %v19004_v45  ;;  %v10788_v21 = vpop.f32.mrb[35].mxu1 }
 0x83c   : > { %v11088_v37 = vmax.f32 %v11040_v1, 0.0  ;;  %v14520_v48 = vadd.f32 %v10788_v21, %v19005_v47  ;;  %v19016_v1 = vld [vmem:[#allocation68_spill] sm:$0xff] }
 0x83d   : > { %11137 = vst.msk [vmem:[%s18363_s10 + $0x48] sm:$0xff] %vm279_vm0, %v11089_v20  ;;  %v11043_v13 = vadd.f32 %v14519_v60, %v18355_v46  ;;  %v19017_v60 = vld [vmem:[#allocation69_spill] sm:$0xff] }
 0x83e   : > { %11136 = vst.msk [vmem:[%s18363_s10 + $0x40] sm:$0xff] %vm279_vm0, %v11088_v37  ;;  %v11042_v9 = vadd.f32 %v14520_v48, %v18355_v46  ;;  %v14455_v55 = vpop.f32.mrb[36].mxu1 }
 0x83f   : > { %v11091_v17 = vmax.f32 %v11043_v13, 0.0  ;;  %v14521_v2 = vadd.f32 %v14455_v55, %v19006_v11  ;;  %v10798_v0 = vpop.f32.mrb[37].mxu1 }
 0x840   : > { %v11090_v50 = vmax.f32 %v11042_v9, 0.0  ;;  %v14522_v41 = vadd.f32 %v10798_v0, %v19007_v28 }
 0x841   : > { %11139 = vst.msk [vmem:[%s18363_s10 + $0x58] sm:$0xff] %vm279_vm0, %v11091_v17  ;;  %v11045_v26 = vadd.f32 %v14521_v2, %v18355_v46 }
 0x842   : > { %11138 = vst.msk [vmem:[%s18363_s10 + $0x50] sm:$0xff] %vm279_vm0, %v11090_v50  ;;  %v11044_v24 = vadd.f32 %v14522_v41, %v18355_v46  ;;  %v14458_v4 = vpop.f32.mrb[38].mxu1 }
 0x843   : > { %v11093_v33 = vmax.f32 %v11045_v26, 0.0  ;;  %v14523_v49 = vadd.f32 %v14458_v4, %v19008_v59  ;;  %v10808_v31 = vpop.f32.mrb[39].mxu1 }
 0x844   : > { %v11092_v43 = vmax.f32 %v11044_v24, 0.0  ;;  %v14524_v34 = vadd.f32 %v10808_v31, %v19009_v32 }
 0x845   : > { %11141 = vst.msk [vmem:[%s18363_s10 + $0x68] sm:$0xff] %vm279_vm0, %v11093_v33  ;;  %v11047_v35 = vadd.f32 %v14523_v49, %v18355_v46 }
 0x846   : > { %11140 = vst.msk [vmem:[%s18363_s10 + $0x60] sm:$0xff] %vm279_vm0, %v11092_v43  ;;  %v11046_v36 = vadd.f32 %v14524_v34, %v18355_v46  ;;  %v14461_v58 = vpop.f32.mrb[40].mxu1 }
 0x847   : > { %v11095_v52 = vmax.f32 %v11047_v35, 0.0  ;;  %v14525_v23 = vadd.f32 %v14461_v58, %v19010_v44  ;;  %v10818_v38 = vpop.f32.mrb[41].mxu1 }
 0x848   : > { %v11094_v42 = vmax.f32 %v11046_v36, 0.0  ;;  %v14526_v63 = vadd.f32 %v10818_v38, %v19011_v39 }
 0x849   : > { %11143 = vst.msk [vmem:[%s18363_s10 + $0x78] sm:$0xff] %vm279_vm0, %v11095_v52  ;;  %v11049_v51 = vadd.f32 %v14525_v23, %v18355_v46 }
 0x84a   : > { %11142 = vst.msk [vmem:[%s18363_s10 + $0x70] sm:$0xff] %vm279_vm0, %v11094_v42  ;;  %v11048_v15 = vadd.f32 %v14526_v63, %v18355_v46  ;;  %v14464_v61 = vpop.f32.mrb[42].mxu1 }
 0x84b   : > { %v11097_v10 = vmax.f32 %v11049_v51, 0.0  ;;  %v14527_v56 = vadd.f32 %v14464_v61, %v19012_v54  ;;  %v10828_v18 = vpop.f32.mrb[43].mxu1 }
 0x84c   : > { %v11096_v40 = vmax.f32 %v11048_v15, 0.0  ;;  %v14528_v57 = vadd.f32 %v10828_v18, %v19013_v3 }
 0x84d   : > { %11145 = vst.msk [vmem:[%s18363_s10 + $0x88] sm:$0xff] %vm279_vm0, %v11097_v10  ;;  %v11051_v25 = vadd.f32 %v14527_v56, %v18355_v46 }
 0x84e   : > { %11144 = vst.msk [vmem:[%s18363_s10 + $0x80] sm:$0xff] %vm279_vm0, %v11096_v40  ;;  %v11050_v8 = vadd.f32 %v14528_v57, %v18355_v46  ;;  %v14467_v30 = vpop.f32.mrb[44].mxu1 }
 0x84f   : > { %v11099_v14 = vmax.f32 %v11051_v25, 0.0  ;;  %v14529_v27 = vadd.f32 %v14467_v30, %v19014_v12  ;;  %v10838_v29 = vpop.f32.mrb[45].mxu1 }
 0x850   : > { %v11098_v5 = vmax.f32 %v11050_v8, 0.0  ;;  %v14530_v7 = vadd.f32 %v10838_v29, %v19015_v19 }
 0x851   : > { %11147 = vst.msk [vmem:[%s18363_s10 + $0x98] sm:$0xff] %vm279_vm0, %v11099_v14  ;;  %v11053_v16 = vadd.f32 %v14529_v27, %v18355_v46 }
 0x852   : > { %11146 = vst.msk [vmem:[%s18363_s10 + $0x90] sm:$0xff] %vm279_vm0, %v11098_v5  ;;  %v11052_v22 = vadd.f32 %v14530_v7, %v18355_v46  ;;  %v14470_v6 = vpop.f32.mrb[46].mxu1 }
 0x853   : > { %v11101_v53 = vmax.f32 %v11053_v16, 0.0  ;;  %v14531_v62 = vadd.f32 %v14470_v6, %v19016_v1  ;;  %v10848_v20 = vpop.f32.mrb[47].mxu1 }
 0x854   : > { %v11100_v45 = vmax.f32 %v11052_v22, 0.0  ;;  %v14532_v21 = vadd.f32 %v10848_v20, %v19017_v60 }
 0x855   : > { %11149 = vst.msk [vmem:[%s18363_s10 + $0xa8] sm:$0xff] %vm279_vm0, %v11101_v53  ;;  %v11055_v37 = vadd.f32 %v14531_v62, %v18355_v46 }
 0x856   : > { %11148 = vst.msk [vmem:[%s18363_s10 + $0xa0] sm:$0xff] %vm279_vm0, %v11100_v45  ;;  %v11054_v47 = vadd.f32 %v14532_v21, %v18355_v46  ;;  %v14473_v48 = vpop.f32.mrb[0].mxu1 }
 0x857   : > { %v11103_v13 = vmax.f32 %v11055_v37, 0.0  ;;  %v11057_v9 = vadd.f32 %v14473_v48, %v18355_v46  ;;  %v10858_v55 = vpop.f32.mrb[1].mxu1 }
 0x858   : > { %v11102_v17 = vmax.f32 %v11054_v47, 0.0  ;;  %v11056_v11 = vadd.f32 %v18355_v46, %v10858_v55 }
 0x859   : > { %11151 = vst.msk [vmem:[%s18363_s10 + $0xb8] sm:$0xff] %vm279_vm0, %v11103_v13  ;;  %v11105_v2 = vmax.f32 %v11057_v9, 0.0 }
 0x85a   : > { %11150 = vst.msk [vmem:[%s18363_s10 + $0xb0] sm:$0xff] %vm279_vm0, %v11102_v17  ;;  %v11104_v0 = vmax.f32 %v11056_v11, 0.0  ;;  %v14476_v50 = vpop.f32.mrb[2].mxu1 }
 0x85b   : > { %11153 = vst.msk [vmem:[%s18363_s10 + $0xc8] sm:$0xff] %vm279_vm0, %v11105_v2  ;;  %v11059_v28 = vadd.f32 %v14476_v50, %v18355_v46  ;;  %v10868_v41 = vpop.f32.mrb[3].mxu1 }
 0x85c   : > { %11152 = vst.msk [vmem:[%s18363_s10 + $0xc0] sm:$0xff] %vm279_vm0, %v11104_v0  ;;  %v11058_v26 = vadd.f32 %v18355_v46, %v10868_v41 }
 0x85d   : > { %v11107_v24 = vmax.f32 %v11059_v28, 0.0 }
 0x85e   : > { %v11106_v4 = vmax.f32 %v11058_v26, 0.0  ;;  %v14479_v33 = vpop.f32.mrb[4].mxu1 }
 0x85f   : > { %11155 = vst.msk [vmem:[%s18363_s10 + $0xd8] sm:$0xff] %vm279_vm0, %v11107_v24  ;;  %v11061_v59 = vadd.f32 %v14479_v33, %v18355_v46  ;;  %v10878_v49 = vpop.f32.mrb[5].mxu1 }
 0x860   : > { %11154 = vst.msk [vmem:[%s18363_s10 + $0xd0] sm:$0xff] %vm279_vm0, %v11106_v4  ;;  %v11060_v31 = vadd.f32 %v18355_v46, %v10878_v49 }
 0x861   : > { %v11109_v43 = vmax.f32 %v11061_v59, 0.0 }
 0x862   : > { %v11108_v32 = vmax.f32 %v11060_v31, 0.0  ;;  %v14482_v34 = vpop.f32.mrb[6].mxu1 }
 0x863   : > { %11157 = vst.msk [vmem:[%s18363_s10 + $0xe8] sm:$0xff] %vm279_vm0, %v11109_v43  ;;  %v11063_v35 = vadd.f32 %v14482_v34, %v18355_v46  ;;  %v10888_v36 = vpop.f32.mrb[7].mxu1 }
 0x864   : > { %11156 = vst.msk [vmem:[%s18363_s10 + $0xe0] sm:$0xff] %vm279_vm0, %v11108_v32  ;;  %v11062_v58 = vadd.f32 %v18355_v46, %v10888_v36 }
 0x865   : > { %v11111_v52 = vmax.f32 %v11063_v35, 0.0 }
 0x866   : > { %v11110_v44 = vmax.f32 %v11062_v58, 0.0  ;;  %v14485_v23 = vpop.f32.mrb[8].mxu1 }
 0x867   : > { %11159 = vst.msk [vmem:[%s18363_s10 + $0xf8] sm:$0xff] %vm279_vm0, %v11111_v52  ;;  %v11065_v38 = vadd.f32 %v14485_v23, %v18355_v46  ;;  %v10898_v42 = vpop.f32.mrb[9].mxu1 }
 0x868   : > { %11158 = vst.msk [vmem:[%s18363_s10 + $0xf0] sm:$0xff] %vm279_vm0, %v11110_v44  ;;  %v11064_v39 = vadd.f32 %v18355_v46, %v10898_v42 }
 0x869   : > { %v11113_v63 = vmax.f32 %v11065_v38, 0.0 }
 0x86a   : > { %v11112_v51 = vmax.f32 %v11064_v39, 0.0  ;;  %v14488_v15 = vpop.f32.mrb[10].mxu1 }
 0x86b   : > { %11161 = vst.msk [vmem:[%s18363_s10 + $0x108] sm:$0xff] %vm279_vm0, %v11113_v63  ;;  %v11067_v61 = vadd.f32 %v14488_v15, %v18355_v46  ;;  %v10908_v10 = vpop.f32.mrb[11].mxu1 }
 0x86c   : > { %11160 = vst.msk [vmem:[%s18363_s10 + $0x100] sm:$0xff] %vm279_vm0, %v11112_v51  ;;  %v11066_v54 = vadd.f32 %v18355_v46, %v10908_v10 }
 0x86d   : > { %v11115_v56 = vmax.f32 %v11067_v61, 0.0 }
 0x86e   : > { %v11114_v18 = vmax.f32 %v11066_v54, 0.0  ;;  %v14491_v40 = vpop.f32.mrb[12].mxu1 }
 0x86f   : > { %11163 = vst.msk [vmem:[%s18363_s10 + $0x118] sm:$0xff] %vm279_vm0, %v11115_v56  ;;  %v11069_v3 = vadd.f32 %v14491_v40, %v18355_v46  ;;  %v10918_v57 = vpop.f32.mrb[13].mxu1 }
 0x870   : > { %11162 = vst.msk [vmem:[%s18363_s10 + $0x110] sm:$0xff] %vm279_vm0, %v11114_v18  ;;  %v11068_v25 = vadd.f32 %v18355_v46, %v10918_v57 }
 0x871   : > { %v11117_v8 = vmax.f32 %v11069_v3, 0.0 }
 0x872   : > { %v11116_v30 = vmax.f32 %v11068_v25, 0.0  ;;  %v14494_v14 = vpop.f32.mrb[14].mxu1 }
 0x873   : > { %11165 = vst.msk [vmem:[%s18363_s10 + $0x128] sm:$0xff] %vm279_vm0, %v11117_v8  ;;  %v11071_v12 = vadd.f32 %v14494_v14, %v18355_v46  ;;  %v10928_v27 = vpop.f32.mrb[15].mxu1 }
 0x874   : > { %11164 = vst.msk [vmem:[%s18363_s10 + $0x120] sm:$0xff] %vm279_vm0, %v11116_v30  ;;  %v11070_v29 = vadd.f32 %v18355_v46, %v10928_v27 }
 0x875   : > { %v11119_v5 = vmax.f32 %v11071_v12, 0.0 }
 0x876   : > { %v11118_v19 = vmax.f32 %v11070_v29, 0.0  ;;  %v14497_v7 = vpop.f32.mrb[16].mxu1 }
 0x877   : > { %11167 = vst.msk [vmem:[%s18363_s10 + $0x138] sm:$0xff] %vm279_vm0, %v11119_v5  ;;  %v11073_v16 = vadd.f32 %v14497_v7, %v18355_v46  ;;  %v10938_v22 = vpop.f32.mrb[17].mxu1 }
 0x878   : > { %11166 = vst.msk [vmem:[%s18363_s10 + $0x130] sm:$0xff] %vm279_vm0, %v11118_v19  ;;  %v11072_v6 = vadd.f32 %v18355_v46, %v10938_v22 }
 0x879   : > { %v11121_v53 = vmax.f32 %v11073_v16, 0.0 }
 0x87a   : > { %v11120_v1 = vmax.f32 %v11072_v6, 0.0  ;;  %v14500_v62 = vpop.f32.mrb[18].mxu1 }
 0x87b   : > { %11169 = vst.msk [vmem:[%s18363_s10 + $0x148] sm:$0xff] %vm279_vm0, %v11121_v53  ;;  %v11075_v20 = vadd.f32 %v14500_v62, %v18355_v46  ;;  %v10948_v45 = vpop.f32.mrb[19].mxu1 }
 0x87c   : > { %11168 = vst.msk [vmem:[%s18363_s10 + $0x140] sm:$0xff] %vm279_vm0, %v11120_v1  ;;  %v11074_v60 = vadd.f32 %v18355_v46, %v10948_v45 }
 0x87d   : > { %v11123_v21 = vmax.f32 %v11075_v20, 0.0 }
 0x87e   : > { %v11122_v37 = vmax.f32 %v11074_v60, 0.0  ;;  %v14503_v47 = vpop.f32.mrb[20].mxu1 }
 0x87f   : > { %11171 = vst.msk [vmem:[%s18363_s10 + $0x158] sm:$0xff] %vm279_vm0, %v11123_v21  ;;  %v11077_v48 = vadd.f32 %v14503_v47, %v18355_v46  ;;  %v10958_v13 = vpop.f32.mrb[21].mxu1 }
 0x880   : > { %11170 = vst.msk [vmem:[%s18363_s10 + $0x150] sm:$0xff] %vm279_vm0, %v11122_v37  ;;  %v11076_v9 = vadd.f32 %v18355_v46, %v10958_v13 }
 0x881   : > { %v11125_v55 = vmax.f32 %v11077_v48, 0.0 }
 0x882   : > { %v11124_v17 = vmax.f32 %v11076_v9, 0.0  ;;  %v14506_v11 = vpop.f32.mrb[22].mxu1 }
 0x883   : > { %11173 = vst.msk [vmem:[%s18363_s10 + $0x168] sm:$0xff] %vm279_vm0, %v11125_v55  ;;  %v11079_v2 = vadd.f32 %v14506_v11, %v18355_v46  ;;  %v10968_v0 = vpop.f32.mrb[23].mxu1 }
 0x884   : > { %11172 = vst.msk [vmem:[%s18363_s10 + $0x160] sm:$0xff] %vm279_vm0, %v11124_v17  ;;  %v11078_v50 = vadd.f32 %v18355_v46, %v10968_v0 }
 0x885   : > { %v11127_v28 = vmax.f32 %v11079_v2, 0.0 }
 0x886   : > { %v11126_v41 = vmax.f32 %v11078_v50, 0.0 }
 0x887   : > { %11175 = vst.msk [vmem:[%s18363_s10 + $0x178] sm:$0xff] %vm279_vm0, %v11127_v28 }
 0x888   : > { %11174 = vst.msk [vmem:[%s18363_s10 + $0x170] sm:$0xff] %vm279_vm0, %v11126_v41 }
 0x889 PF: > { %s17_s24 = sadd.s32 1, %s15345_s24  }
 0x88a   : > { %p14_p4 = scmp.ge.s32.totalorder %s17_s24, 4  }
 0x88c   :  { %16 = sbr.rel (!%p14_p4) target bundleno = 1 (0x1), region = 94 }

</bundles_post_ra>
